<compile_context>
chip_gen: v7x
topology: tpu7x:2x2x1
jax: 0.10.0
libtpu: 0.0.40
codegen_flags: <defaults>
</compile_context>

<pallas_src>
import jax
import jax.numpy as jnp
from jax.experimental import pallas as pl
from jax.experimental.pallas import tpu as pltpu


HEAD_OUT_DIM = 2        # real logits per class head
HEAD_OUT_PAD = 128      # lane-dense padded output width


# ---------------------------------------------------------------------------
# Fused kernel: surrogate backbone (pool + 1x1 proj) + packed MLP heads.
# One grid step handles NH/n_split heads.
# ---------------------------------------------------------------------------
def _fused_kernel(x_ref, wproj_ref, w1_ref, b1_ref, w2_ref, b2_ref,
                  w3_ref, b3_ref, w4_ref, b4_ref, out_ref):
    nh_per, d1, _ = w2_ref.shape                 # (heads per step, 384, 48)

    # --- surrogate backbone: global average pool (lane reduction) + 1x1 proj.
    x = x_ref[...]                                # (B, C, HW) f32, HW in lanes
    x_mean = jnp.mean(x, axis=-1)                 # (B, C)
    feat = jnp.dot(x_mean, wproj_ref[...],
                   preferred_element_type=jnp.float32)          # (B, F) f32

    # --- packed layer 1: one lane-dense bf16 matmul over this step's heads.
    feat_bf16 = feat.astype(jnp.bfloat16)
    h1 = jnp.dot(feat_bf16, w1_ref[...],
                 preferred_element_type=jnp.float32)            # (B, nh_per*384)
    h1 = jnp.maximum(h1 + b1_ref[...], 0.0)                     # f32 elementwise

    # --- layers 2-4 per head (tiny; statically unrolled).
    for n in range(nh_per):
        h = h1[:, n * d1:(n + 1) * d1]                          # (B, 384) lane-aligned
        h = jnp.maximum(
            jnp.dot(h, w2_ref[n], preferred_element_type=jnp.float32)
            + b2_ref[n], 0.0)                                   # (B, 48)
        h = jnp.maximum(
            jnp.dot(h, w3_ref[n], preferred_element_type=jnp.float32)
            + b3_ref[n], 0.0)                                   # (B, 48)
        y = (jnp.dot(h, w4_ref[n], preferred_element_type=jnp.float32)
             + b4_ref[n])                                       # (B, 128) lane-dense
        out_ref[n] = y.astype(out_ref.dtype)                    # dense store


def maxvit_heads_forward(x_bchw, params):
    """x_bchw: [B, C, HW] f32.  Returns padded logits [NH, B, HEAD_OUT_PAD]."""
    B, C, HW = x_bchw.shape
    w_proj = params["w_proj"]
    F = w_proj.shape[1]
    w1p, b1p = params["w1"], params["b1"]        # (F, NH*384) bf16, (1, NH*384) f32
    w2, b2 = params["w2"], params["b2"]          # (NH, 384, 48), (NH, 1, 48)
    w3, b3 = params["w3"], params["b3"]          # (NH, 48, 48),  (NH, 1, 48)
    w4p, b4p = params["w4"], params["b4"]        # (NH, 48, 128), (NH, 1, 128)

    NH, D1, D2 = w2.shape
    D3 = w3.shape[2]
    DOUT = w4p.shape[2]
    n_split = 2 if NH % 2 == 0 else 1            # 2 groups -> both v7x TCs busy
    nh_per = NH // n_split

    out = pl.pallas_call(
        _fused_kernel,
        out_shape=jax.ShapeDtypeStruct((NH, B, DOUT), jnp.float32),
        grid=(n_split,),
        in_specs=[
            pl.BlockSpec((B, C, HW), lambda g: (0, 0, 0)),          # x (shared)
            pl.BlockSpec((C, F), lambda g: (0, 0)),                 # w_proj (shared)
            pl.BlockSpec((F, nh_per * D1), lambda g: (0, g)),       # packed w1 (bf16)
            pl.BlockSpec((1, nh_per * D1), lambda g: (0, g)),       # packed b1
            pl.BlockSpec((nh_per, D1, D2), lambda g: (g, 0, 0)),    # w2
            pl.BlockSpec((nh_per, 1, D2), lambda g: (g, 0, 0)),     # b2
            pl.BlockSpec((nh_per, D2, D3), lambda g: (g, 0, 0)),    # w3
            pl.BlockSpec((nh_per, 1, D3), lambda g: (g, 0, 0)),     # b3
            pl.BlockSpec((nh_per, D3, DOUT), lambda g: (g, 0, 0)),  # w4 (padded)
            pl.BlockSpec((nh_per, 1, DOUT), lambda g: (g, 0, 0)),   # b4 (padded)
        ],
        out_specs=pl.BlockSpec((nh_per, B, DOUT), lambda g: (g, 0, 0)),
        compiler_params=pltpu.CompilerParams(
            dimension_semantics=("parallel",),
            vmem_limit_bytes=32 * 1024 * 1024,   # actual footprint ~8 MiB; safe on v5e/v6e/v7x
        ),
    )(x_bchw, w_proj, w1p, b1p, w2, b2, w3, b3, w4p, b4p)
    return out


# ---------------------------------------------------------------------------
# Parameter init (packed / padded layouts produced once, up-front)
# ---------------------------------------------------------------------------
def init_params(key, in_chans, num_features, num_classes,
                d1=384, d2=48, d3=48, d_out=HEAD_OUT_DIM, out_pad=HEAD_OUT_PAD):
    ks = jax.random.split(key, 9)
    scale = 0.02
    w_proj = scale * jax.random.normal(ks[0], (in_chans, num_features), jnp.float32)
    w1 = scale * jax.random.normal(ks[1], (num_classes, num_features, d1), jnp.float32)
    b1 = scale * jax.random.normal(ks[2], (num_classes, 1, d1), jnp.float32)
    w2 = scale * jax.random.normal(ks[3], (num_classes, d1, d2), jnp.float32)
    b2 = scale * jax.random.normal(ks[4], (num_classes, 1, d2), jnp.float32)
    w3 = scale * jax.random.normal(ks[5], (num_classes, d2, d3), jnp.float32)
    b3 = scale * jax.random.normal(ks[6], (num_classes, 1, d3), jnp.float32)
    w4 = scale * jax.random.normal(ks[7], (num_classes, d3, d_out), jnp.float32)
    b4 = scale * jax.random.normal(ks[8], (num_classes, 1, d_out), jnp.float32)

    # Pack layer-1 across heads -> one lane-dense (F, NH*384) bf16 matrix.
    w1_packed = jnp.transpose(w1, (1, 0, 2)).reshape(num_features, num_classes * d1)
    w1_packed = w1_packed.astype(jnp.bfloat16)
    b1_packed = b1.reshape(1, num_classes * d1)
    # Pad the 2-wide output layer to 128 lanes (dense stores / dense writeback).
    w4_padded = jnp.pad(w4, ((0, 0), (0, 0), (0, out_pad - d_out)))
    b4_padded = jnp.pad(b4, ((0, 0), (0, 0), (0, out_pad - d_out)))

    return {
        "w_proj": w_proj,
        "w1": w1_packed, "b1": b1_packed,
        "w2": w2, "b2": b2,
        "w3": w3, "b3": b3,
        "w4": w4_padded, "b4": b4_padded,
    }


# ---------------------------------------------------------------------------
# Forward + pure-JAX reference
# ---------------------------------------------------------------------------
@jax.jit
def forward(x_nchw, params):
    B, C, H, W = x_nchw.shape
    x_bchw = x_nchw.reshape(B, C, H * W)                 # HW in the lane dim
    out_padded = maxvit_heads_forward(x_bchw, params)    # (NH, B, 128)
    return out_padded[:, :, :HEAD_OUT_DIM]               # (NH, B, 2)


def forward_reference(x_nchw, params):
    """Pure-JAX reference of the same computation (incl. bf16 layer-1)."""
    B, C, H, W = x_nchw.shape
    x_mean = x_nchw.reshape(B, C, H * W).mean(axis=-1)   # (B, C)
    feat = x_mean @ params["w_proj"]                     # (B, F)
    h1 = jnp.dot(feat.astype(jnp.bfloat16), params["w1"],
                 preferred_element_type=jnp.float32) + params["b1"]
    h1 = jnp.maximum(h1, 0.0)                            # (B, NH*384)
    NH, D1, _ = params["w2"].shape
    h1 = h1.reshape(B, NH, D1).transpose(1, 0, 2)        # (NH, B, 384)
    h2 = jnp.maximum(jnp.einsum("nbf,nfo->nbo", h1, params["w2"]) + params["b2"], 0.0)
    h3 = jnp.maximum(jnp.einsum("nbf,nfo->nbo", h2, params["w3"]) + params["b3"], 0.0)
    y = jnp.einsum("nbf,nfo->nbo", h3, params["w4"]) + params["b4"]
    return y[:, :, :HEAD_OUT_DIM]


if __name__ == "__main__":
    B, C, H, W = 2, 3, 16, 16
    NUM_FEATURES = 512     # maxvit_tiny num_features
    NUM_CLASSES = 14
    key = jax.random.PRNGKey(0)
    k_x, k_p = jax.random.split(key)

    x = jax.random.normal(k_x, (B, C, H, W), jnp.float32)
    params = init_params(k_p, C, NUM_FEATURES, NUM_CLASSES)

    out = forward(x, params)
    out = jax.block_until_ready(out)

    ref = forward_reference(x, params)
    assert out.shape == (NUM_CLASSES, B, HEAD_OUT_DIM), out.shape
    assert jnp.allclose(out, ref, rtol=1e-3, atol=1e-5), \
        float(jnp.max(jnp.abs(out - ref)))

    # Return value matching the PyTorch module: a list of 14 arrays of [B, 2].
    y = [out[i] for i in range(NUM_CLASSES)]
    assert len(y) == NUM_CLASSES and y[0].shape == (B, HEAD_OUT_DIM)

    print("KERNEL_OK")
</pallas_src>

<mosaic_0001>
module attributes {stable_mosaic.version = 11 : i64} {
  func.func @_fused_kernel(%arg0: i32, %arg1: memref<2x3x256xf32, #tpu.memory_space<vmem>>, %arg2: memref<3x512xf32, #tpu.memory_space<vmem>>, %arg3: memref<512x2688xbf16, #tpu.memory_space<vmem>>, %arg4: memref<1x2688xf32, #tpu.memory_space<vmem>>, %arg5: memref<7x384x48xf32, #tpu.memory_space<vmem>>, %arg6: memref<7x1x48xf32, #tpu.memory_space<vmem>>, %arg7: memref<7x48x48xf32, #tpu.memory_space<vmem>>, %arg8: memref<7x1x48xf32, #tpu.memory_space<vmem>>, %arg9: memref<7x48x128xf32, #tpu.memory_space<vmem>>, %arg10: memref<7x1x128xf32, #tpu.memory_space<vmem>>, %arg11: memref<7x2x128xf32, #tpu.memory_space<vmem>>) attributes {dimension_semantics = [#tpu.dimension_semantics<parallel>], iteration_bounds = array<i64: 2>, scalar_prefetch = 0 : i64, scratch_operands = 0 : i64, tpu.core_type = #tpu.core_type<tc>, window_params = [{pipeline_mode = #tpu.pipeline_mode<synchronous>, transform_indices = @transform_0, window_bounds = array<i64: 2, 3, 256>}, {pipeline_mode = #tpu.pipeline_mode<synchronous>, transform_indices = @transform_1, window_bounds = array<i64: 3, 512>}, {transform_indices = @transform_2, window_bounds = array<i64: 512, 2688>}, {transform_indices = @transform_3, window_bounds = array<i64: 1, 2688>}, {transform_indices = @transform_4, window_bounds = array<i64: 7, 384, 48>}, {transform_indices = @transform_5, window_bounds = array<i64: 7, 1, 48>}, {transform_indices = @transform_6, window_bounds = array<i64: 7, 48, 48>}, {transform_indices = @transform_7, window_bounds = array<i64: 7, 1, 48>}, {transform_indices = @transform_8, window_bounds = array<i64: 7, 48, 128>}, {transform_indices = @transform_9, window_bounds = array<i64: 7, 1, 128>}, {transform_indices = @transform_10, window_bounds = array<i64: 7, 2, 128>}]} {
    %c0 = arith.constant 0 : index
    %c0_0 = arith.constant 0 : index
    %c0_1 = arith.constant 0 : index
    %0 = vector.load %arg1[%c0, %c0_0, %c0_1] : memref<2x3x256xf32, #tpu.memory_space<vmem>>, vector<2x3x256xf32>
    %cst = arith.constant dense<0.000000e+00> : vector<2x3xf32>
    %1 = vector.multi_reduction <add>, %0, %cst [2] : vector<2x3x256xf32> to vector<2x3xf32>
    %cst_2 = arith.constant 2.560000e+02 : f32
    %2 = vector.broadcast %cst_2 : f32 to vector<2x3xf32>
    %3 = arith.divf %1, %2 : vector<2x3xf32>
    %c0_3 = arith.constant 0 : index
    %c0_4 = arith.constant 0 : index
    %4 = vector.load %arg2[%c0_3, %c0_4] : memref<3x512xf32, #tpu.memory_space<vmem>>, vector<3x512xf32>
    %cst_5 = arith.constant dense<0.000000e+00> : vector<2x512xf32>
    %5 = tpu.matmul %3, %4, %cst_5 {dimension_numbers = #tpu.dot_dimension_numbers<[1], [0], [0], [1], [0, 0, 1, 1], [], []>} : vector<2x3xf32>, vector<3x512xf32>, vector<2x512xf32> -> vector<2x512xf32>
    %6 = arith.truncf %5 : vector<2x512xf32> to vector<2x512xbf16>
    %c0_6 = arith.constant 0 : index
    %c0_7 = arith.constant 0 : index
    %7 = vector.load %arg3[%c0_6, %c0_7] : memref<512x2688xbf16, #tpu.memory_space<vmem>>, vector<512x2688xbf16>
    %cst_8 = arith.constant dense<0.000000e+00> : vector<2x2688xf32>
    %8 = tpu.matmul %6, %7, %cst_8 {dimension_numbers = #tpu.dot_dimension_numbers<[1], [0], [0], [1], [0, 0, 1, 1], [], []>} : vector<2x512xbf16>, vector<512x2688xbf16>, vector<2x2688xf32> -> vector<2x2688xf32>
    %c0_9 = arith.constant 0 : index
    %c0_10 = arith.constant 0 : index
    %9 = vector.load %arg4[%c0_9, %c0_10] : memref<1x2688xf32, #tpu.memory_space<vmem>>, vector<1x2688xf32>
    %10 = vector.broadcast %9 : vector<1x2688xf32> to vector<2x2688xf32>
    %11 = arith.addf %8, %10 : vector<2x2688xf32>
    %cst_11 = arith.constant 0.000000e+00 : f32
    %12 = vector.broadcast %cst_11 : f32 to vector<2x2688xf32>
    %13 = arith.maximumf %11, %12 : vector<2x2688xf32>
    %14 = vector.extract_strided_slice %13 {offsets = [0, 0], sizes = [2, 384], strides = [1, 1]} : vector<2x2688xf32> to vector<2x384xf32>
    %c0_12 = arith.constant 0 : index
    %c0_13 = arith.constant 0 : index
    %c0_14 = arith.constant 0 : index
    %15 = vector.load %arg5[%c0_12, %c0_13, %c0_14] : memref<7x384x48xf32, #tpu.memory_space<vmem>>, vector<1x384x48xf32>
    %16 = vector.shape_cast %15 : vector<1x384x48xf32> to vector<384x48xf32>
    %cst_15 = arith.constant dense<0.000000e+00> : vector<2x48xf32>
    %17 = tpu.matmul %14, %16, %cst_15 {dimension_numbers = #tpu.dot_dimension_numbers<[1], [0], [0], [1], [0, 0, 1, 1], [], []>} : vector<2x384xf32>, vector<384x48xf32>, vector<2x48xf32> -> vector<2x48xf32>
    %c0_16 = arith.constant 0 : index
    %c0_17 = arith.constant 0 : index
    %c0_18 = arith.constant 0 : index
    %18 = vector.load %arg6[%c0_16, %c0_17, %c0_18] : memref<7x1x48xf32, #tpu.memory_space<vmem>>, vector<1x1x48xf32>
    %19 = vector.shape_cast %18 : vector<1x1x48xf32> to vector<1x48xf32>
    %20 = vector.broadcast %19 : vector<1x48xf32> to vector<2x48xf32>
    %21 = arith.addf %17, %20 : vector<2x48xf32>
    %cst_19 = arith.constant 0.000000e+00 : f32
    %22 = vector.broadcast %cst_19 : f32 to vector<2x48xf32>
    %23 = arith.maximumf %21, %22 : vector<2x48xf32>
    %c0_20 = arith.constant 0 : index
    %c0_21 = arith.constant 0 : index
    %c0_22 = arith.constant 0 : index
    %24 = vector.load %arg7[%c0_20, %c0_21, %c0_22] : memref<7x48x48xf32, #tpu.memory_space<vmem>>, vector<1x48x48xf32>
    %25 = vector.shape_cast %24 : vector<1x48x48xf32> to vector<48x48xf32>
    %cst_23 = arith.constant dense<0.000000e+00> : vector<2x48xf32>
    %26 = tpu.matmul %23, %25, %cst_23 {dimension_numbers = #tpu.dot_dimension_numbers<[1], [0], [0], [1], [0, 0, 1, 1], [], []>} : vector<2x48xf32>, vector<48x48xf32>, vector<2x48xf32> -> vector<2x48xf32>
    %c0_24 = arith.constant 0 : index
    %c0_25 = arith.constant 0 : index
    %c0_26 = arith.constant 0 : index
    %27 = vector.load %arg8[%c0_24, %c0_25, %c0_26] : memref<7x1x48xf32, #tpu.memory_space<vmem>>, vector<1x1x48xf32>
    %28 = vector.shape_cast %27 : vector<1x1x48xf32> to vector<1x48xf32>
    %29 = vector.broadcast %28 : vector<1x48xf32> to vector<2x48xf32>
    %30 = arith.addf %26, %29 : vector<2x48xf32>
    %cst_27 = arith.constant 0.000000e+00 : f32
    %31 = vector.broadcast %cst_27 : f32 to vector<2x48xf32>
    %32 = arith.maximumf %30, %31 : vector<2x48xf32>
    %c0_28 = arith.constant 0 : index
    %c0_29 = arith.constant 0 : index
    %c0_30 = arith.constant 0 : index
    %33 = vector.load %arg9[%c0_28, %c0_29, %c0_30] : memref<7x48x128xf32, #tpu.memory_space<vmem>>, vector<1x48x128xf32>
    %34 = vector.shape_cast %33 : vector<1x48x128xf32> to vector<48x128xf32>
    %cst_31 = arith.constant dense<0.000000e+00> : vector<2x128xf32>
    %35 = tpu.matmul %32, %34, %cst_31 {dimension_numbers = #tpu.dot_dimension_numbers<[1], [0], [0], [1], [0, 0, 1, 1], [], []>} : vector<2x48xf32>, vector<48x128xf32>, vector<2x128xf32> -> vector<2x128xf32>
    %c0_32 = arith.constant 0 : index
    %c0_33 = arith.constant 0 : index
    %c0_34 = arith.constant 0 : index
    %36 = vector.load %arg10[%c0_32, %c0_33, %c0_34] : memref<7x1x128xf32, #tpu.memory_space<vmem>>, vector<1x1x128xf32>
    %37 = vector.shape_cast %36 : vector<1x1x128xf32> to vector<1x128xf32>
    %38 = vector.broadcast %37 : vector<1x128xf32> to vector<2x128xf32>
    %39 = arith.addf %35, %38 : vector<2x128xf32>
    %c0_35 = arith.constant 0 : index
    %c0_36 = arith.constant 0 : index
    %c0_37 = arith.constant 0 : index
    %40 = vector.load %arg11[%c0_35, %c0_36, %c0_37] : memref<7x2x128xf32, #tpu.memory_space<vmem>>, vector<1x2x128xf32>
    %41 = vector.shape_cast %40 : vector<1x2x128xf32> to vector<2x128xf32>
    %42 = vector.shape_cast %39 : vector<2x128xf32> to vector<1x2x128xf32>
    tpu.vector_store %arg11[%c0_35, %c0_36, %c0_37], %42 {strides = array<i32>} : memref<7x2x128xf32, #tpu.memory_space<vmem>>, vector<1x2x128xf32>,
    %43 = vector.extract_strided_slice %13 {offsets = [0, 384], sizes = [2, 384], strides = [1, 1]} : vector<2x2688xf32> to vector<2x384xf32>
    %c1 = arith.constant 1 : index
    %c0_38 = arith.constant 0 : index
    %c0_39 = arith.constant 0 : index
    %44 = vector.load %arg5[%c1, %c0_38, %c0_39] : memref<7x384x48xf32, #tpu.memory_space<vmem>>, vector<1x384x48xf32>
    %45 = vector.shape_cast %44 : vector<1x384x48xf32> to vector<384x48xf32>
    %cst_40 = arith.constant dense<0.000000e+00> : vector<2x48xf32>
    %46 = tpu.matmul %43, %45, %cst_40 {dimension_numbers = #tpu.dot_dimension_numbers<[1], [0], [0], [1], [0, 0, 1, 1], [], []>} : vector<2x384xf32>, vector<384x48xf32>, vector<2x48xf32> -> vector<2x48xf32>
    %c1_41 = arith.constant 1 : index
    %c0_42 = arith.constant 0 : index
    %c0_43 = arith.constant 0 : index
    %47 = vector.load %arg6[%c1_41, %c0_42, %c0_43] : memref<7x1x48xf32, #tpu.memory_space<vmem>>, vector<1x1x48xf32>
    %48 = vector.shape_cast %47 : vector<1x1x48xf32> to vector<1x48xf32>
    %49 = vector.broadcast %48 : vector<1x48xf32> to vector<2x48xf32>
    %50 = arith.addf %46, %49 : vector<2x48xf32>
    %cst_44 = arith.constant 0.000000e+00 : f32
    %51 = vector.broadcast %cst_44 : f32 to vector<2x48xf32>
    %52 = arith.maximumf %50, %51 : vector<2x48xf32>
    %c1_45 = arith.constant 1 : index
    %c0_46 = arith.constant 0 : index
    %c0_47 = arith.constant 0 : index
    %53 = vector.load %arg7[%c1_45, %c0_46, %c0_47] : memref<7x48x48xf32, #tpu.memory_space<vmem>>, vector<1x48x48xf32>
    %54 = vector.shape_cast %53 : vector<1x48x48xf32> to vector<48x48xf32>
    %cst_48 = arith.constant dense<0.000000e+00> : vector<2x48xf32>
    %55 = tpu.matmul %52, %54, %cst_48 {dimension_numbers = #tpu.dot_dimension_numbers<[1], [0], [0], [1], [0, 0, 1, 1], [], []>} : vector<2x48xf32>, vector<48x48xf32>, vector<2x48xf32> -> vector<2x48xf32>
    %c1_49 = arith.constant 1 : index
    %c0_50 = arith.constant 0 : index
    %c0_51 = arith.constant 0 : index
    %56 = vector.load %arg8[%c1_49, %c0_50, %c0_51] : memref<7x1x48xf32, #tpu.memory_space<vmem>>, vector<1x1x48xf32>
    %57 = vector.shape_cast %56 : vector<1x1x48xf32> to vector<1x48xf32>
    %58 = vector.broadcast %57 : vector<1x48xf32> to vector<2x48xf32>
    %59 = arith.addf %55, %58 : vector<2x48xf32>
    %cst_52 = arith.constant 0.000000e+00 : f32
    %60 = vector.broadcast %cst_52 : f32 to vector<2x48xf32>
    %61 = arith.maximumf %59, %60 : vector<2x48xf32>
    %c1_53 = arith.constant 1 : index
    %c0_54 = arith.constant 0 : index
    %c0_55 = arith.constant 0 : index
    %62 = vector.load %arg9[%c1_53, %c0_54, %c0_55] : memref<7x48x128xf32, #tpu.memory_space<vmem>>, vector<1x48x128xf32>
    %63 = vector.shape_cast %62 : vector<1x48x128xf32> to vector<48x128xf32>
    %cst_56 = arith.constant dense<0.000000e+00> : vector<2x128xf32>
    %64 = tpu.matmul %61, %63, %cst_56 {dimension_numbers = #tpu.dot_dimension_numbers<[1], [0], [0], [1], [0, 0, 1, 1], [], []>} : vector<2x48xf32>, vector<48x128xf32>, vector<2x128xf32> -> vector<2x128xf32>
    %c1_57 = arith.constant 1 : index
    %c0_58 = arith.constant 0 : index
    %c0_59 = arith.constant 0 : index
    %65 = vector.load %arg10[%c1_57, %c0_58, %c0_59] : memref<7x1x128xf32, #tpu.memory_space<vmem>>, vector<1x1x128xf32>
    %66 = vector.shape_cast %65 : vector<1x1x128xf32> to vector<1x128xf32>
    %67 = vector.broadcast %66 : vector<1x128xf32> to vector<2x128xf32>
    %68 = arith.addf %64, %67 : vector<2x128xf32>
    %c1_60 = arith.constant 1 : index
    %c0_61 = arith.constant 0 : index
    %c0_62 = arith.constant 0 : index
    %69 = vector.load %arg11[%c1_60, %c0_61, %c0_62] : memref<7x2x128xf32, #tpu.memory_space<vmem>>, vector<1x2x128xf32>
    %70 = vector.shape_cast %69 : vector<1x2x128xf32> to vector<2x128xf32>
    %71 = vector.shape_cast %68 : vector<2x128xf32> to vector<1x2x128xf32>
    tpu.vector_store %arg11[%c1_60, %c0_61, %c0_62], %71 {strides = array<i32>} : memref<7x2x128xf32, #tpu.memory_space<vmem>>, vector<1x2x128xf32>,
    %72 = vector.extract_strided_slice %13 {offsets = [0, 768], sizes = [2, 384], strides = [1, 1]} : vector<2x2688xf32> to vector<2x384xf32>
    %c2 = arith.constant 2 : index
    %c0_63 = arith.constant 0 : index
    %c0_64 = arith.constant 0 : index
    %73 = vector.load %arg5[%c2, %c0_63, %c0_64] : memref<7x384x48xf32, #tpu.memory_space<vmem>>, vector<1x384x48xf32>
    %74 = vector.shape_cast %73 : vector<1x384x48xf32> to vector<384x48xf32>
    %cst_65 = arith.constant dense<0.000000e+00> : vector<2x48xf32>
    %75 = tpu.matmul %72, %74, %cst_65 {dimension_numbers = #tpu.dot_dimension_numbers<[1], [0], [0], [1], [0, 0, 1, 1], [], []>} : vector<2x384xf32>, vector<384x48xf32>, vector<2x48xf32> -> vector<2x48xf32>
    %c2_66 = arith.constant 2 : index
    %c0_67 = arith.constant 0 : index
    %c0_68 = arith.constant 0 : index
    %76 = vector.load %arg6[%c2_66, %c0_67, %c0_68] : memref<7x1x48xf32, #tpu.memory_space<vmem>>, vector<1x1x48xf32>
    %77 = vector.shape_cast %76 : vector<1x1x48xf32> to vector<1x48xf32>
    %78 = vector.broadcast %77 : vector<1x48xf32> to vector<2x48xf32>
    %79 = arith.addf %75, %78 : vector<2x48xf32>
    %cst_69 = arith.constant 0.000000e+00 : f32
    %80 = vector.broadcast %cst_69 : f32 to vector<2x48xf32>
    %81 = arith.maximumf %79, %80 : vector<2x48xf32>
    %c2_70 = arith.constant 2 : index
    %c0_71 = arith.constant 0 : index
    %c0_72 = arith.constant 0 : index
    %82 = vector.load %arg7[%c2_70, %c0_71, %c0_72] : memref<7x48x48xf32, #tpu.memory_space<vmem>>, vector<1x48x48xf32>
    %83 = vector.shape_cast %82 : vector<1x48x48xf32> to vector<48x48xf32>
    %cst_73 = arith.constant dense<0.000000e+00> : vector<2x48xf32>
    %84 = tpu.matmul %81, %83, %cst_73 {dimension_numbers = #tpu.dot_dimension_numbers<[1], [0], [0], [1], [0, 0, 1, 1], [], []>} : vector<2x48xf32>, vector<48x48xf32>, vector<2x48xf32> -> vector<2x48xf32>
    %c2_74 = arith.constant 2 : index
    %c0_75 = arith.constant 0 : index
    %c0_76 = arith.constant 0 : index
    %85 = vector.load %arg8[%c2_74, %c0_75, %c0_76] : memref<7x1x48xf32, #tpu.memory_space<vmem>>, vector<1x1x48xf32>
    %86 = vector.shape_cast %85 : vector<1x1x48xf32> to vector<1x48xf32>
    %87 = vector.broadcast %86 : vector<1x48xf32> to vector<2x48xf32>
    %88 = arith.addf %84, %87 : vector<2x48xf32>
    %cst_77 = arith.constant 0.000000e+00 : f32
    %89 = vector.broadcast %cst_77 : f32 to vector<2x48xf32>
    %90 = arith.maximumf %88, %89 : vector<2x48xf32>
    %c2_78 = arith.constant 2 : index
    %c0_79 = arith.constant 0 : index
    %c0_80 = arith.constant 0 : index
    %91 = vector.load %arg9[%c2_78, %c0_79, %c0_80] : memref<7x48x128xf32, #tpu.memory_space<vmem>>, vector<1x48x128xf32>
    %92 = vector.shape_cast %91 : vector<1x48x128xf32> to vector<48x128xf32>
    %cst_81 = arith.constant dense<0.000000e+00> : vector<2x128xf32>
    %93 = tpu.matmul %90, %92, %cst_81 {dimension_numbers = #tpu.dot_dimension_numbers<[1], [0], [0], [1], [0, 0, 1, 1], [], []>} : vector<2x48xf32>, vector<48x128xf32>, vector<2x128xf32> -> vector<2x128xf32>
    %c2_82 = arith.constant 2 : index
    %c0_83 = arith.constant 0 : index
    %c0_84 = arith.constant 0 : index
    %94 = vector.load %arg10[%c2_82, %c0_83, %c0_84] : memref<7x1x128xf32, #tpu.memory_space<vmem>>, vector<1x1x128xf32>
    %95 = vector.shape_cast %94 : vector<1x1x128xf32> to vector<1x128xf32>
    %96 = vector.broadcast %95 : vector<1x128xf32> to vector<2x128xf32>
    %97 = arith.addf %93, %96 : vector<2x128xf32>
    %c2_85 = arith.constant 2 : index
    %c0_86 = arith.constant 0 : index
    %c0_87 = arith.constant 0 : index
    %98 = vector.load %arg11[%c2_85, %c0_86, %c0_87] : memref<7x2x128xf32, #tpu.memory_space<vmem>>, vector<1x2x128xf32>
    %99 = vector.shape_cast %98 : vector<1x2x128xf32> to vector<2x128xf32>
    %100 = vector.shape_cast %97 : vector<2x128xf32> to vector<1x2x128xf32>
    tpu.vector_store %arg11[%c2_85, %c0_86, %c0_87], %100 {strides = array<i32>} : memref<7x2x128xf32, #tpu.memory_space<vmem>>, vector<1x2x128xf32>,
    %101 = vector.extract_strided_slice %13 {offsets = [0, 1152], sizes = [2, 384], strides = [1, 1]} : vector<2x2688xf32> to vector<2x384xf32>
    %c3 = arith.constant 3 : index
    %c0_88 = arith.constant 0 : index
    %c0_89 = arith.constant 0 : index
    %102 = vector.load %arg5[%c3, %c0_88, %c0_89] : memref<7x384x48xf32, #tpu.memory_space<vmem>>, vector<1x384x48xf32>
    %103 = vector.shape_cast %102 : vector<1x384x48xf32> to vector<384x48xf32>
    %cst_90 = arith.constant dense<0.000000e+00> : vector<2x48xf32>
    %104 = tpu.matmul %101, %103, %cst_90 {dimension_numbers = #tpu.dot_dimension_numbers<[1], [0], [0], [1], [0, 0, 1, 1], [], []>} : vector<2x384xf32>, vector<384x48xf32>, vector<2x48xf32> -> vector<2x48xf32>
    %c3_91 = arith.constant 3 : index
    %c0_92 = arith.constant 0 : index
    %c0_93 = arith.constant 0 : index
    %105 = vector.load %arg6[%c3_91, %c0_92, %c0_93] : memref<7x1x48xf32, #tpu.memory_space<vmem>>, vector<1x1x48xf32>
    %106 = vector.shape_cast %105 : vector<1x1x48xf32> to vector<1x48xf32>
    %107 = vector.broadcast %106 : vector<1x48xf32> to vector<2x48xf32>
    %108 = arith.addf %104, %107 : vector<2x48xf32>
    %cst_94 = arith.constant 0.000000e+00 : f32
    %109 = vector.broadcast %cst_94 : f32 to vector<2x48xf32>
    %110 = arith.maximumf %108, %109 : vector<2x48xf32>
    %c3_95 = arith.constant 3 : index
    %c0_96 = arith.constant 0 : index
    %c0_97 = arith.constant 0 : index
    %111 = vector.load %arg7[%c3_95, %c0_96, %c0_97] : memref<7x48x48xf32, #tpu.memory_space<vmem>>, vector<1x48x48xf32>
    %112 = vector.shape_cast %111 : vector<1x48x48xf32> to vector<48x48xf32>
    %cst_98 = arith.constant dense<0.000000e+00> : vector<2x48xf32>
    %113 = tpu.matmul %110, %112, %cst_98 {dimension_numbers = #tpu.dot_dimension_numbers<[1], [0], [0], [1], [0, 0, 1, 1], [], []>} : vector<2x48xf32>, vector<48x48xf32>, vector<2x48xf32> -> vector<2x48xf32>
    %c3_99 = arith.constant 3 : index
    %c0_100 = arith.constant 0 : index
    %c0_101 = arith.constant 0 : index
    %114 = vector.load %arg8[%c3_99, %c0_100, %c0_101] : memref<7x1x48xf32, #tpu.memory_space<vmem>>, vector<1x1x48xf32>
    %115 = vector.shape_cast %114 : vector<1x1x48xf32> to vector<1x48xf32>
    %116 = vector.broadcast %115 : vector<1x48xf32> to vector<2x48xf32>
    %117 = arith.addf %113, %116 : vector<2x48xf32>
    %cst_102 = arith.constant 0.000000e+00 : f32
    %118 = vector.broadcast %cst_102 : f32 to vector<2x48xf32>
    %119 = arith.maximumf %117, %118 : vector<2x48xf32>
    %c3_103 = arith.constant 3 : index
    %c0_104 = arith.constant 0 : index
    %c0_105 = arith.constant 0 : index
    %120 = vector.load %arg9[%c3_103, %c0_104, %c0_105] : memref<7x48x128xf32, #tpu.memory_space<vmem>>, vector<1x48x128xf32>
    %121 = vector.shape_cast %120 : vector<1x48x128xf32> to vector<48x128xf32>
    %cst_106 = arith.constant dense<0.000000e+00> : vector<2x128xf32>
    %122 = tpu.matmul %119, %121, %cst_106 {dimension_numbers = #tpu.dot_dimension_numbers<[1], [0], [0], [1], [0, 0, 1, 1], [], []>} : vector<2x48xf32>, vector<48x128xf32>, vector<2x128xf32> -> vector<2x128xf32>
    %c3_107 = arith.constant 3 : index
    %c0_108 = arith.constant 0 : index
    %c0_109 = arith.constant 0 : index
    %123 = vector.load %arg10[%c3_107, %c0_108, %c0_109] : memref<7x1x128xf32, #tpu.memory_space<vmem>>, vector<1x1x128xf32>
    %124 = vector.shape_cast %123 : vector<1x1x128xf32> to vector<1x128xf32>
    %125 = vector.broadcast %124 : vector<1x128xf32> to vector<2x128xf32>
    %126 = arith.addf %122, %125 : vector<2x128xf32>
    %c3_110 = arith.constant 3 : index
    %c0_111 = arith.constant 0 : index
    %c0_112 = arith.constant 0 : index
    %127 = vector.load %arg11[%c3_110, %c0_111, %c0_112] : memref<7x2x128xf32, #tpu.memory_space<vmem>>, vector<1x2x128xf32>
    %128 = vector.shape_cast %127 : vector<1x2x128xf32> to vector<2x128xf32>
    %129 = vector.shape_cast %126 : vector<2x128xf32> to vector<1x2x128xf32>
    tpu.vector_store %arg11[%c3_110, %c0_111, %c0_112], %129 {strides = array<i32>} : memref<7x2x128xf32, #tpu.memory_space<vmem>>, vector<1x2x128xf32>,
    %130 = vector.extract_strided_slice %13 {offsets = [0, 1536], sizes = [2, 384], strides = [1, 1]} : vector<2x2688xf32> to vector<2x384xf32>
    %c4 = arith.constant 4 : index
    %c0_113 = arith.constant 0 : index
    %c0_114 = arith.constant 0 : index
    %131 = vector.load %arg5[%c4, %c0_113, %c0_114] : memref<7x384x48xf32, #tpu.memory_space<vmem>>, vector<1x384x48xf32>
    %132 = vector.shape_cast %131 : vector<1x384x48xf32> to vector<384x48xf32>
    %cst_115 = arith.constant dense<0.000000e+00> : vector<2x48xf32>
    %133 = tpu.matmul %130, %132, %cst_115 {dimension_numbers = #tpu.dot_dimension_numbers<[1], [0], [0], [1], [0, 0, 1, 1], [], []>} : vector<2x384xf32>, vector<384x48xf32>, vector<2x48xf32> -> vector<2x48xf32>
    %c4_116 = arith.constant 4 : index
    %c0_117 = arith.constant 0 : index
    %c0_118 = arith.constant 0 : index
    %134 = vector.load %arg6[%c4_116, %c0_117, %c0_118] : memref<7x1x48xf32, #tpu.memory_space<vmem>>, vector<1x1x48xf32>
    %135 = vector.shape_cast %134 : vector<1x1x48xf32> to vector<1x48xf32>
    %136 = vector.broadcast %135 : vector<1x48xf32> to vector<2x48xf32>
    %137 = arith.addf %133, %136 : vector<2x48xf32>
    %cst_119 = arith.constant 0.000000e+00 : f32
    %138 = vector.broadcast %cst_119 : f32 to vector<2x48xf32>
    %139 = arith.maximumf %137, %138 : vector<2x48xf32>
    %c4_120 = arith.constant 4 : index
    %c0_121 = arith.constant 0 : index
    %c0_122 = arith.constant 0 : index
    %140 = vector.load %arg7[%c4_120, %c0_121, %c0_122] : memref<7x48x48xf32, #tpu.memory_space<vmem>>, vector<1x48x48xf32>
    %141 = vector.shape_cast %140 : vector<1x48x48xf32> to vector<48x48xf32>
    %cst_123 = arith.constant dense<0.000000e+00> : vector<2x48xf32>
    %142 = tpu.matmul %139, %141, %cst_123 {dimension_numbers = #tpu.dot_dimension_numbers<[1], [0], [0], [1], [0, 0, 1, 1], [], []>} : vector<2x48xf32>, vector<48x48xf32>, vector<2x48xf32> -> vector<2x48xf32>
    %c4_124 = arith.constant 4 : index
    %c0_125 = arith.constant 0 : index
    %c0_126 = arith.constant 0 : index
    %143 = vector.load %arg8[%c4_124, %c0_125, %c0_126] : memref<7x1x48xf32, #tpu.memory_space<vmem>>, vector<1x1x48xf32>
    %144 = vector.shape_cast %143 : vector<1x1x48xf32> to vector<1x48xf32>
    %145 = vector.broadcast %144 : vector<1x48xf32> to vector<2x48xf32>
    %146 = arith.addf %142, %145 : vector<2x48xf32>
    %cst_127 = arith.constant 0.000000e+00 : f32
    %147 = vector.broadcast %cst_127 : f32 to vector<2x48xf32>
    %148 = arith.maximumf %146, %147 : vector<2x48xf32>
    %c4_128 = arith.constant 4 : index
    %c0_129 = arith.constant 0 : index
    %c0_130 = arith.constant 0 : index
    %149 = vector.load %arg9[%c4_128, %c0_129, %c0_130] : memref<7x48x128xf32, #tpu.memory_space<vmem>>, vector<1x48x128xf32>
    %150 = vector.shape_cast %149 : vector<1x48x128xf32> to vector<48x128xf32>
    %cst_131 = arith.constant dense<0.000000e+00> : vector<2x128xf32>
    %151 = tpu.matmul %148, %150, %cst_131 {dimension_numbers = #tpu.dot_dimension_numbers<[1], [0], [0], [1], [0, 0, 1, 1], [], []>} : vector<2x48xf32>, vector<48x128xf32>, vector<2x128xf32> -> vector<2x128xf32>
    %c4_132 = arith.constant 4 : index
    %c0_133 = arith.constant 0 : index
    %c0_134 = arith.constant 0 : index
    %152 = vector.load %arg10[%c4_132, %c0_133, %c0_134] : memref<7x1x128xf32, #tpu.memory_space<vmem>>, vector<1x1x128xf32>
    %153 = vector.shape_cast %152 : vector<1x1x128xf32> to vector<1x128xf32>
    %154 = vector.broadcast %153 : vector<1x128xf32> to vector<2x128xf32>
    %155 = arith.addf %151, %154 : vector<2x128xf32>
    %c4_135 = arith.constant 4 : index
    %c0_136 = arith.constant 0 : index
    %c0_137 = arith.constant 0 : index
    %156 = vector.load %arg11[%c4_135, %c0_136, %c0_137] : memref<7x2x128xf32, #tpu.memory_space<vmem>>, vector<1x2x128xf32>
    %157 = vector.shape_cast %156 : vector<1x2x128xf32> to vector<2x128xf32>
    %158 = vector.shape_cast %155 : vector<2x128xf32> to vector<1x2x128xf32>
    tpu.vector_store %arg11[%c4_135, %c0_136, %c0_137], %158 {strides = array<i32>} : memref<7x2x128xf32, #tpu.memory_space<vmem>>, vector<1x2x128xf32>,
    %159 = vector.extract_strided_slice %13 {offsets = [0, 1920], sizes = [2, 384], strides = [1, 1]} : vector<2x2688xf32> to vector<2x384xf32>
    %c5 = arith.constant 5 : index
    %c0_138 = arith.constant 0 : index
    %c0_139 = arith.constant 0 : index
    %160 = vector.load %arg5[%c5, %c0_138, %c0_139] : memref<7x384x48xf32, #tpu.memory_space<vmem>>, vector<1x384x48xf32>
    %161 = vector.shape_cast %160 : vector<1x384x48xf32> to vector<384x48xf32>
    %cst_140 = arith.constant dense<0.000000e+00> : vector<2x48xf32>
    %162 = tpu.matmul %159, %161, %cst_140 {dimension_numbers = #tpu.dot_dimension_numbers<[1], [0], [0], [1], [0, 0, 1, 1], [], []>} : vector<2x384xf32>, vector<384x48xf32>, vector<2x48xf32> -> vector<2x48xf32>
    %c5_141 = arith.constant 5 : index
    %c0_142 = arith.constant 0 : index
    %c0_143 = arith.constant 0 : index
    %163 = vector.load %arg6[%c5_141, %c0_142, %c0_143] : memref<7x1x48xf32, #tpu.memory_space<vmem>>, vector<1x1x48xf32>
    %164 = vector.shape_cast %163 : vector<1x1x48xf32> to vector<1x48xf32>
    %165 = vector.broadcast %164 : vector<1x48xf32> to vector<2x48xf32>
    %166 = arith.addf %162, %165 : vector<2x48xf32>
    %cst_144 = arith.constant 0.000000e+00 : f32
    %167 = vector.broadcast %cst_144 : f32 to vector<2x48xf32>
    %168 = arith.maximumf %166, %167 : vector<2x48xf32>
    %c5_145 = arith.constant 5 : index
    %c0_146 = arith.constant 0 : index
    %c0_147 = arith.constant 0 : index
    %169 = vector.load %arg7[%c5_145, %c0_146, %c0_147] : memref<7x48x48xf32, #tpu.memory_space<vmem>>, vector<1x48x48xf32>
    %170 = vector.shape_cast %169 : vector<1x48x48xf32> to vector<48x48xf32>
    %cst_148 = arith.constant dense<0.000000e+00> : vector<2x48xf32>
    %171 = tpu.matmul %168, %170, %cst_148 {dimension_numbers = #tpu.dot_dimension_numbers<[1], [0], [0], [1], [0, 0, 1, 1], [], []>} : vector<2x48xf32>, vector<48x48xf32>, vector<2x48xf32> -> vector<2x48xf32>
    %c5_149 = arith.constant 5 : index
    %c0_150 = arith.constant 0 : index
    %c0_151 = arith.constant 0 : index
    %172 = vector.load %arg8[%c5_149, %c0_150, %c0_151] : memref<7x1x48xf32, #tpu.memory_space<vmem>>, vector<1x1x48xf32>
    %173 = vector.shape_cast %172 : vector<1x1x48xf32> to vector<1x48xf32>
    %174 = vector.broadcast %173 : vector<1x48xf32> to vector<2x48xf32>
    %175 = arith.addf %171, %174 : vector<2x48xf32>
    %cst_152 = arith.constant 0.000000e+00 : f32
    %176 = vector.broadcast %cst_152 : f32 to vector<2x48xf32>
    %177 = arith.maximumf %175, %176 : vector<2x48xf32>
    %c5_153 = arith.constant 5 : index
    %c0_154 = arith.constant 0 : index
    %c0_155 = arith.constant 0 : index
    %178 = vector.load %arg9[%c5_153, %c0_154, %c0_155] : memref<7x48x128xf32, #tpu.memory_space<vmem>>, vector<1x48x128xf32>
    %179 = vector.shape_cast %178 : vector<1x48x128xf32> to vector<48x128xf32>
    %cst_156 = arith.constant dense<0.000000e+00> : vector<2x128xf32>
    %180 = tpu.matmul %177, %179, %cst_156 {dimension_numbers = #tpu.dot_dimension_numbers<[1], [0], [0], [1], [0, 0, 1, 1], [], []>} : vector<2x48xf32>, vector<48x128xf32>, vector<2x128xf32> -> vector<2x128xf32>
    %c5_157 = arith.constant 5 : index
    %c0_158 = arith.constant 0 : index
    %c0_159 = arith.constant 0 : index
    %181 = vector.load %arg10[%c5_157, %c0_158, %c0_159] : memref<7x1x128xf32, #tpu.memory_space<vmem>>, vector<1x1x128xf32>
    %182 = vector.shape_cast %181 : vector<1x1x128xf32> to vector<1x128xf32>
    %183 = vector.broadcast %182 : vector<1x128xf32> to vector<2x128xf32>
    %184 = arith.addf %180, %183 : vector<2x128xf32>
    %c5_160 = arith.constant 5 : index
    %c0_161 = arith.constant 0 : index
    %c0_162 = arith.constant 0 : index
    %185 = vector.load %arg11[%c5_160, %c0_161, %c0_162] : memref<7x2x128xf32, #tpu.memory_space<vmem>>, vector<1x2x128xf32>
    %186 = vector.shape_cast %185 : vector<1x2x128xf32> to vector<2x128xf32>
    %187 = vector.shape_cast %184 : vector<2x128xf32> to vector<1x2x128xf32>
    tpu.vector_store %arg11[%c5_160, %c0_161, %c0_162], %187 {strides = array<i32>} : memref<7x2x128xf32, #tpu.memory_space<vmem>>, vector<1x2x128xf32>,
    %188 = vector.extract_strided_slice %13 {offsets = [0, 2304], sizes = [2, 384], strides = [1, 1]} : vector<2x2688xf32> to vector<2x384xf32>
    %c6 = arith.constant 6 : index
    %c0_163 = arith.constant 0 : index
    %c0_164 = arith.constant 0 : index
    %189 = vector.load %arg5[%c6, %c0_163, %c0_164] : memref<7x384x48xf32, #tpu.memory_space<vmem>>, vector<1x384x48xf32>
    %190 = vector.shape_cast %189 : vector<1x384x48xf32> to vector<384x48xf32>
    %cst_165 = arith.constant dense<0.000000e+00> : vector<2x48xf32>
    %191 = tpu.matmul %188, %190, %cst_165 {dimension_numbers = #tpu.dot_dimension_numbers<[1], [0], [0], [1], [0, 0, 1, 1], [], []>} : vector<2x384xf32>, vector<384x48xf32>, vector<2x48xf32> -> vector<2x48xf32>
    %c6_166 = arith.constant 6 : index
    %c0_167 = arith.constant 0 : index
    %c0_168 = arith.constant 0 : index
    %192 = vector.load %arg6[%c6_166, %c0_167, %c0_168] : memref<7x1x48xf32, #tpu.memory_space<vmem>>, vector<1x1x48xf32>
    %193 = vector.shape_cast %192 : vector<1x1x48xf32> to vector<1x48xf32>
    %194 = vector.broadcast %193 : vector<1x48xf32> to vector<2x48xf32>
    %195 = arith.addf %191, %194 : vector<2x48xf32>
    %cst_169 = arith.constant 0.000000e+00 : f32
    %196 = vector.broadcast %cst_169 : f32 to vector<2x48xf32>
    %197 = arith.maximumf %195, %196 : vector<2x48xf32>
    %c6_170 = arith.constant 6 : index
    %c0_171 = arith.constant 0 : index
    %c0_172 = arith.constant 0 : index
    %198 = vector.load %arg7[%c6_170, %c0_171, %c0_172] : memref<7x48x48xf32, #tpu.memory_space<vmem>>, vector<1x48x48xf32>
    %199 = vector.shape_cast %198 : vector<1x48x48xf32> to vector<48x48xf32>
    %cst_173 = arith.constant dense<0.000000e+00> : vector<2x48xf32>
    %200 = tpu.matmul %197, %199, %cst_173 {dimension_numbers = #tpu.dot_dimension_numbers<[1], [0], [0], [1], [0, 0, 1, 1], [], []>} : vector<2x48xf32>, vector<48x48xf32>, vector<2x48xf32> -> vector<2x48xf32>
    %c6_174 = arith.constant 6 : index
    %c0_175 = arith.constant 0 : index
    %c0_176 = arith.constant 0 : index
    %201 = vector.load %arg8[%c6_174, %c0_175, %c0_176] : memref<7x1x48xf32, #tpu.memory_space<vmem>>, vector<1x1x48xf32>
    %202 = vector.shape_cast %201 : vector<1x1x48xf32> to vector<1x48xf32>
    %203 = vector.broadcast %202 : vector<1x48xf32> to vector<2x48xf32>
    %204 = arith.addf %200, %203 : vector<2x48xf32>
    %cst_177 = arith.constant 0.000000e+00 : f32
    %205 = vector.broadcast %cst_177 : f32 to vector<2x48xf32>
    %206 = arith.maximumf %204, %205 : vector<2x48xf32>
    %c6_178 = arith.constant 6 : index
    %c0_179 = arith.constant 0 : index
    %c0_180 = arith.constant 0 : index
    %207 = vector.load %arg9[%c6_178, %c0_179, %c0_180] : memref<7x48x128xf32, #tpu.memory_space<vmem>>, vector<1x48x128xf32>
    %208 = vector.shape_cast %207 : vector<1x48x128xf32> to vector<48x128xf32>
    %cst_181 = arith.constant dense<0.000000e+00> : vector<2x128xf32>
    %209 = tpu.matmul %206, %208, %cst_181 {dimension_numbers = #tpu.dot_dimension_numbers<[1], [0], [0], [1], [0, 0, 1, 1], [], []>} : vector<2x48xf32>, vector<48x128xf32>, vector<2x128xf32> -> vector<2x128xf32>
    %c6_182 = arith.constant 6 : index
    %c0_183 = arith.constant 0 : index
    %c0_184 = arith.constant 0 : index
    %210 = vector.load %arg10[%c6_182, %c0_183, %c0_184] : memref<7x1x128xf32, #tpu.memory_space<vmem>>, vector<1x1x128xf32>
    %211 = vector.shape_cast %210 : vector<1x1x128xf32> to vector<1x128xf32>
    %212 = vector.broadcast %211 : vector<1x128xf32> to vector<2x128xf32>
    %213 = arith.addf %209, %212 : vector<2x128xf32>
    %c6_185 = arith.constant 6 : index
    %c0_186 = arith.constant 0 : index
    %c0_187 = arith.constant 0 : index
    %214 = vector.load %arg11[%c6_185, %c0_186, %c0_187] : memref<7x2x128xf32, #tpu.memory_space<vmem>>, vector<1x2x128xf32>
    %215 = vector.shape_cast %214 : vector<1x2x128xf32> to vector<2x128xf32>
    %216 = vector.shape_cast %213 : vector<2x128xf32> to vector<1x2x128xf32>
    tpu.vector_store %arg11[%c6_185, %c0_186, %c0_187], %216 {strides = array<i32>} : memref<7x2x128xf32, #tpu.memory_space<vmem>>, vector<1x2x128xf32>,
    return
  }
  func.func @transform_0(%arg0: i32) -> (i32, i32, i32) {
    %c0_i32 = arith.constant 0 : i32
    %c0_i32_0 = arith.constant 0 : i32
    %c0_i32_1 = arith.constant 0 : i32
    %c0_i32_2 = arith.constant 0 : i32
    return %c0_i32, %c0_i32_0, %c0_i32_1 : i32, i32, i32
  }
  func.func @transform_1(%arg0: i32) -> (i32, i32) {
    %c0_i32 = arith.constant 0 : i32
    %c0_i32_0 = arith.constant 0 : i32
    %c0_i32_1 = arith.constant 0 : i32
    return %c0_i32, %c0_i32_0 : i32, i32
  }
  func.func @transform_2(%arg0: i32) -> (i32, i32) {
    %c0_i32 = arith.constant 0 : i32
    %c0_i32_0 = arith.constant 0 : i32
    return %c0_i32, %arg0 : i32, i32
  }
  func.func @transform_3(%arg0: i32) -> (i32, i32) {
    %c0_i32 = arith.constant 0 : i32
    %c0_i32_0 = arith.constant 0 : i32
    return %c0_i32, %arg0 : i32, i32
  }
  func.func @transform_4(%arg0: i32) -> (i32, i32, i32) {
    %c0_i32 = arith.constant 0 : i32
    %c0_i32_0 = arith.constant 0 : i32
    %c0_i32_1 = arith.constant 0 : i32
    return %arg0, %c0_i32, %c0_i32_0 : i32, i32, i32
  }
  func.func @transform_5(%arg0: i32) -> (i32, i32, i32) {
    %c0_i32 = arith.constant 0 : i32
    %c0_i32_0 = arith.constant 0 : i32
    %c0_i32_1 = arith.constant 0 : i32
    return %arg0, %c0_i32, %c0_i32_0 : i32, i32, i32
  }
  func.func @transform_6(%arg0: i32) -> (i32, i32, i32) {
    %c0_i32 = arith.constant 0 : i32
    %c0_i32_0 = arith.constant 0 : i32
    %c0_i32_1 = arith.constant 0 : i32
    return %arg0, %c0_i32, %c0_i32_0 : i32, i32, i32
  }
  func.func @transform_7(%arg0: i32) -> (i32, i32, i32) {
    %c0_i32 = arith.constant 0 : i32
    %c0_i32_0 = arith.constant 0 : i32
    %c0_i32_1 = arith.constant 0 : i32
    return %arg0, %c0_i32, %c0_i32_0 : i32, i32, i32
  }
  func.func @transform_8(%arg0: i32) -> (i32, i32, i32) {
    %c0_i32 = arith.constant 0 : i32
    %c0_i32_0 = arith.constant 0 : i32
    %c0_i32_1 = arith.constant 0 : i32
    return %arg0, %c0_i32, %c0_i32_0 : i32, i32, i32
  }
  func.func @transform_9(%arg0: i32) -> (i32, i32, i32) {
    %c0_i32 = arith.constant 0 : i32
    %c0_i32_0 = arith.constant 0 : i32
    %c0_i32_1 = arith.constant 0 : i32
    return %arg0, %c0_i32, %c0_i32_0 : i32, i32, i32
  }
  func.func @transform_10(%arg0: i32) -> (i32, i32, i32) {
    %c0_i32 = arith.constant 0 : i32
    %c0_i32_0 = arith.constant 0 : i32
    %c0_i32_1 = arith.constant 0 : i32
    return %arg0, %c0_i32, %c0_i32_0 : i32, i32, i32
  }
}

</mosaic_0001>

<bundles_post_ra>
// kernel: forward.1
= control target key start
LH: loop header
LB: loop body
LE: loop exit
PB: predicated region body
PF: predicated region fallthrough
CT: control target
= control target key end

     0   :  { %s14862_s0 = inlined_call_operand.vmem [shape: f32[2,3,256], index: 0, kind: input, shape index: {}]   ;;  %s14863_s1 = inlined_call_operand.hbm [shape: f32[3,512], index: 1, kind: input, shape index: {}]   ;;  %s14864_s2 = inlined_call_operand.hbm [shape: bf16[512,5376], index: 2, kind: input, shape index: {}]   ;;  %s14865_s3 = inlined_call_operand.hbm [shape: f32[1,5376], index: 3, kind: input, shape index: {}]   ;;  %s14866_s4 = inlined_call_operand.vmem [shape: f32[14,384,48], index: 4, kind: input, shape index: {}]   ;;  %s14867_s5 = inlined_call_operand.hbm [shape: f32[14,1,48], index: 5, kind: input, shape index: {}]   ;;  %s14868_s6 = inlined_call_operand.hbm [shape: f32[14,48,48], index: 6, kind: input, shape index: {}]   ;;  %s14869_s7 = inlined_call_operand.hbm [shape: f32[14,1,48], index: 7, kind: input, shape index: {}]   ;;  %s14870_s8 = inlined_call_operand.hbm [shape: f32[14,48,128], index: 8, kind: input, shape index: {}]   ;;  %s14871_s9 = inlined_call_operand.hbm [shape: f32[14,1,128], index: 9, kind: input, shape index: {}]   ;;  %s14872_s10 = inlined_call_operand.vmem [shape: f32[14,2,128], index: 10, kind: output, shape index: {}]  }
   0x1   :  { %14888 = sst [smem:[#allocation23_spill]] %s14864_s2 }
   0x2   :  { %14889 = sst [smem:[#allocation24_spill]] %s14866_s4 }
   0x3   :  { %14890 = sst [smem:[#allocation25_spill]] %s14867_s5 }
   0x4   :  { %14891 = sst [smem:[#allocation26_spill]] %s14869_s7 }
   0x5   :  { %14892 = sst [smem:[#allocation27_spill]] %s14872_s10 }
   0x6   :  { %15 = vsyncpa [#allocation3], 0 }
   0x7   :  { %16 = vsyncpa [#allocation5], 0 }
   0x8   :  { %18 = vsyncpa [#allocation5 + $0x1], 0 }
   0x9   :  { %19 = vsyncpa [#allocation8], 0 }
   0xa   :  { %21 = vsyncpa [#allocation8 + $0x1], 0 }
   0xb   :  { %22 = vsyncpa [#allocation11], 0 }
   0xc   :  { %24 = vsyncpa [#allocation11 + $0x1], 0 }
   0xd   :  { %25 = vsyncpa [#allocation14], 0 }
   0xe   :  { %27 = vsyncpa [#allocation14 + $0x1], 0  ;;  %s12963_s13 = smov 0   ;;  %s12965_s14 = smov 0  }
   0xf   :  { %s12967_s15 = smov 0   ;;  %s12969_s16 = smov 0  }
  0x10 LB: > { %14893 = sst [smem:[#allocation20_spill]] %s12884_s15  ;;  %s12984_s17 = sadd.s32 1, %s12888_s16   ;;  %s12888_s16 = sphi %s12969_s16, %s14919_s16   ;;  %s12884_s15 = sphi %s12967_s15, %s14924_s15   ;;  %s12880_s14 = sphi %s12965_s14, %s14923_s14   ;;  %s12876_s13 = sphi %s12963_s13, %s14922_s13  }
  0x11   : > { %14894 = sst [smem:[#allocation21_spill]] %s12984_s17  ;;  %s82_s18 = sadd.s32 1, %s12884_s15 }
  0x12   : > { %s79_s19 = ssub.s32 %s12888_s16, %s12984_s17  ;;  %p89_p0 = scmp.ne.s32.totalorder %s12884_s15, %s12880_s14 }
  0x13   : > { %p80_p1 = scmp.eq.s32.totalorder %s79_s19, 0  ;;  %p90_p2 = scmp.eq.s32.totalorder %s12888_s16, 0 }
  0x14   : > { %p11556_p3 = scmp.lt.s32.totalorder %s12888_s16, 2  ;;  %s12997_s21 = sand.u32 1, %s12888_s16  }
  0x15   : > { %s12994_s20 = scalar_select %p80_p1, %s12884_s15, %s82_s18  }
  0x16   : > { %p91_p4 = por %p90_p2, %p89_p0  ;;  %s13000_s22 = sand.u32 1, %s12884_s15  }
  0x17   : > { %14895 = sst [smem:[#allocation22_spill]] %s12994_s20  ;;  %s11497_s23 = smul.u32 5376, %s13000_s22 }
  0x18   : > { %p13003_p5 = pnand %p11556_p3, %p91_p4  ;;  %s9953_s25 = smul.u32 1344, %s12888_s16 }
  0x19   : > { %s14897_s2 = sld [smem:[#allocation23_spill]]  ;;  %s345_s29 = scalar_lea.vmem [#allocation4], %s11497_s23 }
  0x1a   : > { %s14896_s24 = scalar_select %p13003_p5, 1, 0 }
  0x1b   : > { %s352_s30 = sshll.u32 %s345_s29, 4  ;;  %s14874_s11 = scalar_lea.sflag [#allocation5], %s12997_s21  ;;  %s13013_s30 = int_to_ptr.vmem [resolvable:$true] %s352_s30 }
  0x1c   : > { %p13020_p7 = pneg %p13003_p5 }
  0x1e   : > { %s14898_s18 = scalar_select %p13020_p7, 1, 0 }
  0x1f   : > { %s13011_s28 = scalar_lea.hbm %s14897_s2, %s9953_s25  ;;  %s12605_s26 = scalar_lea.hbm %s14897_s2, 172032 }
  0x20   : > { %s12600_s12 = scalar_lea.hbm %s13011_s28, 86016  ;;  %p12606_p10 = scmp.lt.u32.totalorder %s13011_s28, %s14897_s2 }
  0x21   : > { %p12601_p6 = scmp.ne.s32.totalorder %s13011_s28, %s12600_s12  ;;  %p12607_p11 = scmp.lt.u32.totalorder %s12605_s26, %s12600_s12 }
  0x22   : > { %p12609_p13 = scmp.lt.u32.totalorder %s12600_s12, %s13011_s28 }
  0x23   : > { %p12603_p8 = pnand %p13020_p7, %p12601_p6  ;;  %p12608_p12 = por %p12607_p11, %p12606_p10 }
  0x25   : > { %p12604_p9 = pneg %p12603_p8  ;;  %p12610_p0 = por %p12609_p13, %p12608_p12 }
  0x27   : > { %p12611_p1 = pnand %p12610_p0, %p12604_p9 }
  0x29   : > { %12614 = shalt.err (!%p12611_p1)
}
  0x2a   : > { %s12615_s29 = scalar_lea.vmem %s13013_s30, 86016  ;;  %s12890_s19 = smov [#allocation4]  }
  0x2b   : > { %p12616_p2 = scmp.ne.s32.totalorder %s13013_s30, %s12615_s29  ;;  %s12620_s25 = sshll.u32 %s12890_s19, 4  ;;  %s12621_s25 = int_to_ptr.vmem [resolvable:$false] %s12620_s25 }
  0x2c   : > { %s12622_s23 = scalar_lea.vmem %s12621_s25, 172032  ;;  %p12623_p6 = scmp.lt.s32.totalorder %s13013_s30, %s12621_s25 }
  0x2d   : > { %p12618_p3 = pnand %p12616_p2, %p13020_p7  ;;  %p12624_p8 = scmp.lt.s32.totalorder %s12622_s23, %s12615_s29 }
  0x2f   : > { %p12619_p4 = pneg %p12618_p3  ;;  %p12625_p10 = por %p12624_p8, %p12623_p6 }
  0x31   : > { %p12626_p11 = pnand %p12625_p10, %p12619_p4 }
  0x33   : > { %12629 = shalt.err (!%p12626_p11)
}
  0x34   : > { %s12891_s12 = smov 2688   ;;  %s12892_s26 = smov 1344  }
  0x35   : > { %s12893_s27 = smov 84   ;;  %s13046_s19 = smul.u32 7, %s13000_s22 }
  0x36   : > { %11536 = dma.hbm_to_vmem [thread:$0]  (!%p13003_p5), %s13011_s28, 86016, %s13013_s30, %s14874_s11, %s12891_s12, %s12892_s26, %s12893_s27  }
  0x37   : > { %s13049_s29 = smul.u32 112, %s12888_s16  ;;  %s14899_s5 = sld [smem:[#allocation25_spill]] }
  0x38   : > { %s395_s20 = scalar_lea.vmem [#allocation7], %s13046_s19  ;;  %s14875_s28 = scalar_lea.sflag [#allocation8], %s12997_s21 }
  0x39   : > { %s402_s15 = sshll.u32 %s395_s20, 4  ;;  %s13058_s15 = int_to_ptr.vmem [resolvable:$true] %s402_s15 }
  0x3d   : > { %s13055_s2 = scalar_lea.hbm %s14899_s5, %s13049_s29  ;;  %s12635_s27 = scalar_lea.hbm %s14899_s5, 224 }
  0x3e   : > { %s12630_s30 = scalar_lea.hbm %s13055_s2, 112  ;;  %p12636_p0 = scmp.lt.u32.totalorder %s13055_s2, %s14899_s5 }
  0x3f   : > { %p12631_p9 = scmp.ne.s32.totalorder %s13055_s2, %s12630_s30  ;;  %p12637_p1 = scmp.lt.u32.totalorder %s12635_s27, %s12630_s30 }
  0x40   : > { %p12639_p3 = scmp.lt.u32.totalorder %s12630_s30, %s13055_s2 }
  0x41   : > { %p12633_p12 = pnand %p12631_p9, %p13020_p7  ;;  %p12638_p2 = por %p12637_p1, %p12636_p0 }
  0x43   : > { %p12634_p13 = pneg %p12633_p12  ;;  %p12640_p4 = por %p12639_p3, %p12638_p2 }
  0x45   : > { %p12641_p6 = pnand %p12640_p4, %p12634_p13 }
  0x47   : > { %12644 = shalt.err (!%p12641_p6)
}
  0x48   : > { %s12645_s20 = scalar_lea.vmem %s13058_s15, 112  ;;  %s12894_s12 = smov [#allocation7]  }
  0x49   : > { %p12646_p8 = scmp.ne.s32.totalorder %s13058_s15, %s12645_s20  ;;  %s12650_s26 = sshll.u32 %s12894_s12, 4  ;;  %s12651_s26 = int_to_ptr.vmem [resolvable:$false] %s12650_s26 }
  0x4a   : > { %s12652_s25 = scalar_lea.vmem %s12651_s26, 224  ;;  %p12653_p9 = scmp.lt.s32.totalorder %s13058_s15, %s12651_s26 }
  0x4b   : > { %p12648_p10 = pnand %p12646_p8, %p13020_p7  ;;  %p12654_p12 = scmp.lt.s32.totalorder %s12652_s25, %s12645_s20 }
  0x4d   : > { %p12649_p11 = pneg %p12648_p10  ;;  %p12655_p0 = por %p12654_p12, %p12653_p9 }
  0x4f   : > { %p12656_p1 = pnand %p12655_p0, %p12649_p11 }
  0x51   : > { %12659 = shalt.err (!%p12656_p1)
}
  0x52   : > { %s14876_s30 = smov 16   ;;  %s14877_s27 = smov 1  }
  0x53   : > { %11542 = dma.hbm_to_vmem [thread:$0]  (!%p13003_p5), %s13055_s2, 112, %s13058_s15, %s14875_s28, %s14876_s30, %s14876_s30, %s14877_s27  }
  0x54   : > { %s14900_s7 = sld [smem:[#allocation26_spill]]  ;;  %s438_s26 = scalar_lea.vmem [#allocation10], %s13046_s19 }
  0x55   : > { %s445_s25 = sshll.u32 %s438_s26, 4  ;;  %s14878_s11 = scalar_lea.sflag [#allocation11], %s12997_s21  ;;  %s13094_s25 = int_to_ptr.vmem [resolvable:$true] %s445_s25 }
  0x5a   : > { %s13091_s12 = scalar_lea.hbm %s14900_s7, %s13049_s29  ;;  %s12665_s23 = scalar_lea.hbm %s14900_s7, 224 }
  0x5b   : > { %s12660_s5 = scalar_lea.hbm %s13091_s12, 112  ;;  %p12666_p4 = scmp.lt.u32.totalorder %s13091_s12, %s14900_s7 }
  0x5c   : > { %p12661_p13 = scmp.ne.s32.totalorder %s13091_s12, %s12660_s5  ;;  %p12667_p6 = scmp.lt.u32.totalorder %s12665_s23, %s12660_s5 }
  0x5d   : > { %p12669_p10 = scmp.lt.u32.totalorder %s12660_s5, %s13091_s12 }
  0x5e   : > { %p12663_p2 = pnand %p12661_p13, %p13020_p7  ;;  %p12668_p8 = por %p12667_p6, %p12666_p4 }
  0x60   : > { %p12664_p3 = pneg %p12663_p2  ;;  %p12670_p11 = por %p12669_p10, %p12668_p8 }
  0x62   : > { %p12671_p9 = pnand %p12670_p11, %p12664_p3 }
  0x64   : > { %12674 = shalt.err (!%p12671_p9)
}
  0x65   : > { %s12675_s26 = scalar_lea.vmem %s13094_s25, 112  ;;  %s12897_s2 = smov [#allocation10]  }
  0x66   : > { %p12676_p12 = scmp.ne.s32.totalorder %s13094_s25, %s12675_s26  ;;  %s12680_s15 = sshll.u32 %s12897_s2, 4  ;;  %s12681_s15 = int_to_ptr.vmem [resolvable:$false] %s12680_s15 }
  0x67   : > { %s12682_s28 = scalar_lea.vmem %s12681_s15, 224  ;;  %p12683_p13 = scmp.lt.s32.totalorder %s13094_s25, %s12681_s15 }
  0x68   : > { %p12678_p0 = pnand %p12676_p12, %p13020_p7  ;;  %p12684_p2 = scmp.lt.s32.totalorder %s12682_s28, %s12675_s26 }
  0x6a   : > { %p12679_p1 = pneg %p12678_p0  ;;  %p12685_p4 = por %p12684_p2, %p12683_p13 }
  0x6c   : > { %p12686_p6 = pnand %p12685_p4, %p12679_p1 }
  0x6e   : > { %12689 = shalt.err (!%p12686_p6)
}
  0x6f   : > { %11548 = dma.hbm_to_vmem [thread:$0]  (!%p13003_p5), %s13091_s12, 112, %s13094_s25, %s14878_s11, %s14876_s30, %s14876_s30, %s14877_s27  }
  0x70   : > { %s13124_s5 = sadd.s32 4294967295, %s12888_s16   ;;  %p95_p3 = scmp.ne.s32.totalorder %s12880_s14, %s12876_s13 }
  0x71   : > { %p14881_p8 = scmp.eq.s32.totalorder %s13124_s5, 0  ;;  %p8840_p10 = scmp.ge.s32.totalorder %s12888_s16, 1 }
  0x72   : > { %p314_p11 = scmp.lt.s32.totalorder %s12888_s16, 3  ;;  %s12898_s12 = smov [#allocation2]  }
  0x73   : > { %p13133_p9 = por %p14881_p8, %p95_p3  ;;  %s330_s25 = sshll.u32 %s12898_s12, 4  ;;  %s331_s25 = int_to_ptr.vmem [resolvable:$true] %s330_s25 }
  0x74   : > { %p13137_p12 = pnand %p8840_p10, %p314_p11  ;;  %s11498_s26 = smul.u32 21, %s13000_s22 }
  0x75   : > { %s14901_s23 = scalar_select %p13133_p9, 1, 0 }
  0x76   : > { %s14902_s20 = scalar_select %p13137_p12, 1, 0 }
  0x77   : > { %p11529_p0 = pneg %p13137_p12  ;;  %s9954_s13 = smul.u32 336, %s12888_s16 }
  0x78   : > { %s366_s11 = scalar_lea.vmem [#allocation6], %s11498_s26  ;;  %s12690_s10 = scalar_lea.hbm %s14863_s1, 256 }
  0x79   : > { %p13148_p1 = pnand %p11529_p0, %p14881_p8  ;;  %s13155_s27 = scalar_lea.hbm %s14865_s3, %s9954_s13 }
  0x7a   : > { %s374_s7 = sshll.u32 %s366_s11, 4  ;;  %p12691_p13 = scmp.ne.s32.totalorder %s14863_s1, %s12690_s10  ;;  %s13157_s7 = int_to_ptr.vmem [resolvable:$true] %s374_s7 }
  0x7b   : > { %p12692_p2 = pneg %p13148_p1  ;;  %p12697_p3 = scmp.lt.u32.totalorder %s12690_s10, %s14863_s1 }
  0x7d   : > { %p12693_p4 = pnand %p12692_p2, %p12691_p13 }
  0x7f   : > { %p12694_p6 = pneg %p12693_p4 }
  0x81   : > { %p12699_p10 = pnand %p12697_p3, %p12694_p6 }
  0x83   : > { %12702 = shalt.err (!%p12699_p10)
}
  0x84   : > { %s12703_s11 = scalar_lea.vmem %s331_s25, 256  ;;  %p12711_p9 = scmp.lt.s32.totalorder %s331_s25, %s331_s25 }
  0x85   : > { %p12704_p11 = scmp.ne.s32.totalorder %s331_s25, %s12703_s11  ;;  %p12712_p12 = scmp.lt.s32.totalorder %s12703_s11, %s12703_s11 }
  0x87   : > { %p12706_p0 = pnand %p12704_p11, %p12692_p2  ;;  %p12713_p5 = por %p12712_p12, %p12711_p9 }
  0x89   : > { %p12707_p8 = pneg %p12706_p0 }
  0x8b   : > { %p12714_p7 = pnand %p12713_p5, %p12707_p8 }
  0x8d   : > { %12717 = shalt.err (!%p12714_p7)
}
  0x8e   : > { %11532 = dma.hbm_to_vmem [thread:$0]  (!%p13148_p1), %s14863_s1, 256, %s331_s25, [#allocation3]  }
  0x8f   : > { %s12718_s10 = scalar_lea.hbm %s13155_s27, 336  ;;  %p14904_p2 = scmp.ne.s32.totalorder %s14898_s18, 0 }
  0x90   : > { %p12719_p13 = scmp.ne.s32.totalorder %s13155_s27, %s12718_s10  ;;  %s12723_s2 = scalar_lea.hbm %s14865_s3, 672 }
  0x91   : > { %p12724_p5 = scmp.lt.u32.totalorder %s13155_s27, %s14865_s3  ;;  %p12725_p7 = scmp.lt.u32.totalorder %s12723_s2, %s12718_s10 }
  0x92   : > { %p12721_p4 = pnand %p12719_p13, %p14904_p2  ;;  %p12727_p9 = scmp.lt.u32.totalorder %s12718_s10, %s13155_s27 }
  0x93   : > { %p12726_p8 = por %p12725_p7, %p12724_p5 }
  0x94   : > { %p12722_p6 = pneg %p12721_p4 }
  0x95   : > { %p12728_p12 = por %p12727_p9, %p12726_p8 }
  0x97   : > { %p12729_p3 = pnand %p12728_p12, %p12722_p6 }
  0x99   : > { %12732 = shalt.err (!%p12729_p3)
}
  0x9a   : > { %s12733_s25 = scalar_lea.vmem %s13157_s7, 336  ;;  %s12899_s30 = smov [#allocation6]  }
  0x9b   : > { %p12734_p1 = scmp.ne.s32.totalorder %s13157_s7, %s12733_s25  ;;  %s12738_s28 = sshll.u32 %s12899_s30, 4  ;;  %s12739_s28 = int_to_ptr.vmem [resolvable:$false] %s12738_s28 }
  0x9c   : > { %s12740_s11 = scalar_lea.vmem %s12739_s28, 672  ;;  %p12741_p0 = scmp.lt.s32.totalorder %s13157_s7, %s12739_s28 }
  0x9d   : > { %p12736_p10 = pnand %p12734_p1, %p14904_p2  ;;  %p12742_p13 = scmp.lt.s32.totalorder %s12740_s11, %s12733_s25 }
  0x9f   : > { %p12737_p11 = pneg %p12736_p10  ;;  %p12743_p4 = por %p12742_p13, %p12741_p0 }
  0xa1   : > { %p12744_p5 = pnand %p12743_p4, %p12737_p11 }
  0xa3   : > { %12747 = shalt.err (!%p12744_p5)
}
  0xa4   : > { %p14905_p6 = scmp.ne.s32.totalorder %s14896_s24, 0  ;;  %s14906_s4 = scalar_lea.sflag [#allocation5], %s12997_s21 }
  0xa5   : > { %s11557_s17 = smul.u32 5376, %s12888_s16  ;;  %s12753_s30 = scalar_lea.hbm %s14868_s6, 10752 }
  0xa6   : > { %11539 = dma.hbm_to_vmem [thread:$0]  (!%p14905_p6), %s13155_s27, 336, %s13157_s7, %s14906_s4  }
  0xa7   : > { %s14907_s10 = smul.u32 336, %s13000_s22  ;;  %s13208_s15 = scalar_lea.hbm %s14868_s6, %s11557_s17 }
  0xa8   : > { %s12748_s25 = scalar_lea.hbm %s13208_s15, 5376  ;;  %p12754_p12 = scmp.lt.u32.totalorder %s13208_s15, %s14868_s6 }
  0xa9   : > { %s416_s26 = scalar_lea.vmem [#allocation9], %s14907_s10  ;;  %p12749_p7 = scmp.ne.s32.totalorder %s13208_s15, %s12748_s25 }
  0xaa   : > { %s424_s13 = sshll.u32 %s416_s26, 4  ;;  %p12755_p3 = scmp.lt.u32.totalorder %s12753_s30, %s12748_s25  ;;  %s13201_s13 = int_to_ptr.vmem [resolvable:$true] %s424_s13 }
  0xab   : > { %p12751_p8 = pnand %p12749_p7, %p14904_p2  ;;  %p12757_p10 = scmp.lt.u32.totalorder %s12748_s25, %s13208_s15 }
  0xac   : > { %p12756_p1 = por %p12755_p3, %p12754_p12 }
  0xad   : > { %p12752_p9 = pneg %p12751_p8 }
  0xae   : > { %p12758_p11 = por %p12757_p10, %p12756_p1 }
  0xb0   : > { %p12759_p0 = pnand %p12758_p11, %p12752_p9 }
  0xb2   : > { %12762 = shalt.err (!%p12759_p0)
}
  0xb3   : > { %s12763_s4 = scalar_lea.vmem %s13201_s13, 5376  ;;  %s12900_s10 = smov [#allocation9]  }
  0xb4   : > { %p12764_p13 = scmp.ne.s32.totalorder %s13201_s13, %s12763_s4  ;;  %s12768_s26 = sshll.u32 %s12900_s10, 4  ;;  %s12769_s26 = int_to_ptr.vmem [resolvable:$false] %s12768_s26 }
  0xb5   : > { %s12770_s2 = scalar_lea.vmem %s12769_s26, 10752  ;;  %p12771_p7 = scmp.lt.s32.totalorder %s13201_s13, %s12769_s26 }
  0xb6   : > { %p12766_p4 = pnand %p12764_p13, %p14904_p2  ;;  %p12772_p8 = scmp.lt.s32.totalorder %s12770_s2, %s12763_s4 }
  0xb8   : > { %p12767_p5 = pneg %p12766_p4  ;;  %p12773_p12 = por %p12772_p8, %p12771_p7 }
  0xba   : > { %p12774_p3 = pnand %p12773_p12, %p12767_p5 }
  0xbc   : > { %12777 = shalt.err (!%p12774_p3)
}
  0xbd   : > { %s12901_s12 = smov 128   ;;  %s12902_s25 = smov 8  }
  0xbe   : > { %s14908_s7 = scalar_lea.sflag [#allocation8], %s12997_s21  ;;  %s13241_s28 = scalar_lea.hbm %s14870_s8, %s11557_s17 }
  0xbf   : > { %11545 = dma.hbm_to_vmem [thread:$0]  (!%p14905_p6), %s13208_s15, 5376, %s13201_s13, %s14908_s7, %s12901_s12, %s12901_s12, %s12902_s25  }
  0xc0   : > { %s14909_s11 = smul.u32 336, %s13000_s22  ;;  %s12778_s26 = scalar_lea.hbm %s13241_s28, 5376 }
  0xc1   : > { %p12779_p9 = scmp.ne.s32.totalorder %s13241_s28, %s12778_s26  ;;  %s12783_s15 = scalar_lea.hbm %s14870_s8, 10752 }
  0xc2   : > { %s459_s4 = scalar_lea.vmem [#allocation12], %s14909_s11  ;;  %p12784_p11 = scmp.lt.u32.totalorder %s13241_s28, %s14870_s8 }
  0xc3   : > { %s467_s10 = sshll.u32 %s459_s4, 4  ;;  %p12781_p1 = pnand %p12779_p9, %p14904_p2  ;;  %s13245_s10 = int_to_ptr.vmem [resolvable:$true] %s467_s10 }
  0xc4   : > { %p12785_p0 = scmp.lt.u32.totalorder %s12783_s15, %s12778_s26  ;;  %p12787_p4 = scmp.lt.u32.totalorder %s12778_s26, %s13241_s28 }
  0xc5   : > { %p12782_p10 = pneg %p12781_p1 }
  0xc6   : > { %p12786_p13 = por %p12785_p0, %p12784_p11 }
  0xc8   : > { %p12788_p5 = por %p12787_p4, %p12786_p13 }
  0xca   : > { %p12789_p7 = pnand %p12788_p5, %p12782_p10 }
  0xcc   : > { %12792 = shalt.err (!%p12789_p7)
}
  0xcd   : > { %s12793_s7 = scalar_lea.vmem %s13245_s10, 5376  ;;  %s12903_s27 = smov [#allocation12]  }
  0xce   : > { %p12794_p8 = scmp.ne.s32.totalorder %s13245_s10, %s12793_s7  ;;  %s12798_s30 = sshll.u32 %s12903_s27, 4  ;;  %s12799_s30 = int_to_ptr.vmem [resolvable:$false] %s12798_s30 }
  0xcf   : > { %s12800_s11 = scalar_lea.vmem %s12799_s30, 10752  ;;  %p12801_p9 = scmp.lt.s32.totalorder %s13245_s10, %s12799_s30 }
  0xd0   : > { %p12796_p12 = pnand %p12794_p8, %p14904_p2  ;;  %p12802_p1 = scmp.lt.s32.totalorder %s12800_s11, %s12793_s7 }
  0xd2   : > { %p12797_p3 = pneg %p12796_p12  ;;  %p12803_p11 = por %p12802_p1, %p12801_p9 }
  0xd4   : > { %p12804_p0 = pnand %p12803_p11, %p12797_p3 }
  0xd6   : > { %12807 = shalt.err (!%p12804_p0)
}
  0xd7   : > { %s14910_s4 = scalar_lea.sflag [#allocation11], %s12997_s21  ;;  %s13277_s13 = scalar_lea.hbm %s14871_s9, %s13049_s29 }
  0xd8   : > { %11551 = dma.hbm_to_vmem [thread:$0]  (!%p14905_p6), %s13241_s28, 5376, %s13245_s10, %s14910_s4, %s12901_s12, %s12901_s12, %s12902_s25  }
  0xd9   : > { %s481_s15 = scalar_lea.vmem [#allocation13], %s13046_s19  ;;  %s478_s21 = scalar_lea.sflag [#allocation14], %s13000_s22 }
  0xda   : > { %s488_s17 = sshll.u32 %s481_s15, 4  ;;  %s12808_s2 = scalar_lea.hbm %s13277_s13, 112  ;;  %s13280_s17 = int_to_ptr.vmem [resolvable:$true] %s488_s17 }
  0xdb   : > { %p12809_p10 = scmp.ne.s32.totalorder %s13277_s13, %s12808_s2  ;;  %s12813_s28 = scalar_lea.hbm %s14871_s9, 224 }
  0xdc   : > { %p12814_p5 = scmp.lt.u32.totalorder %s13277_s13, %s14871_s9  ;;  %p12815_p7 = scmp.lt.u32.totalorder %s12813_s28, %s12808_s2 }
  0xdd   : > { %p12811_p13 = pnand %p12809_p10, %p14904_p2  ;;  %p12817_p12 = scmp.lt.u32.totalorder %s12808_s2, %s13277_s13 }
  0xde   : > { %p12816_p8 = por %p12815_p7, %p12814_p5 }
  0xdf   : > { %p12812_p4 = pneg %p12811_p13 }
  0xe0   : > { %p12818_p3 = por %p12817_p12, %p12816_p8 }
  0xe2   : > { %p12819_p9 = pnand %p12818_p3, %p12812_p4 }
  0xe4   : > { %12822 = shalt.err (!%p12819_p9)
}
  0xe5   : > { %s12823_s19 = scalar_lea.vmem %s13280_s17, 112  ;;  %s12904_s7 = smov [#allocation13]  }
  0xe6   : > { %p12824_p1 = scmp.ne.s32.totalorder %s13280_s17, %s12823_s19  ;;  %s12828_s27 = sshll.u32 %s12904_s7, 4  ;;  %s12829_s27 = int_to_ptr.vmem [resolvable:$false] %s12828_s27 }
  0xe7   : > { %s12830_s30 = scalar_lea.vmem %s12829_s27, 224  ;;  %p12831_p10 = scmp.lt.s32.totalorder %s13280_s17, %s12829_s27 }
  0xe8   : > { %p12826_p11 = pnand %p12824_p1, %p14904_p2  ;;  %p12832_p13 = scmp.lt.s32.totalorder %s12830_s30, %s12823_s19 }
  0xea   : > { %p12827_p0 = pneg %p12826_p11  ;;  %p12833_p5 = por %p12832_p13, %p12831_p10 }
  0xec   : > { %p12834_p7 = pnand %p12833_p5, %p12827_p0 }
  0xee   : > { %12837 = shalt.err (!%p12834_p7)
}
  0xef   : > { %s14911_s11 = smov 1   ;;  %s14912_s4 = smov 16  }
  0xf0   : > { %11554 = dma.hbm_to_vmem [thread:$0]  (!%p14905_p6), %s13277_s13, 112, %s13280_s17, %s478_s21, %s14912_s4, %s14912_s4, %s14911_s11  }
  0xf1   : > { %p14913_p2 = scmp.ne.s32.totalorder %s14902_s20, 0 }
  0xf2   : > { %p14914_p4 = scmp.eq.s32.totalorder (!%p14913_p2), %s13124_s5, 0 }
  0xf3   : > { %500 = sbr.rel (%p14913_p2) target bundleno = 4717 (0x126d), region = 60 }
  0xfa   : > { %12855 = dma.done.wait (%p14914_p4), [#allocation3], 256   ;;  %p14915_p8 = pmov %p14914_p4 }
  0xfb   : > { %s506_s24 = sand.u32 1, %s13124_s5   ;;  %s508_s18 = sand.u32 1, %s12880_s14  }
  0xfc   : > { %12857 = vsyncadd (%p14915_p8), [#allocation3], 4294967040  ;;  %s11506_s26 = smul.u32 5376, %s508_s18  ;;  %s507_s16 = scalar_lea.sflag [#allocation5], %s506_s24 }
  0xfd   : > { %p14916_p12 = scmp.ne.s32.totalorder %s14901_s23, 0 }
  0xfe   : > { %s13317_s22 = scalar_lea.vmem [#allocation4], %s11506_s26 }
  0xff   : > { %12859 = dma.done.wait (%p14916_p12), %s507_s16, 86352  }
 0x100   : > { %12861 = vsyncadd (%p14916_p12), %s507_s16, 4294880944  ;;  %s11507_s20 = smul.u32 21, %s508_s18  ;;  %s525_s17 = scalar_lea.sflag [#allocation8], %s506_s24 }
 0x101   : > { %s11508_s13 = smul.u32 7, %s508_s18 }
 0x102   : > { %s13323_s15 = scalar_lea.vmem [#allocation6], %s11507_s20 }
 0x103   : > { %s13325_s21 = scalar_lea.vmem [#allocation7], %s11508_s13 }
 0x104   : > { %12863 = dma.done.wait (%p14916_p12), %s525_s17, 5488  }
 0x105   : > { %12865 = vsyncadd (%p14916_p12), %s525_s17, 4294961808  ;;  %s11509_s2 = smul.u32 336, %s508_s18  ;;  %s543_s25 = scalar_lea.sflag [#allocation11], %s506_s24 }
 0x106   : > { %s13333_s28 = scalar_lea.vmem [#allocation10], %s11508_s13 }
 0x107   : > { %s13331_s12 = scalar_lea.vmem [#allocation9], %s11509_s2 }
 0x108   : > { %12867 = dma.done.wait (%p14916_p12), %s543_s25, 5488  }
 0x109   : > { %12869 = vsyncadd (%p14916_p12), %s543_s25, 4294961808  ;;  %s13339_s29 = scalar_lea.vmem [#allocation12], %s11509_s2  ;;  %s561_s10 = scalar_lea.sflag [#allocation14], %s508_s18 }
 0x10a   : > { %s13341_s19 = scalar_lea.vmem [#allocation13], %s11508_s13 }
 0x10b   : > { %12871 = dma.done.wait (%p14916_p12), %s561_s10, 112  }
 0x10c   : > { %12873 = vsyncadd (%p14916_p12), %s561_s10, 4294967184  ;;  %vm666_vm0 = vcmask 1042432   ;;  %v658_v0 = vld [vmem:[%s14862_s0] sm:$0x77]  ;;  %v659_v1 = vld [vmem:[%s14862_s0 + $0x8] sm:$0x77]  ;;  %v684_v17 = vlaneseq }
 0x10d   : > { %v662_v2 = vcombine.high %v658_v0, %v658_v0  ;;  %v667_v3 = vsel %vm666_vm0, %v658_v0, 0.0  ;;  %v663_v4 = vcombine.high %v659_v1, %v659_v1  ;;  %v672_v6 = vsel %vm666_vm0, %v659_v1, 0.0  ;;  %v680_v10 = vld [vmem:[#allocation2] sm:$0x77]  ;;  %v681_v11 = vld [vmem:[#allocation2 + $0x8] sm:$0x77] }
 0x10e   : > { %v698_v12 = vcombine.high %v680_v10, %v680_v10  ;;  %v699_v13 = vcombine.high %v681_v11, %v681_v11  ;;  %v12905_v14 = vmov 0.0   ;;  %v11609_v15 = vld [vmem:[%s13317_s22 + $0x4] ss:$84 sps:$4 sm:$0xff]   ;;  %v11612_v16 = vld [vmem:[%s13317_s22 + $0xc] ss:$84 sps:$4 sm:$0xff]   ;;  %v685_v18 = vand.u32 127, %v684_v17 }
 0x10f   : > { %v668_v5 = vsel %vm666_vm0, %v662_v2, 0.0  ;;  %v673_v7 = vsel %vm666_vm0, %v663_v4, 0.0  ;;  %775 = vmatprep.mubr.f32.mxu0 %v12905_v14  ;;  %846 = vmatprep.mubr.f32.mxu1 %v12905_v14  ;;  %v13365_v19 = vshrl.u32 %v684_v17, 7  ;;  %v11607_v25 = vld [vmem:[%s13317_s22] ss:$84 sps:$4 sm:$0xff]   ;;  %vm694_vm1 = vcmask 1041409  }
 0x110   : > { %v669_v8 = vadd.f32 %v668_v5, %v667_v3  ;;  %v674_v9 = vadd.f32 %v673_v7, %v672_v6  ;;  %8854 = vmatprep.subr.msk.mxu0 %vm666_vm0, %v698_v12  ;;  %8857 = vmatprep.subr.msk.mxu1 %vm666_vm0, %v699_v13  ;;  %v11610_v26 = vld [vmem:[%s13317_s22 + $0x8] ss:$84 sps:$4 sm:$0xff]   ;;  %v11615_v27 = vld [vmem:[%s13317_s22 + $0xac] ss:$84 sps:$4 sm:$0xff]   ;;  %vm700_vm2 = vcmask 23552   ;;  %s639_s23 = smul.u32 7, %s13124_s5 }
 0x111   : > { %8855 = vmatpush1.msk.msra.mxu0 %vm666_vm0, %v680_v10  ;;  %8858 = vmatpush1.msk.msra.mxu1 %vm666_vm0, %v681_v11  ;;  %v688_v21 = vsub.s32 %v685_v18, %v13365_v19  ;;  %v11618_v28 = vld [vmem:[%s13317_s22 + $0xb4] ss:$84 sps:$4 sm:$0xff]   ;;  %v11616_v33 = vld [vmem:[%s13317_s22 + $0xb0] ss:$84 sps:$4 sm:$0xff]   ;;  %v11622_v37 = vld [vmem:[%s13317_s22 + $0x158] ss:$84 sps:$4 sm:$0xff]  }
 0x112   : > { %670 = vadd.xlane.f32.xlu0 %v669_v8  ;;  %5064 = vmatprep.subr.bf16.mxu0 %v11609_v15  ;;  %v11613_v32 = vld [vmem:[%s13317_s22 + $0xa8] ss:$84 sps:$4 sm:$0xff]   ;;  %v11619_v36 = vld [vmem:[%s13317_s22 + $0x150] ss:$84 sps:$4 sm:$0xff]   ;;  %v11625_v40 = vld [vmem:[%s13317_s22 + $0x1f8] ss:$84 sps:$4 sm:$0xff]  }
 0x113   : > { %5146 = vmatprep.subr.bf16.mxu1 %v11612_v16  ;;  %v11621_v34 = vld [vmem:[%s13317_s22 + $0x154] ss:$84 sps:$4 sm:$0xff]   ;;  %v11624_v35 = vld [vmem:[%s13317_s22 + $0x15c] ss:$84 sps:$4 sm:$0xff]   ;;  %v11630_v39 = vld [vmem:[%s13317_s22 + $0x204] ss:$84 sps:$4 sm:$0xff]  }
 0x114   : > { %v11627_v38 = vld [vmem:[%s13317_s22 + $0x1fc] ss:$84 sps:$4 sm:$0xff]   ;;  %v11628_v41 = vld [vmem:[%s13317_s22 + $0x200] ss:$84 sps:$4 sm:$0xff]   ;;  %v11633_v42 = vld [vmem:[%s13317_s22 + $0x2a4] ss:$84 sps:$4 sm:$0xff]  }
 0x115   : > { %v11636_v43 = vld [vmem:[%s13317_s22 + $0x2ac] ss:$84 sps:$4 sm:$0xff]   ;;  %v11634_v45 = vld [vmem:[%s13317_s22 + $0x2a8] ss:$84 sps:$4 sm:$0xff]   ;;  %v11640_v49 = vld [vmem:[%s13317_s22 + $0x350] ss:$84 sps:$4 sm:$0xff]  }
 0x116   : > { %675 = vadd.xlane.f32.xlu0 %v674_v9  ;;  %v11631_v44 = vld [vmem:[%s13317_s22 + $0x2a0] ss:$84 sps:$4 sm:$0xff]   ;;  %v11637_v48 = vld [vmem:[%s13317_s22 + $0x348] ss:$84 sps:$4 sm:$0xff]   ;;  %v11643_v52 = vld [vmem:[%s13317_s22 + $0x3f0] ss:$84 sps:$4 sm:$0xff]  }
 0x117   : > { %v11639_v46 = vld [vmem:[%s13317_s22 + $0x34c] ss:$84 sps:$4 sm:$0xff]   ;;  %v11642_v47 = vld [vmem:[%s13317_s22 + $0x354] ss:$84 sps:$4 sm:$0xff]   ;;  %v11648_v51 = vld [vmem:[%s13317_s22 + $0x3fc] ss:$84 sps:$4 sm:$0xff]  }
 0x118   : > { %v11645_v50 = vld [vmem:[%s13317_s22 + $0x3f4] ss:$84 sps:$4 sm:$0xff]   ;;  %v11646_v53 = vld [vmem:[%s13317_s22 + $0x3f8] ss:$84 sps:$4 sm:$0xff]   ;;  %v11651_v54 = vld [vmem:[%s13317_s22 + $0x49c] ss:$84 sps:$4 sm:$0xff]  }
 0x119   : > { %v11654_v55 = vld [vmem:[%s13317_s22 + $0x4a4] ss:$84 sps:$4 sm:$0xff]   ;;  %v11652_v57 = vld [vmem:[%s13317_s22 + $0x4a0] ss:$84 sps:$4 sm:$0xff]   ;;  %v11658_v61 = vld [vmem:[%s13317_s22 + $0x548] ss:$84 sps:$4 sm:$0xff]  }
 0x11a   : > { %v11649_v56 = vld [vmem:[%s13317_s22 + $0x498] ss:$84 sps:$4 sm:$0xff]   ;;  %v11655_v60 = vld [vmem:[%s13317_s22 + $0x540] ss:$84 sps:$4 sm:$0xff]   ;;  %v11661_v0 = vld [vmem:[%s13317_s22 + $0x5e8] ss:$84 sps:$4 sm:$0xff]  }
 0x11b   : > { %v11657_v58 = vld [vmem:[%s13317_s22 + $0x544] ss:$84 sps:$4 sm:$0xff]   ;;  %v11660_v59 = vld [vmem:[%s13317_s22 + $0x54c] ss:$84 sps:$4 sm:$0xff]   ;;  %v11666_v63 = vld [vmem:[%s13317_s22 + $0x5f4] ss:$84 sps:$4 sm:$0xff]  }
 0x11c   : > { %v11663_v62 = vld [vmem:[%s13317_s22 + $0x5ec] ss:$84 sps:$4 sm:$0xff]   ;;  %v11664_v1 = vld [vmem:[%s13317_s22 + $0x5f0] ss:$84 sps:$4 sm:$0xff]   ;;  %v11669_v2 = vld [vmem:[%s13317_s22 + $0x694] ss:$84 sps:$4 sm:$0xff]  }
 0x11d   : > { %v11672_v3 = vld [vmem:[%s13317_s22 + $0x69c] ss:$84 sps:$4 sm:$0xff]   ;;  %v11670_v5 = vld [vmem:[%s13317_s22 + $0x698] ss:$84 sps:$4 sm:$0xff]   ;;  %v11676_v9 = vld [vmem:[%s13317_s22 + $0x740] ss:$84 sps:$4 sm:$0xff]  }
 0x11e   : > { %v11667_v4 = vld [vmem:[%s13317_s22 + $0x690] ss:$84 sps:$4 sm:$0xff]   ;;  %v11673_v8 = vld [vmem:[%s13317_s22 + $0x738] ss:$84 sps:$4 sm:$0xff]   ;;  %v11679_v12 = vld [vmem:[%s13317_s22 + $0x7e0] ss:$84 sps:$4 sm:$0xff]  }
 0x11f   : > { %v11675_v6 = vld [vmem:[%s13317_s22 + $0x73c] ss:$84 sps:$4 sm:$0xff]   ;;  %v11678_v7 = vld [vmem:[%s13317_s22 + $0x744] ss:$84 sps:$4 sm:$0xff]   ;;  %v11684_v11 = vld [vmem:[%s13317_s22 + $0x7ec] ss:$84 sps:$4 sm:$0xff]  }
 0x120   : > { %v11681_v10 = vld [vmem:[%s13317_s22 + $0x7e4] ss:$84 sps:$4 sm:$0xff]   ;;  %v11682_v13 = vld [vmem:[%s13317_s22 + $0x7e8] ss:$84 sps:$4 sm:$0xff]   ;;  %v11687_v15 = vld [vmem:[%s13317_s22 + $0x88c] ss:$84 sps:$4 sm:$0xff]  }
 0x121   : > { %v11690_v16 = vld [vmem:[%s13317_s22 + $0x894] ss:$84 sps:$4 sm:$0xff]   ;;  %v11688_v18 = vld [vmem:[%s13317_s22 + $0x890] ss:$84 sps:$4 sm:$0xff]   ;;  %p640_p6 = scmp.lt.s32.totalorder %s639_s23, 13  ;;  %s14917_s18 = sld [smem:[#allocation24_spill]] }
 0x122   : > { %v11685_v17 = vld [vmem:[%s13317_s22 + $0x888] ss:$84 sps:$4 sm:$0xff]   ;;  %vm12907_vm3 = vmmov 0   ;;  %vm6194_vm4 = vcmask 392192   ;;  %s14918_s13 = sld [smem:[#allocation27_spill]] }
 0x123   : > { %s14926_s23 = smov (!%p640_p6, %s639_s23), 13 }
 0x124   : > { %s11510_s5 = smul.u32 384, %s14926_s23  ;;  %s8853_s16 = sshll.u32 %s14926_s23, 1 }
 0x127   : > { %s14120_s26 = scalar_lea.vmem %s14917_s18, %s11510_s5 }
 0x128   : > { %s14354_s17 = scalar_lea.vmem %s14918_s13, %s8853_s16 }
 0x19f   : > { %v671_v20 = vpop.xlane.xlu0 %670 }
 0x1a0   : > { %v678_v22 = vmul.f32 0.00390625, %v671_v20  ;;  %v11693_v20 = vld [vmem:[%s13317_s22 + $0x934] ss:$84 sps:$4 sm:$0xff]  }
 0x1a2   : > { %v689_v29 = vrot.slane %v678_v22, %v688_v21  ;;  %v11691_v22 = vld [vmem:[%s13317_s22 + $0x930] ss:$84 sps:$4 sm:$0xff]  }
 0x1a3   : > { %v676_v23 = vpop.xlane.xlu0 %675 }
 0x1a4   : > { %v679_v24 = vmul.f32 0.00390625, %v676_v23  ;;  %v11694_v23 = vld [vmem:[%s13317_s22 + $0x938] ss:$84 sps:$4 sm:$0xff]  }
 0x1a6   : > { %v693_v30 = vrot.slane %v679_v24, %v688_v21  ;;  %v11696_v21 = vld [vmem:[%s13317_s22 + $0x93c] ss:$84 sps:$4 sm:$0xff]  }
 0x1a7   : > { %v11699_v24 = vld [vmem:[%s13317_s22 + $0x9dc] ss:$84 sps:$4 sm:$0xff]  }
 0x1a8   : > { %v695_v31 = vsel %vm694_vm1, %v693_v30, %v689_v29  ;;  %v11708_v29 = vld [vmem:[%s13317_s22 + $0xa8c] ss:$84 sps:$4 sm:$0xff]  }
 0x1a9   : > { %8856 = vmatmul.mubr.msk.f32.vlgmr.msra.gmra.mrb[0].mxu0 %vm700_vm2, %v695_v31  ;;  %8859 = vmatmul.mubr.msk.f32.vlgmr.msra.gmra.mrb[0].mxu1 %vm700_vm2, %v695_v31 }
 0x1aa   : > { %5065 = vmatpush1.bf16.msra.mxu0 %v11607_v25  ;;  %5147 = vmatpush1.bf16.msra.mxu1 %v11610_v26  ;;  %v11702_v25 = vld [vmem:[%s13317_s22 + $0x9e4] ss:$84 sps:$4 sm:$0xff]  }
 0x1ab   : > { %5066 = vmatprep.subr.bf16.mxu0 %v11615_v27  ;;  %5148 = vmatprep.subr.bf16.mxu1 %v11618_v28  ;;  %v11697_v26 = vld [vmem:[%s13317_s22 + $0x9d8] ss:$84 sps:$4 sm:$0xff]   ;;  %v11700_v27 = vld [vmem:[%s13317_s22 + $0x9e0] ss:$84 sps:$4 sm:$0xff]  }
 0x1ac   : > { %v11705_v28 = vld [vmem:[%s13317_s22 + $0xa84] ss:$84 sps:$4 sm:$0xff]  }
 0x1ae   : > { %5067 = vmatpush1.bf16.msra.mxu0 %v11613_v32  ;;  %5149 = vmatpush1.bf16.msra.mxu1 %v11616_v33 }
 0x1af   : > { %5068 = vmatprep.subr.bf16.mxu0 %v11621_v34  ;;  %5150 = vmatprep.subr.bf16.mxu1 %v11624_v35  ;;  %v11703_v35 = vld [vmem:[%s13317_s22 + $0xa80] ss:$84 sps:$4 sm:$0xff]  }
 0x1b2   : > { %5069 = vmatpush1.bf16.msra.mxu0 %v11619_v36  ;;  %5151 = vmatpush1.bf16.msra.mxu1 %v11622_v37  ;;  %v11706_v36 = vld [vmem:[%s13317_s22 + $0xa88] ss:$84 sps:$4 sm:$0xff]  }
 0x1b3   : > { %5070 = vmatprep.subr.bf16.mxu0 %v11627_v38  ;;  %5152 = vmatprep.subr.bf16.mxu1 %v11630_v39  ;;  %v11711_v38 = vld [vmem:[%s13317_s22 + $0xb2c] ss:$84 sps:$4 sm:$0xff]   ;;  %v11714_v39 = vld [vmem:[%s13317_s22 + $0xb34] ss:$84 sps:$4 sm:$0xff]  }
 0x1b6   : > { %5071 = vmatpush1.bf16.msra.mxu0 %v11625_v40  ;;  %5153 = vmatpush1.bf16.msra.mxu1 %v11628_v41  ;;  %v11709_v41 = vld [vmem:[%s13317_s22 + $0xb28] ss:$84 sps:$4 sm:$0xff]  }
 0x1b7   : > { %5072 = vmatprep.subr.bf16.mxu0 %v11633_v42  ;;  %5154 = vmatprep.subr.bf16.mxu1 %v11636_v43  ;;  %v11712_v42 = vld [vmem:[%s13317_s22 + $0xb30] ss:$84 sps:$4 sm:$0xff]   ;;  %v11717_v43 = vld [vmem:[%s13317_s22 + $0xbd4] ss:$84 sps:$4 sm:$0xff]  }
 0x1ba   : > { %5073 = vmatpush1.bf16.msra.mxu0 %v11631_v44  ;;  %5155 = vmatpush1.bf16.msra.mxu1 %v11634_v45  ;;  %v11720_v44 = vld [vmem:[%s13317_s22 + $0xbdc] ss:$84 sps:$4 sm:$0xff]  }
 0x1bb   : > { %5074 = vmatprep.subr.bf16.mxu0 %v11639_v46  ;;  %5156 = vmatprep.subr.bf16.mxu1 %v11642_v47  ;;  %v11715_v45 = vld [vmem:[%s13317_s22 + $0xbd0] ss:$84 sps:$4 sm:$0xff]   ;;  %v11718_v46 = vld [vmem:[%s13317_s22 + $0xbd8] ss:$84 sps:$4 sm:$0xff]  }
 0x1bc   : > { %v11723_v47 = vld [vmem:[%s13317_s22 + $0xc7c] ss:$84 sps:$4 sm:$0xff]  }
 0x1be   : > { %5075 = vmatpush1.bf16.msra.mxu0 %v11637_v48  ;;  %5157 = vmatpush1.bf16.msra.mxu1 %v11640_v49  ;;  %v11726_v48 = vld [vmem:[%s13317_s22 + $0xc84] ss:$84 sps:$4 sm:$0xff]  }
 0x1bf   : > { %5076 = vmatprep.subr.bf16.mxu0 %v11645_v50  ;;  %5158 = vmatprep.subr.bf16.mxu1 %v11648_v51  ;;  %v11721_v49 = vld [vmem:[%s13317_s22 + $0xc78] ss:$84 sps:$4 sm:$0xff]   ;;  %v11724_v50 = vld [vmem:[%s13317_s22 + $0xc80] ss:$84 sps:$4 sm:$0xff]  }
 0x1c0   : > { %v11729_v51 = vld [vmem:[%s13317_s22 + $0xd24] ss:$84 sps:$4 sm:$0xff]  }
 0x1c2   : > { %5077 = vmatpush1.bf16.msra.mxu0 %v11643_v52  ;;  %5159 = vmatpush1.bf16.msra.mxu1 %v11646_v53  ;;  %v11732_v52 = vld [vmem:[%s13317_s22 + $0xd2c] ss:$84 sps:$4 sm:$0xff]  }
 0x1c3   : > { %5078 = vmatprep.subr.bf16.mxu0 %v11651_v54  ;;  %5160 = vmatprep.subr.bf16.mxu1 %v11654_v55  ;;  %v11727_v53 = vld [vmem:[%s13317_s22 + $0xd20] ss:$84 sps:$4 sm:$0xff]   ;;  %v11730_v54 = vld [vmem:[%s13317_s22 + $0xd28] ss:$84 sps:$4 sm:$0xff]  }
 0x1c4   : > { %v11735_v55 = vld [vmem:[%s13317_s22 + $0xdcc] ss:$84 sps:$4 sm:$0xff]  }
 0x1c6   : > { %5079 = vmatpush1.bf16.msra.mxu0 %v11649_v56  ;;  %5161 = vmatpush1.bf16.msra.mxu1 %v11652_v57  ;;  %v11738_v56 = vld [vmem:[%s13317_s22 + $0xdd4] ss:$84 sps:$4 sm:$0xff]  }
 0x1c7   : > { %5080 = vmatprep.subr.bf16.mxu0 %v11657_v58  ;;  %5162 = vmatprep.subr.bf16.mxu1 %v11660_v59  ;;  %v11733_v57 = vld [vmem:[%s13317_s22 + $0xdc8] ss:$84 sps:$4 sm:$0xff]   ;;  %v11736_v58 = vld [vmem:[%s13317_s22 + $0xdd0] ss:$84 sps:$4 sm:$0xff]  }
 0x1c8   : > { %v11741_v59 = vld [vmem:[%s13317_s22 + $0xe74] ss:$84 sps:$4 sm:$0xff]  }
 0x1ca   : > { %5081 = vmatpush1.bf16.msra.mxu0 %v11655_v60  ;;  %5163 = vmatpush1.bf16.msra.mxu1 %v11658_v61  ;;  %v11744_v60 = vld [vmem:[%s13317_s22 + $0xe7c] ss:$84 sps:$4 sm:$0xff]  }
 0x1cb   : > { %5082 = vmatprep.subr.bf16.mxu0 %v11663_v62  ;;  %5164 = vmatprep.subr.bf16.mxu1 %v11666_v63  ;;  %v11739_v61 = vld [vmem:[%s13317_s22 + $0xe70] ss:$84 sps:$4 sm:$0xff]   ;;  %v11742_v62 = vld [vmem:[%s13317_s22 + $0xe78] ss:$84 sps:$4 sm:$0xff]  }
 0x1cc   : > { %v11747_v63 = vld [vmem:[%s13317_s22 + $0xf1c] ss:$84 sps:$4 sm:$0xff]  }
 0x1ce   : > { %5083 = vmatpush1.bf16.msra.mxu0 %v11661_v0  ;;  %5165 = vmatpush1.bf16.msra.mxu1 %v11664_v1  ;;  %v11750_v0 = vld [vmem:[%s13317_s22 + $0xf24] ss:$84 sps:$4 sm:$0xff]  }
 0x1cf   : > { %5084 = vmatprep.subr.bf16.mxu0 %v11669_v2  ;;  %5166 = vmatprep.subr.bf16.mxu1 %v11672_v3  ;;  %v11745_v1 = vld [vmem:[%s13317_s22 + $0xf18] ss:$84 sps:$4 sm:$0xff]   ;;  %v11748_v2 = vld [vmem:[%s13317_s22 + $0xf20] ss:$84 sps:$4 sm:$0xff]  }
 0x1d0   : > { %v11753_v3 = vld [vmem:[%s13317_s22 + $0xfc4] ss:$84 sps:$4 sm:$0xff]  }
 0x1d2   : > { %5085 = vmatpush1.bf16.msra.mxu0 %v11667_v4  ;;  %5167 = vmatpush1.bf16.msra.mxu1 %v11670_v5  ;;  %v11756_v4 = vld [vmem:[%s13317_s22 + $0xfcc] ss:$84 sps:$4 sm:$0xff]  }
 0x1d3   : > { %5086 = vmatprep.subr.bf16.mxu0 %v11675_v6  ;;  %5168 = vmatprep.subr.bf16.mxu1 %v11678_v7  ;;  %v11751_v5 = vld [vmem:[%s13317_s22 + $0xfc0] ss:$84 sps:$4 sm:$0xff]   ;;  %v11754_v6 = vld [vmem:[%s13317_s22 + $0xfc8] ss:$84 sps:$4 sm:$0xff]  }
 0x1d4   : > { %v11759_v7 = vld [vmem:[%s13317_s22 + $0x106c] ss:$84 sps:$4 sm:$0xff]  }
 0x1d6   : > { %5087 = vmatpush1.bf16.msra.mxu0 %v11673_v8  ;;  %5169 = vmatpush1.bf16.msra.mxu1 %v11676_v9  ;;  %v11762_v8 = vld [vmem:[%s13317_s22 + $0x1074] ss:$84 sps:$4 sm:$0xff]  }
 0x1d7   : > { %5088 = vmatprep.subr.bf16.mxu0 %v11681_v10  ;;  %5170 = vmatprep.subr.bf16.mxu1 %v11684_v11  ;;  %v11757_v9 = vld [vmem:[%s13317_s22 + $0x1068] ss:$84 sps:$4 sm:$0xff]   ;;  %v11760_v10 = vld [vmem:[%s13317_s22 + $0x1070] ss:$84 sps:$4 sm:$0xff]  }
 0x1d8   : > { %v11765_v11 = vld [vmem:[%s13317_s22 + $0x1114] ss:$84 sps:$4 sm:$0xff]  }
 0x1da   : > { %5089 = vmatpush1.bf16.msra.mxu0 %v11679_v12  ;;  %5171 = vmatpush1.bf16.msra.mxu1 %v11682_v13  ;;  %v11768_v12 = vld [vmem:[%s13317_s22 + $0x111c] ss:$84 sps:$4 sm:$0xff]  }
 0x1db   : > { %5090 = vmatprep.subr.bf16.mxu0 %v11687_v15  ;;  %5172 = vmatprep.subr.bf16.mxu1 %v11690_v16  ;;  %v11763_v13 = vld [vmem:[%s13317_s22 + $0x1110] ss:$84 sps:$4 sm:$0xff]   ;;  %v11766_v15 = vld [vmem:[%s13317_s22 + $0x1118] ss:$84 sps:$4 sm:$0xff]  }
 0x1dc   : > { %v11771_v16 = vld [vmem:[%s13317_s22 + $0x11bc] ss:$84 sps:$4 sm:$0xff]  }
 0x1de   : > { %5091 = vmatpush1.bf16.msra.mxu0 %v11685_v17  ;;  %5173 = vmatpush1.bf16.msra.mxu1 %v11688_v18  ;;  %v11774_v17 = vld [vmem:[%s13317_s22 + $0x11c4] ss:$84 sps:$4 sm:$0xff]  }
 0x1df   : > { %5092 = vmatprep.subr.bf16.mxu0 %v11693_v20  ;;  %5174 = vmatprep.subr.bf16.mxu1 %v11696_v21  ;;  %v11769_v18 = vld [vmem:[%s13317_s22 + $0x11b8] ss:$84 sps:$4 sm:$0xff]   ;;  %v11772_v20 = vld [vmem:[%s13317_s22 + $0x11c0] ss:$84 sps:$4 sm:$0xff]  }
 0x1e0   : > { %v11777_v21 = vld [vmem:[%s13317_s22 + $0x1264] ss:$84 sps:$4 sm:$0xff]  }
 0x1e2   : > { %5093 = vmatpush1.bf16.msra.mxu0 %v11691_v22  ;;  %5175 = vmatpush1.bf16.msra.mxu1 %v11694_v23  ;;  %v11780_v22 = vld [vmem:[%s13317_s22 + $0x126c] ss:$84 sps:$4 sm:$0xff]  }
 0x1e3   : > { %5094 = vmatprep.subr.bf16.mxu0 %v11699_v24  ;;  %5176 = vmatprep.subr.bf16.mxu1 %v11702_v25  ;;  %v11775_v23 = vld [vmem:[%s13317_s22 + $0x1260] ss:$84 sps:$4 sm:$0xff]   ;;  %v11778_v24 = vld [vmem:[%s13317_s22 + $0x1268] ss:$84 sps:$4 sm:$0xff]  }
 0x1e4   : > { %v11783_v25 = vld [vmem:[%s13317_s22 + $0x130c] ss:$84 sps:$4 sm:$0xff]  }
 0x1e6   : > { %5095 = vmatpush1.bf16.msra.mxu0 %v11697_v26  ;;  %5177 = vmatpush1.bf16.msra.mxu1 %v11700_v27  ;;  %v11786_v26 = vld [vmem:[%s13317_s22 + $0x1314] ss:$84 sps:$4 sm:$0xff]  }
 0x1e7   : > { %5105 = vmatprep.subr.bf16.mxu0 %v11705_v28  ;;  %5187 = vmatprep.subr.bf16.mxu1 %v11708_v29  ;;  %v11781_v27 = vld [vmem:[%s13317_s22 + $0x1308] ss:$84 sps:$4 sm:$0xff]   ;;  %v11784_v28 = vld [vmem:[%s13317_s22 + $0x1310] ss:$84 sps:$4 sm:$0xff]  }
 0x1e8   : > { %v11789_v29 = vld [vmem:[%s13317_s22 + $0x13b4] ss:$84 sps:$4 sm:$0xff]  }
 0x27c   : > { %v777_v30 = vpop.f32.mrb[0].mxu0  ;;  %v13432_v31 = vpop.f32.mrb[0].mxu1 }
 0x27d   : > { %v779_v32 = vpop.f32.mrb[1].mxu0  ;;  %v850_v33 = vpop.f32.mrb[1].mxu1  ;;  %v13438_v37 = vpack.c.bf16 %v777_v30, %v777_v30  ;;  %v11792_v30 = vld [vmem:[%s13317_s22 + $0x13bc] ss:$84 sps:$4 sm:$0xff]  }
 0x27e   : > { %v13434_v34 = vpack.c.bf16 %v779_v32, %v779_v32  ;;  %v13444_v40 = vpack.c.bf16 %v850_v33, %v850_v33  ;;  %v11787_v32 = vld [vmem:[%s13317_s22 + $0x13b0] ss:$84 sps:$4 sm:$0xff]   ;;  %v11790_v33 = vld [vmem:[%s13317_s22 + $0x13b8] ss:$84 sps:$4 sm:$0xff]  }
 0x280   : > { %5096 = vmatprep.mubr.bf16.mxu0 %v13434_v34  ;;  %5178 = vmatprep.mubr.bf16.mxu1 %v13434_v34 }
 0x281   : > { %5097 = vmatmul.mubr.bf16.vlgmr.msra.gmra.mrb[4].mxu0 %v13438_v37  ;;  %5179 = vmatmul.mubr.bf16.vlgmr.msra.gmra.mrb[4].mxu1 %v13438_v37 }
 0x282   : > { %5106 = vmatpush1.bf16.msra.mxu0 %v11703_v35  ;;  %5188 = vmatpush1.bf16.msra.mxu1 %v11706_v36  ;;  %v11795_v35 = vld [vmem:[%s13317_s22 + $0x145c] ss:$84 sps:$4 sm:$0xff]   ;;  %v11798_v36 = vld [vmem:[%s13317_s22 + $0x1464] ss:$84 sps:$4 sm:$0xff]  }
 0x283   : > { %5137 = vmatprep.mubr.bf16.mxu0 %v13444_v40  ;;  %5219 = vmatprep.mubr.bf16.mxu1 %v13444_v40 }
 0x284   : > { %5107 = vmatprep.subr.bf16.mxu0 %v11711_v38  ;;  %5189 = vmatprep.subr.bf16.mxu1 %v11714_v39  ;;  %v11793_v38 = vld [vmem:[%s13317_s22 + $0x1458] ss:$84 sps:$4 sm:$0xff]   ;;  %v11796_v39 = vld [vmem:[%s13317_s22 + $0x1460] ss:$84 sps:$4 sm:$0xff]  }
 0x286   : > { %5108 = vmatpush1.bf16.msra.mxu0 %v11709_v41  ;;  %5190 = vmatpush1.bf16.msra.mxu1 %v11712_v42  ;;  %v11801_v41 = vld [vmem:[%s13317_s22 + $0x14] ss:$84 sps:$4 sm:$0xff]   ;;  %v11804_v42 = vld [vmem:[%s13317_s22 + $0x1c] ss:$84 sps:$4 sm:$0xff]  }
 0x287   : > { %5109 = vmatprep.subr.bf16.mxu0 %v11717_v43  ;;  %5191 = vmatprep.subr.bf16.mxu1 %v11720_v44  ;;  %v11799_v43 = vld [vmem:[%s13317_s22 + $0x10] ss:$84 sps:$4 sm:$0xff]   ;;  %v13513_v44 = vpack.c.bf16 %v13432_v31, %v13432_v31  ;;  %v11808_v31 = vld [vmem:[%s13317_s22 + $0xc0] ss:$84 sps:$4 sm:$0xff]  }
 0x28a   : > { %5110 = vmatpush1.bf16.msra.mxu0 %v11715_v45  ;;  %5192 = vmatpush1.bf16.msra.mxu1 %v11718_v46  ;;  %v11802_v45 = vld [vmem:[%s13317_s22 + $0x18] ss:$84 sps:$4 sm:$0xff]   ;;  %v11807_v46 = vld [vmem:[%s13317_s22 + $0xbc] ss:$84 sps:$4 sm:$0xff]  }
 0x28b   : > { %5111 = vmatprep.subr.bf16.mxu0 %v11723_v47  ;;  %5193 = vmatprep.subr.bf16.mxu1 %v11726_v48  ;;  %v11810_v47 = vld [vmem:[%s13317_s22 + $0xc4] ss:$84 sps:$4 sm:$0xff]  }
 0x28c   : > { %v11805_v48 = vld [vmem:[%s13317_s22 + $0xb8] ss:$84 sps:$4 sm:$0xff]  }
 0x28e   : > { %5112 = vmatpush1.bf16.msra.mxu0 %v11721_v49  ;;  %5194 = vmatpush1.bf16.msra.mxu1 %v11724_v50  ;;  %v11813_v49 = vld [vmem:[%s13317_s22 + $0x164] ss:$84 sps:$4 sm:$0xff]   ;;  %v11816_v50 = vld [vmem:[%s13317_s22 + $0x16c] ss:$84 sps:$4 sm:$0xff]  }
 0x28f   : > { %5113 = vmatprep.subr.bf16.mxu0 %v11729_v51  ;;  %5195 = vmatprep.subr.bf16.mxu1 %v11732_v52  ;;  %v11811_v51 = vld [vmem:[%s13317_s22 + $0x160] ss:$84 sps:$4 sm:$0xff]   ;;  %v11814_v52 = vld [vmem:[%s13317_s22 + $0x168] ss:$84 sps:$4 sm:$0xff]  }
 0x292   : > { %5114 = vmatpush1.bf16.msra.mxu0 %v11727_v53  ;;  %5196 = vmatpush1.bf16.msra.mxu1 %v11730_v54  ;;  %v11819_v53 = vld [vmem:[%s13317_s22 + $0x20c] ss:$84 sps:$4 sm:$0xff]   ;;  %v11822_v54 = vld [vmem:[%s13317_s22 + $0x214] ss:$84 sps:$4 sm:$0xff]  }
 0x293   : > { %5115 = vmatprep.subr.bf16.mxu0 %v11735_v55  ;;  %5197 = vmatprep.subr.bf16.mxu1 %v11738_v56  ;;  %v11817_v55 = vld [vmem:[%s13317_s22 + $0x208] ss:$84 sps:$4 sm:$0xff]   ;;  %v11820_v56 = vld [vmem:[%s13317_s22 + $0x210] ss:$84 sps:$4 sm:$0xff]  }
 0x296   : > { %5116 = vmatpush1.bf16.msra.mxu0 %v11733_v57  ;;  %5198 = vmatpush1.bf16.msra.mxu1 %v11736_v58  ;;  %v11825_v57 = vld [vmem:[%s13317_s22 + $0x2b4] ss:$84 sps:$4 sm:$0xff]   ;;  %v11828_v58 = vld [vmem:[%s13317_s22 + $0x2bc] ss:$84 sps:$4 sm:$0xff]  }
 0x297   : > { %5117 = vmatprep.subr.bf16.mxu0 %v11741_v59  ;;  %5199 = vmatprep.subr.bf16.mxu1 %v11744_v60  ;;  %v11823_v59 = vld [vmem:[%s13317_s22 + $0x2b0] ss:$84 sps:$4 sm:$0xff]   ;;  %v11826_v60 = vld [vmem:[%s13317_s22 + $0x2b8] ss:$84 sps:$4 sm:$0xff]  }
 0x29a   : > { %5118 = vmatpush1.bf16.msra.mxu0 %v11739_v61  ;;  %5200 = vmatpush1.bf16.msra.mxu1 %v11742_v62  ;;  %v11831_v61 = vld [vmem:[%s13317_s22 + $0x35c] ss:$84 sps:$4 sm:$0xff]   ;;  %v11834_v62 = vld [vmem:[%s13317_s22 + $0x364] ss:$84 sps:$4 sm:$0xff]  }
 0x29b   : > { %5119 = vmatprep.subr.bf16.mxu0 %v11747_v63  ;;  %5201 = vmatprep.subr.bf16.mxu1 %v11750_v0  ;;  %v11829_v63 = vld [vmem:[%s13317_s22 + $0x358] ss:$84 sps:$4 sm:$0xff]   ;;  %v11832_v0 = vld [vmem:[%s13317_s22 + $0x360] ss:$84 sps:$4 sm:$0xff]  }
 0x29e   : > { %5120 = vmatpush1.bf16.msra.mxu0 %v11745_v1  ;;  %5202 = vmatpush1.bf16.msra.mxu1 %v11748_v2  ;;  %v11837_v1 = vld [vmem:[%s13317_s22 + $0x404] ss:$84 sps:$4 sm:$0xff]   ;;  %v11840_v2 = vld [vmem:[%s13317_s22 + $0x40c] ss:$84 sps:$4 sm:$0xff]  }
 0x29f   : > { %5121 = vmatprep.subr.bf16.mxu0 %v11753_v3  ;;  %5203 = vmatprep.subr.bf16.mxu1 %v11756_v4  ;;  %v11835_v3 = vld [vmem:[%s13317_s22 + $0x400] ss:$84 sps:$4 sm:$0xff]   ;;  %v11838_v4 = vld [vmem:[%s13317_s22 + $0x408] ss:$84 sps:$4 sm:$0xff]  }
 0x2a2   : > { %5122 = vmatpush1.bf16.msra.mxu0 %v11751_v5  ;;  %5204 = vmatpush1.bf16.msra.mxu1 %v11754_v6  ;;  %v11843_v5 = vld [vmem:[%s13317_s22 + $0x4ac] ss:$84 sps:$4 sm:$0xff]   ;;  %v11846_v6 = vld [vmem:[%s13317_s22 + $0x4b4] ss:$84 sps:$4 sm:$0xff]  }
 0x2a3   : > { %5123 = vmatprep.subr.bf16.mxu0 %v11759_v7  ;;  %5205 = vmatprep.subr.bf16.mxu1 %v11762_v8  ;;  %v11841_v7 = vld [vmem:[%s13317_s22 + $0x4a8] ss:$84 sps:$4 sm:$0xff]   ;;  %v11844_v8 = vld [vmem:[%s13317_s22 + $0x4b0] ss:$84 sps:$4 sm:$0xff]  }
 0x2a6   : > { %5124 = vmatpush1.bf16.msra.mxu0 %v11757_v9  ;;  %5206 = vmatpush1.bf16.msra.mxu1 %v11760_v10  ;;  %v11849_v9 = vld [vmem:[%s13317_s22 + $0x554] ss:$84 sps:$4 sm:$0xff]   ;;  %v11852_v10 = vld [vmem:[%s13317_s22 + $0x55c] ss:$84 sps:$4 sm:$0xff]  }
 0x2a7   : > { %5125 = vmatprep.subr.bf16.mxu0 %v11765_v11  ;;  %5207 = vmatprep.subr.bf16.mxu1 %v11768_v12  ;;  %v11847_v11 = vld [vmem:[%s13317_s22 + $0x550] ss:$84 sps:$4 sm:$0xff]   ;;  %v11850_v12 = vld [vmem:[%s13317_s22 + $0x558] ss:$84 sps:$4 sm:$0xff]  }
 0x2aa   : > { %5126 = vmatpush1.bf16.msra.mxu0 %v11763_v13  ;;  %5208 = vmatpush1.bf16.msra.mxu1 %v11766_v15  ;;  %v11855_v13 = vld [vmem:[%s13317_s22 + $0x5fc] ss:$84 sps:$4 sm:$0xff]   ;;  %v11858_v15 = vld [vmem:[%s13317_s22 + $0x604] ss:$84 sps:$4 sm:$0xff]  }
 0x2ab   : > { %5127 = vmatprep.subr.bf16.mxu0 %v11771_v16  ;;  %5209 = vmatprep.subr.bf16.mxu1 %v11774_v17  ;;  %v11853_v16 = vld [vmem:[%s13317_s22 + $0x5f8] ss:$84 sps:$4 sm:$0xff]   ;;  %v11856_v17 = vld [vmem:[%s13317_s22 + $0x600] ss:$84 sps:$4 sm:$0xff]  }
 0x2ae   : > { %5128 = vmatpush1.bf16.msra.mxu0 %v11769_v18  ;;  %5210 = vmatpush1.bf16.msra.mxu1 %v11772_v20  ;;  %v11861_v18 = vld [vmem:[%s13317_s22 + $0x6a4] ss:$84 sps:$4 sm:$0xff]   ;;  %v11864_v20 = vld [vmem:[%s13317_s22 + $0x6ac] ss:$84 sps:$4 sm:$0xff]  }
 0x2af   : > { %5129 = vmatprep.subr.bf16.mxu0 %v11777_v21  ;;  %5211 = vmatprep.subr.bf16.mxu1 %v11780_v22  ;;  %v11859_v21 = vld [vmem:[%s13317_s22 + $0x6a0] ss:$84 sps:$4 sm:$0xff]   ;;  %v11862_v22 = vld [vmem:[%s13317_s22 + $0x6a8] ss:$84 sps:$4 sm:$0xff]  }
 0x2b2   : > { %5130 = vmatpush1.bf16.msra.mxu0 %v11775_v23  ;;  %5212 = vmatpush1.bf16.msra.mxu1 %v11778_v24  ;;  %v11867_v23 = vld [vmem:[%s13317_s22 + $0x74c] ss:$84 sps:$4 sm:$0xff]   ;;  %v11870_v24 = vld [vmem:[%s13317_s22 + $0x754] ss:$84 sps:$4 sm:$0xff]  }
 0x2b3   : > { %5131 = vmatprep.subr.bf16.mxu0 %v11783_v25  ;;  %5213 = vmatprep.subr.bf16.mxu1 %v11786_v26  ;;  %v11865_v25 = vld [vmem:[%s13317_s22 + $0x748] ss:$84 sps:$4 sm:$0xff]   ;;  %v11868_v26 = vld [vmem:[%s13317_s22 + $0x750] ss:$84 sps:$4 sm:$0xff]  }
 0x2b6   : > { %5132 = vmatpush1.bf16.msra.mxu0 %v11781_v27  ;;  %5214 = vmatpush1.bf16.msra.mxu1 %v11784_v28  ;;  %v11873_v27 = vld [vmem:[%s13317_s22 + $0x7f4] ss:$84 sps:$4 sm:$0xff]   ;;  %v11876_v28 = vld [vmem:[%s13317_s22 + $0x7fc] ss:$84 sps:$4 sm:$0xff]  }
 0x2b7   : > { %5133 = vmatprep.subr.bf16.mxu0 %v11789_v29  ;;  %5215 = vmatprep.subr.bf16.mxu1 %v11792_v30  ;;  %v11871_v29 = vld [vmem:[%s13317_s22 + $0x7f0] ss:$84 sps:$4 sm:$0xff]   ;;  %v11874_v30 = vld [vmem:[%s13317_s22 + $0x7f8] ss:$84 sps:$4 sm:$0xff]  }
 0x2ba   : > { %5134 = vmatpush1.bf16.msra.mxu0 %v11787_v32  ;;  %5216 = vmatpush1.bf16.msra.mxu1 %v11790_v33  ;;  %v11879_v32 = vld [vmem:[%s13317_s22 + $0x89c] ss:$84 sps:$4 sm:$0xff]   ;;  %v11882_v33 = vld [vmem:[%s13317_s22 + $0x8a4] ss:$84 sps:$4 sm:$0xff]  }
 0x2bb   : > { %5135 = vmatprep.subr.bf16.mxu0 %v11795_v35  ;;  %5217 = vmatprep.subr.bf16.mxu1 %v11798_v36  ;;  %v11877_v35 = vld [vmem:[%s13317_s22 + $0x898] ss:$84 sps:$4 sm:$0xff]   ;;  %v11880_v36 = vld [vmem:[%s13317_s22 + $0x8a0] ss:$84 sps:$4 sm:$0xff]  }
 0x2be   : > { %5136 = vmatpush1.bf16.msra.mxu0 %v11793_v38  ;;  %5218 = vmatpush1.bf16.msra.mxu1 %v11796_v39  ;;  %v11885_v38 = vld [vmem:[%s13317_s22 + $0x944] ss:$84 sps:$4 sm:$0xff]   ;;  %v11888_v39 = vld [vmem:[%s13317_s22 + $0x94c] ss:$84 sps:$4 sm:$0xff]  }
 0x2bf   : > { %5228 = vmatprep.subr.bf16.mxu0 %v11801_v41  ;;  %5310 = vmatprep.subr.bf16.mxu1 %v11804_v42  ;;  %v11883_v41 = vld [vmem:[%s13317_s22 + $0x940] ss:$84 sps:$4 sm:$0xff]   ;;  %v11886_v42 = vld [vmem:[%s13317_s22 + $0x948] ss:$84 sps:$4 sm:$0xff]  }
 0x2c1   : > { %5138 = vmatmul.mubr.bf16.vlgmr.msra.gmra.mrb[4].mxu0 %v13513_v44  ;;  %5220 = vmatmul.mubr.bf16.vlgmr.msra.gmra.mrb[4].mxu1 %v13513_v44 }
 0x2c2   : > { %5229 = vmatpush1.bf16.msra.mxu0 %v11799_v43  ;;  %5260 = vmatprep.mubr.bf16.mxu0 %v13434_v34  ;;  %v11891_v43 = vld [vmem:[%s13317_s22 + $0x9ec] ss:$84 sps:$4 sm:$0xff]  }
 0x2c3   : > { %5311 = vmatpush1.bf16.msra.mxu1 %v11802_v45  ;;  %5342 = vmatprep.mubr.bf16.mxu1 %v13434_v34  ;;  %v11894_v45 = vld [vmem:[%s13317_s22 + $0x9f4] ss:$84 sps:$4 sm:$0xff]  }
 0x2c4   : > { %5230 = vmatprep.subr.bf16.mxu0 %v11807_v46  ;;  %5312 = vmatprep.subr.bf16.mxu1 %v11810_v47  ;;  %v11889_v46 = vld [vmem:[%s13317_s22 + $0x9e8] ss:$84 sps:$4 sm:$0xff]   ;;  %v11892_v47 = vld [vmem:[%s13317_s22 + $0x9f0] ss:$84 sps:$4 sm:$0xff]  }
 0x2c6   : > { %5231 = vmatpush1.bf16.msra.mxu0 %v11805_v48  ;;  %v11897_v48 = vld [vmem:[%s13317_s22 + $0xa94] ss:$84 sps:$4 sm:$0xff]  }
 0x2c7   : > { %5313 = vmatpush1.bf16.msra.mxu1 %v11808_v31  ;;  %5232 = vmatprep.subr.bf16.mxu0 %v11813_v49  ;;  %v11900_v31 = vld [vmem:[%s13317_s22 + $0xa9c] ss:$84 sps:$4 sm:$0xff]  }
 0x2c8   : > { %5314 = vmatprep.subr.bf16.mxu1 %v11816_v50  ;;  %v11895_v49 = vld [vmem:[%s13317_s22 + $0xa90] ss:$84 sps:$4 sm:$0xff]   ;;  %v11898_v50 = vld [vmem:[%s13317_s22 + $0xa98] ss:$84 sps:$4 sm:$0xff]  }
 0x2ca   : > { %5233 = vmatpush1.bf16.msra.mxu0 %v11811_v51  ;;  %v11903_v51 = vld [vmem:[%s13317_s22 + $0xb3c] ss:$84 sps:$4 sm:$0xff]  }
 0x2cb   : > { %5315 = vmatpush1.bf16.msra.mxu1 %v11814_v52  ;;  %5234 = vmatprep.subr.bf16.mxu0 %v11819_v53  ;;  %v11906_v52 = vld [vmem:[%s13317_s22 + $0xb44] ss:$84 sps:$4 sm:$0xff]  }
 0x2cc   : > { %5316 = vmatprep.subr.bf16.mxu1 %v11822_v54  ;;  %v11901_v53 = vld [vmem:[%s13317_s22 + $0xb38] ss:$84 sps:$4 sm:$0xff]   ;;  %v11904_v54 = vld [vmem:[%s13317_s22 + $0xb40] ss:$84 sps:$4 sm:$0xff]  }
 0x2ce   : > { %5235 = vmatpush1.bf16.msra.mxu0 %v11817_v55  ;;  %v11909_v55 = vld [vmem:[%s13317_s22 + $0xbe4] ss:$84 sps:$4 sm:$0xff]  }
 0x2cf   : > { %5317 = vmatpush1.bf16.msra.mxu1 %v11820_v56  ;;  %5236 = vmatprep.subr.bf16.mxu0 %v11825_v57  ;;  %v11912_v56 = vld [vmem:[%s13317_s22 + $0xbec] ss:$84 sps:$4 sm:$0xff]  }
 0x2d0   : > { %5318 = vmatprep.subr.bf16.mxu1 %v11828_v58  ;;  %v11907_v57 = vld [vmem:[%s13317_s22 + $0xbe0] ss:$84 sps:$4 sm:$0xff]   ;;  %v11910_v58 = vld [vmem:[%s13317_s22 + $0xbe8] ss:$84 sps:$4 sm:$0xff]  }
 0x2d2   : > { %5237 = vmatpush1.bf16.msra.mxu0 %v11823_v59  ;;  %v11915_v59 = vld [vmem:[%s13317_s22 + $0xc8c] ss:$84 sps:$4 sm:$0xff]  }
 0x2d3   : > { %5319 = vmatpush1.bf16.msra.mxu1 %v11826_v60  ;;  %5238 = vmatprep.subr.bf16.mxu0 %v11831_v61  ;;  %v11918_v60 = vld [vmem:[%s13317_s22 + $0xc94] ss:$84 sps:$4 sm:$0xff]  }
 0x2d4   : > { %5320 = vmatprep.subr.bf16.mxu1 %v11834_v62  ;;  %v11913_v61 = vld [vmem:[%s13317_s22 + $0xc88] ss:$84 sps:$4 sm:$0xff]   ;;  %v11916_v62 = vld [vmem:[%s13317_s22 + $0xc90] ss:$84 sps:$4 sm:$0xff]  }
 0x2d6   : > { %5239 = vmatpush1.bf16.msra.mxu0 %v11829_v63  ;;  %v11921_v63 = vld [vmem:[%s13317_s22 + $0xd34] ss:$84 sps:$4 sm:$0xff]  }
 0x2d7   : > { %5321 = vmatpush1.bf16.msra.mxu1 %v11832_v0  ;;  %5240 = vmatprep.subr.bf16.mxu0 %v11837_v1  ;;  %v11924_v0 = vld [vmem:[%s13317_s22 + $0xd3c] ss:$84 sps:$4 sm:$0xff]  }
 0x2d8   : > { %5322 = vmatprep.subr.bf16.mxu1 %v11840_v2  ;;  %v11919_v1 = vld [vmem:[%s13317_s22 + $0xd30] ss:$84 sps:$4 sm:$0xff]   ;;  %v11922_v2 = vld [vmem:[%s13317_s22 + $0xd38] ss:$84 sps:$4 sm:$0xff]  }
 0x2da   : > { %5241 = vmatpush1.bf16.msra.mxu0 %v11835_v3  ;;  %v11927_v3 = vld [vmem:[%s13317_s22 + $0xddc] ss:$84 sps:$4 sm:$0xff]  }
 0x2db   : > { %5323 = vmatpush1.bf16.msra.mxu1 %v11838_v4  ;;  %5242 = vmatprep.subr.bf16.mxu0 %v11843_v5  ;;  %v11930_v4 = vld [vmem:[%s13317_s22 + $0xde4] ss:$84 sps:$4 sm:$0xff]  }
 0x2dc   : > { %5324 = vmatprep.subr.bf16.mxu1 %v11846_v6  ;;  %v11925_v5 = vld [vmem:[%s13317_s22 + $0xdd8] ss:$84 sps:$4 sm:$0xff]   ;;  %v11928_v6 = vld [vmem:[%s13317_s22 + $0xde0] ss:$84 sps:$4 sm:$0xff]  }
 0x2de   : > { %5243 = vmatpush1.bf16.msra.mxu0 %v11841_v7  ;;  %v11933_v7 = vld [vmem:[%s13317_s22 + $0xe84] ss:$84 sps:$4 sm:$0xff]  }
 0x2df   : > { %5325 = vmatpush1.bf16.msra.mxu1 %v11844_v8  ;;  %5244 = vmatprep.subr.bf16.mxu0 %v11849_v9  ;;  %v11936_v8 = vld [vmem:[%s13317_s22 + $0xe8c] ss:$84 sps:$4 sm:$0xff]  }
 0x2e0   : > { %5326 = vmatprep.subr.bf16.mxu1 %v11852_v10  ;;  %v11931_v9 = vld [vmem:[%s13317_s22 + $0xe80] ss:$84 sps:$4 sm:$0xff]   ;;  %v11934_v10 = vld [vmem:[%s13317_s22 + $0xe88] ss:$84 sps:$4 sm:$0xff]  }
 0x2e2   : > { %5245 = vmatpush1.bf16.msra.mxu0 %v11847_v11  ;;  %v11939_v11 = vld [vmem:[%s13317_s22 + $0xf2c] ss:$84 sps:$4 sm:$0xff]  }
 0x2e3   : > { %5327 = vmatpush1.bf16.msra.mxu1 %v11850_v12  ;;  %5246 = vmatprep.subr.bf16.mxu0 %v11855_v13  ;;  %v11942_v12 = vld [vmem:[%s13317_s22 + $0xf34] ss:$84 sps:$4 sm:$0xff]  }
 0x2e4   : > { %5328 = vmatprep.subr.bf16.mxu1 %v11858_v15  ;;  %v11937_v13 = vld [vmem:[%s13317_s22 + $0xf28] ss:$84 sps:$4 sm:$0xff]   ;;  %v11940_v15 = vld [vmem:[%s13317_s22 + $0xf30] ss:$84 sps:$4 sm:$0xff]  }
 0x2e6   : > { %5247 = vmatpush1.bf16.msra.mxu0 %v11853_v16  ;;  %v11945_v16 = vld [vmem:[%s13317_s22 + $0xfd4] ss:$84 sps:$4 sm:$0xff]  }
 0x2e7   : > { %5329 = vmatpush1.bf16.msra.mxu1 %v11856_v17  ;;  %5248 = vmatprep.subr.bf16.mxu0 %v11861_v18  ;;  %v11948_v17 = vld [vmem:[%s13317_s22 + $0xfdc] ss:$84 sps:$4 sm:$0xff]  }
 0x2e8   : > { %5330 = vmatprep.subr.bf16.mxu1 %v11864_v20  ;;  %v11943_v18 = vld [vmem:[%s13317_s22 + $0xfd0] ss:$84 sps:$4 sm:$0xff]   ;;  %v11946_v20 = vld [vmem:[%s13317_s22 + $0xfd8] ss:$84 sps:$4 sm:$0xff]  }
 0x2ea   : > { %5249 = vmatpush1.bf16.msra.mxu0 %v11859_v21  ;;  %v11951_v21 = vld [vmem:[%s13317_s22 + $0x107c] ss:$84 sps:$4 sm:$0xff]  }
 0x2eb   : > { %5331 = vmatpush1.bf16.msra.mxu1 %v11862_v22  ;;  %5250 = vmatprep.subr.bf16.mxu0 %v11867_v23  ;;  %v11954_v22 = vld [vmem:[%s13317_s22 + $0x1084] ss:$84 sps:$4 sm:$0xff]  }
 0x2ec   : > { %5332 = vmatprep.subr.bf16.mxu1 %v11870_v24  ;;  %v11949_v23 = vld [vmem:[%s13317_s22 + $0x1078] ss:$84 sps:$4 sm:$0xff]   ;;  %v11952_v24 = vld [vmem:[%s13317_s22 + $0x1080] ss:$84 sps:$4 sm:$0xff]  }
 0x2ee   : > { %5251 = vmatpush1.bf16.msra.mxu0 %v11865_v25  ;;  %v11957_v25 = vld [vmem:[%s13317_s22 + $0x1124] ss:$84 sps:$4 sm:$0xff]  }
 0x2ef   : > { %5333 = vmatpush1.bf16.msra.mxu1 %v11868_v26  ;;  %5252 = vmatprep.subr.bf16.mxu0 %v11873_v27  ;;  %v11960_v26 = vld [vmem:[%s13317_s22 + $0x112c] ss:$84 sps:$4 sm:$0xff]  }
 0x2f0   : > { %5334 = vmatprep.subr.bf16.mxu1 %v11876_v28  ;;  %v11955_v27 = vld [vmem:[%s13317_s22 + $0x1120] ss:$84 sps:$4 sm:$0xff]   ;;  %v11958_v28 = vld [vmem:[%s13317_s22 + $0x1128] ss:$84 sps:$4 sm:$0xff]  }
 0x2f2   : > { %5253 = vmatpush1.bf16.msra.mxu0 %v11871_v29  ;;  %v11963_v29 = vld [vmem:[%s13317_s22 + $0x11cc] ss:$84 sps:$4 sm:$0xff]  }
 0x2f3   : > { %5335 = vmatpush1.bf16.msra.mxu1 %v11874_v30  ;;  %5254 = vmatprep.subr.bf16.mxu0 %v11879_v32  ;;  %v11966_v30 = vld [vmem:[%s13317_s22 + $0x11d4] ss:$84 sps:$4 sm:$0xff]  }
 0x2f4   : > { %5336 = vmatprep.subr.bf16.mxu1 %v11882_v33  ;;  %v11961_v32 = vld [vmem:[%s13317_s22 + $0x11c8] ss:$84 sps:$4 sm:$0xff]   ;;  %v11964_v33 = vld [vmem:[%s13317_s22 + $0x11d0] ss:$84 sps:$4 sm:$0xff]  }
 0x2f6   : > { %5255 = vmatpush1.bf16.msra.mxu0 %v11877_v35  ;;  %v11969_v35 = vld [vmem:[%s13317_s22 + $0x1274] ss:$84 sps:$4 sm:$0xff]  }
 0x2f7   : > { %5337 = vmatpush1.bf16.msra.mxu1 %v11880_v36  ;;  %5256 = vmatprep.subr.bf16.mxu0 %v11885_v38  ;;  %v11972_v36 = vld [vmem:[%s13317_s22 + $0x127c] ss:$84 sps:$4 sm:$0xff]  }
 0x2f8   : > { %5338 = vmatprep.subr.bf16.mxu1 %v11888_v39  ;;  %v11967_v38 = vld [vmem:[%s13317_s22 + $0x1270] ss:$84 sps:$4 sm:$0xff]   ;;  %v11970_v39 = vld [vmem:[%s13317_s22 + $0x1278] ss:$84 sps:$4 sm:$0xff]  }
 0x2fa   : > { %5257 = vmatpush1.bf16.msra.mxu0 %v11883_v41  ;;  %v11975_v41 = vld [vmem:[%s13317_s22 + $0x131c] ss:$84 sps:$4 sm:$0xff]  }
 0x2fb   : > { %5339 = vmatpush1.bf16.msra.mxu1 %v11886_v42  ;;  %5258 = vmatprep.subr.bf16.mxu0 %v11891_v43  ;;  %v11978_v42 = vld [vmem:[%s13317_s22 + $0x1324] ss:$84 sps:$4 sm:$0xff]  }
 0x2fc   : > { %5340 = vmatprep.subr.bf16.mxu1 %v11894_v45  ;;  %v11973_v43 = vld [vmem:[%s13317_s22 + $0x1318] ss:$84 sps:$4 sm:$0xff]   ;;  %v11976_v45 = vld [vmem:[%s13317_s22 + $0x1320] ss:$84 sps:$4 sm:$0xff]  }
 0x2fe   : > { %5259 = vmatpush1.bf16.msra.mxu0 %v11889_v46  ;;  %v11981_v46 = vld [vmem:[%s13317_s22 + $0x13c4] ss:$84 sps:$4 sm:$0xff]  }
 0x2ff   : > { %5341 = vmatpush1.bf16.msra.mxu1 %v11892_v47  ;;  %5269 = vmatprep.subr.bf16.mxu0 %v11897_v48  ;;  %v11984_v47 = vld [vmem:[%s13317_s22 + $0x13cc] ss:$84 sps:$4 sm:$0xff]  }
 0x300   : > { %5351 = vmatprep.subr.bf16.mxu1 %v11900_v31  ;;  %v11979_v48 = vld [vmem:[%s13317_s22 + $0x13c0] ss:$84 sps:$4 sm:$0xff]   ;;  %v11982_v31 = vld [vmem:[%s13317_s22 + $0x13c8] ss:$84 sps:$4 sm:$0xff]  }
 0x301   : > { %5261 = vmatmul.mubr.bf16.vlgmr.msra.gmra.mrb[8].mxu0 %v13438_v37 }
 0x302   : > { %5343 = vmatmul.mubr.bf16.vlgmr.msra.gmra.mrb[8].mxu1 %v13438_v37  ;;  %5270 = vmatpush1.bf16.msra.mxu0 %v11895_v49  ;;  %v11987_v49 = vld [vmem:[%s13317_s22 + $0x146c] ss:$84 sps:$4 sm:$0xff]  }
 0x303   : > { %5301 = vmatprep.mubr.bf16.mxu0 %v13444_v40  ;;  %5352 = vmatpush1.bf16.msra.mxu1 %v11898_v50  ;;  %v11990_v50 = vld [vmem:[%s13317_s22 + $0x1474] ss:$84 sps:$4 sm:$0xff]  }
 0x304   : > { %5383 = vmatprep.mubr.bf16.mxu1 %v13444_v40  ;;  %5271 = vmatprep.subr.bf16.mxu0 %v11903_v51  ;;  %v11985_v51 = vld [vmem:[%s13317_s22 + $0x1468] ss:$84 sps:$4 sm:$0xff]  }
 0x305   : > { %5353 = vmatprep.subr.bf16.mxu1 %v11906_v52  ;;  %v11988_v52 = vld [vmem:[%s13317_s22 + $0x1470] ss:$84 sps:$4 sm:$0xff]  }
 0x306   : > { %5272 = vmatpush1.bf16.msra.mxu0 %v11901_v53  ;;  %v11993_v53 = vld [vmem:[%s13317_s22 + $0x24] ss:$84 sps:$4 sm:$0xff]  }
 0x307   : > { %5354 = vmatpush1.bf16.msra.mxu1 %v11904_v54  ;;  %5273 = vmatprep.subr.bf16.mxu0 %v11909_v55  ;;  %v11996_v54 = vld [vmem:[%s13317_s22 + $0x2c] ss:$84 sps:$4 sm:$0xff]  }
 0x308   : > { %5355 = vmatprep.subr.bf16.mxu1 %v11912_v56  ;;  %v11991_v55 = vld [vmem:[%s13317_s22 + $0x20] ss:$84 sps:$4 sm:$0xff]   ;;  %v11994_v56 = vld [vmem:[%s13317_s22 + $0x28] ss:$84 sps:$4 sm:$0xff]  }
 0x30a   : > { %5274 = vmatpush1.bf16.msra.mxu0 %v11907_v57  ;;  %v11999_v57 = vld [vmem:[%s13317_s22 + $0xcc] ss:$84 sps:$4 sm:$0xff]  }
 0x30b   : > { %5356 = vmatpush1.bf16.msra.mxu1 %v11910_v58  ;;  %5275 = vmatprep.subr.bf16.mxu0 %v11915_v59  ;;  %v12002_v58 = vld [vmem:[%s13317_s22 + $0xd4] ss:$84 sps:$4 sm:$0xff]  }
 0x30c   : > { %5357 = vmatprep.subr.bf16.mxu1 %v11918_v60  ;;  %v11997_v59 = vld [vmem:[%s13317_s22 + $0xc8] ss:$84 sps:$4 sm:$0xff]   ;;  %v12000_v60 = vld [vmem:[%s13317_s22 + $0xd0] ss:$84 sps:$4 sm:$0xff]  }
 0x30e   : > { %5276 = vmatpush1.bf16.msra.mxu0 %v11913_v61  ;;  %v12005_v61 = vld [vmem:[%s13317_s22 + $0x174] ss:$84 sps:$4 sm:$0xff]  }
 0x30f   : > { %5358 = vmatpush1.bf16.msra.mxu1 %v11916_v62  ;;  %5277 = vmatprep.subr.bf16.mxu0 %v11921_v63  ;;  %v12008_v62 = vld [vmem:[%s13317_s22 + $0x17c] ss:$84 sps:$4 sm:$0xff]  }
 0x310   : > { %5359 = vmatprep.subr.bf16.mxu1 %v11924_v0  ;;  %v12003_v63 = vld [vmem:[%s13317_s22 + $0x170] ss:$84 sps:$4 sm:$0xff]   ;;  %v12006_v0 = vld [vmem:[%s13317_s22 + $0x178] ss:$84 sps:$4 sm:$0xff]  }
 0x312   : > { %5278 = vmatpush1.bf16.msra.mxu0 %v11919_v1  ;;  %v12011_v1 = vld [vmem:[%s13317_s22 + $0x21c] ss:$84 sps:$4 sm:$0xff]  }
 0x313   : > { %5360 = vmatpush1.bf16.msra.mxu1 %v11922_v2  ;;  %5279 = vmatprep.subr.bf16.mxu0 %v11927_v3  ;;  %v12014_v2 = vld [vmem:[%s13317_s22 + $0x224] ss:$84 sps:$4 sm:$0xff]  }
 0x314   : > { %5361 = vmatprep.subr.bf16.mxu1 %v11930_v4  ;;  %v12009_v3 = vld [vmem:[%s13317_s22 + $0x218] ss:$84 sps:$4 sm:$0xff]   ;;  %v12012_v4 = vld [vmem:[%s13317_s22 + $0x220] ss:$84 sps:$4 sm:$0xff]  }
 0x316   : > { %5280 = vmatpush1.bf16.msra.mxu0 %v11925_v5  ;;  %v12017_v5 = vld [vmem:[%s13317_s22 + $0x2c4] ss:$84 sps:$4 sm:$0xff]  }
 0x317   : > { %5362 = vmatpush1.bf16.msra.mxu1 %v11928_v6  ;;  %5281 = vmatprep.subr.bf16.mxu0 %v11933_v7  ;;  %v12020_v6 = vld [vmem:[%s13317_s22 + $0x2cc] ss:$84 sps:$4 sm:$0xff]  }
 0x318   : > { %5363 = vmatprep.subr.bf16.mxu1 %v11936_v8  ;;  %v12015_v7 = vld [vmem:[%s13317_s22 + $0x2c0] ss:$84 sps:$4 sm:$0xff]   ;;  %v12018_v8 = vld [vmem:[%s13317_s22 + $0x2c8] ss:$84 sps:$4 sm:$0xff]  }
 0x31a   : > { %5282 = vmatpush1.bf16.msra.mxu0 %v11931_v9  ;;  %v12023_v9 = vld [vmem:[%s13317_s22 + $0x36c] ss:$84 sps:$4 sm:$0xff]  }
 0x31b   : > { %5364 = vmatpush1.bf16.msra.mxu1 %v11934_v10  ;;  %5283 = vmatprep.subr.bf16.mxu0 %v11939_v11  ;;  %v12026_v10 = vld [vmem:[%s13317_s22 + $0x374] ss:$84 sps:$4 sm:$0xff]  }
 0x31c   : > { %5365 = vmatprep.subr.bf16.mxu1 %v11942_v12  ;;  %v12021_v11 = vld [vmem:[%s13317_s22 + $0x368] ss:$84 sps:$4 sm:$0xff]   ;;  %v12024_v12 = vld [vmem:[%s13317_s22 + $0x370] ss:$84 sps:$4 sm:$0xff]  }
 0x31e   : > { %5284 = vmatpush1.bf16.msra.mxu0 %v11937_v13  ;;  %v12029_v13 = vld [vmem:[%s13317_s22 + $0x414] ss:$84 sps:$4 sm:$0xff]  }
 0x31f   : > { %5366 = vmatpush1.bf16.msra.mxu1 %v11940_v15  ;;  %5285 = vmatprep.subr.bf16.mxu0 %v11945_v16  ;;  %v12032_v15 = vld [vmem:[%s13317_s22 + $0x41c] ss:$84 sps:$4 sm:$0xff]  }
 0x320   : > { %5367 = vmatprep.subr.bf16.mxu1 %v11948_v17  ;;  %v12027_v16 = vld [vmem:[%s13317_s22 + $0x410] ss:$84 sps:$4 sm:$0xff]   ;;  %v12030_v17 = vld [vmem:[%s13317_s22 + $0x418] ss:$84 sps:$4 sm:$0xff]  }
 0x322   : > { %5286 = vmatpush1.bf16.msra.mxu0 %v11943_v18  ;;  %v12035_v18 = vld [vmem:[%s13317_s22 + $0x4bc] ss:$84 sps:$4 sm:$0xff]  }
 0x323   : > { %5368 = vmatpush1.bf16.msra.mxu1 %v11946_v20  ;;  %5287 = vmatprep.subr.bf16.mxu0 %v11951_v21  ;;  %v12038_v20 = vld [vmem:[%s13317_s22 + $0x4c4] ss:$84 sps:$4 sm:$0xff]  }
 0x324   : > { %5369 = vmatprep.subr.bf16.mxu1 %v11954_v22  ;;  %v12033_v21 = vld [vmem:[%s13317_s22 + $0x4b8] ss:$84 sps:$4 sm:$0xff]   ;;  %v12036_v22 = vld [vmem:[%s13317_s22 + $0x4c0] ss:$84 sps:$4 sm:$0xff]  }
 0x326   : > { %5288 = vmatpush1.bf16.msra.mxu0 %v11949_v23  ;;  %v12041_v23 = vld [vmem:[%s13317_s22 + $0x564] ss:$84 sps:$4 sm:$0xff]  }
 0x327   : > { %5370 = vmatpush1.bf16.msra.mxu1 %v11952_v24  ;;  %5289 = vmatprep.subr.bf16.mxu0 %v11957_v25  ;;  %v12044_v24 = vld [vmem:[%s13317_s22 + $0x56c] ss:$84 sps:$4 sm:$0xff]  }
 0x328   : > { %5371 = vmatprep.subr.bf16.mxu1 %v11960_v26  ;;  %v12039_v25 = vld [vmem:[%s13317_s22 + $0x560] ss:$84 sps:$4 sm:$0xff]   ;;  %v12042_v26 = vld [vmem:[%s13317_s22 + $0x568] ss:$84 sps:$4 sm:$0xff]  }
 0x32a   : > { %5290 = vmatpush1.bf16.msra.mxu0 %v11955_v27  ;;  %v12047_v27 = vld [vmem:[%s13317_s22 + $0x60c] ss:$84 sps:$4 sm:$0xff]  }
 0x32b   : > { %5372 = vmatpush1.bf16.msra.mxu1 %v11958_v28  ;;  %5291 = vmatprep.subr.bf16.mxu0 %v11963_v29  ;;  %v12050_v28 = vld [vmem:[%s13317_s22 + $0x614] ss:$84 sps:$4 sm:$0xff]  }
 0x32c   : > { %5373 = vmatprep.subr.bf16.mxu1 %v11966_v30  ;;  %v12045_v29 = vld [vmem:[%s13317_s22 + $0x608] ss:$84 sps:$4 sm:$0xff]   ;;  %v12048_v30 = vld [vmem:[%s13317_s22 + $0x610] ss:$84 sps:$4 sm:$0xff]  }
 0x32e   : > { %5292 = vmatpush1.bf16.msra.mxu0 %v11961_v32  ;;  %v12053_v32 = vld [vmem:[%s13317_s22 + $0x6b4] ss:$84 sps:$4 sm:$0xff]  }
 0x32f   : > { %5374 = vmatpush1.bf16.msra.mxu1 %v11964_v33  ;;  %5293 = vmatprep.subr.bf16.mxu0 %v11969_v35  ;;  %v12056_v33 = vld [vmem:[%s13317_s22 + $0x6bc] ss:$84 sps:$4 sm:$0xff]  }
 0x330   : > { %5375 = vmatprep.subr.bf16.mxu1 %v11972_v36  ;;  %v12051_v35 = vld [vmem:[%s13317_s22 + $0x6b0] ss:$84 sps:$4 sm:$0xff]   ;;  %v12054_v36 = vld [vmem:[%s13317_s22 + $0x6b8] ss:$84 sps:$4 sm:$0xff]  }
 0x332   : > { %5294 = vmatpush1.bf16.msra.mxu0 %v11967_v38  ;;  %v12059_v38 = vld [vmem:[%s13317_s22 + $0x75c] ss:$84 sps:$4 sm:$0xff]  }
 0x333   : > { %5376 = vmatpush1.bf16.msra.mxu1 %v11970_v39  ;;  %5295 = vmatprep.subr.bf16.mxu0 %v11975_v41  ;;  %v12062_v39 = vld [vmem:[%s13317_s22 + $0x764] ss:$84 sps:$4 sm:$0xff]  }
 0x334   : > { %5377 = vmatprep.subr.bf16.mxu1 %v11978_v42  ;;  %v12057_v41 = vld [vmem:[%s13317_s22 + $0x758] ss:$84 sps:$4 sm:$0xff]   ;;  %v12060_v42 = vld [vmem:[%s13317_s22 + $0x760] ss:$84 sps:$4 sm:$0xff]  }
 0x336   : > { %5296 = vmatpush1.bf16.msra.mxu0 %v11973_v43  ;;  %v12065_v43 = vld [vmem:[%s13317_s22 + $0x804] ss:$84 sps:$4 sm:$0xff]  }
 0x337   : > { %5378 = vmatpush1.bf16.msra.mxu1 %v11976_v45  ;;  %5297 = vmatprep.subr.bf16.mxu0 %v11981_v46  ;;  %v12068_v45 = vld [vmem:[%s13317_s22 + $0x80c] ss:$84 sps:$4 sm:$0xff]  }
 0x338   : > { %5379 = vmatprep.subr.bf16.mxu1 %v11984_v47  ;;  %v12063_v46 = vld [vmem:[%s13317_s22 + $0x800] ss:$84 sps:$4 sm:$0xff]   ;;  %v12066_v47 = vld [vmem:[%s13317_s22 + $0x808] ss:$84 sps:$4 sm:$0xff]  }
 0x33a   : > { %5298 = vmatpush1.bf16.msra.mxu0 %v11979_v48  ;;  %v12071_v48 = vld [vmem:[%s13317_s22 + $0x8ac] ss:$84 sps:$4 sm:$0xff]  }
 0x33b   : > { %5380 = vmatpush1.bf16.msra.mxu1 %v11982_v31  ;;  %5299 = vmatprep.subr.bf16.mxu0 %v11987_v49  ;;  %v12074_v31 = vld [vmem:[%s13317_s22 + $0x8b4] ss:$84 sps:$4 sm:$0xff]  }
 0x33c   : > { %5381 = vmatprep.subr.bf16.mxu1 %v11990_v50  ;;  %v12069_v49 = vld [vmem:[%s13317_s22 + $0x8a8] ss:$84 sps:$4 sm:$0xff]   ;;  %v12072_v50 = vld [vmem:[%s13317_s22 + $0x8b0] ss:$84 sps:$4 sm:$0xff]  }
 0x33e   : > { %5300 = vmatpush1.bf16.msra.mxu0 %v11985_v51  ;;  %v12077_v51 = vld [vmem:[%s13317_s22 + $0x954] ss:$84 sps:$4 sm:$0xff]  }
 0x33f   : > { %5382 = vmatpush1.bf16.msra.mxu1 %v11988_v52  ;;  %5392 = vmatprep.subr.bf16.mxu0 %v11993_v53  ;;  %v12080_v52 = vld [vmem:[%s13317_s22 + $0x95c] ss:$84 sps:$4 sm:$0xff]  }
 0x340   : > { %5474 = vmatprep.subr.bf16.mxu1 %v11996_v54  ;;  %v12075_v53 = vld [vmem:[%s13317_s22 + $0x950] ss:$84 sps:$4 sm:$0xff]   ;;  %v12078_v54 = vld [vmem:[%s13317_s22 + $0x958] ss:$84 sps:$4 sm:$0xff]  }
 0x341   : > { %5302 = vmatmul.mubr.bf16.vlgmr.msra.gmra.mrb[8].mxu0 %v13513_v44 }
 0x342   : > { %5384 = vmatmul.mubr.bf16.vlgmr.msra.gmra.mrb[8].mxu1 %v13513_v44  ;;  %5393 = vmatpush1.bf16.msra.mxu0 %v11991_v55  ;;  %v12083_v55 = vld [vmem:[%s13317_s22 + $0x9fc] ss:$84 sps:$4 sm:$0xff]  }
 0x343   : > { %5424 = vmatprep.mubr.bf16.mxu0 %v13434_v34  ;;  %5475 = vmatpush1.bf16.msra.mxu1 %v11994_v56  ;;  %v12086_v56 = vld [vmem:[%s13317_s22 + $0xa04] ss:$84 sps:$4 sm:$0xff]  }
 0x344   : > { %5506 = vmatprep.mubr.bf16.mxu1 %v13434_v34  ;;  %5394 = vmatprep.subr.bf16.mxu0 %v11999_v57  ;;  %v12081_v57 = vld [vmem:[%s13317_s22 + $0x9f8] ss:$84 sps:$4 sm:$0xff]  }
 0x345   : > { %5476 = vmatprep.subr.bf16.mxu1 %v12002_v58  ;;  %v12084_v58 = vld [vmem:[%s13317_s22 + $0xa00] ss:$84 sps:$4 sm:$0xff]  }
 0x346   : > { %5395 = vmatpush1.bf16.msra.mxu0 %v11997_v59  ;;  %v12089_v59 = vld [vmem:[%s13317_s22 + $0xaa4] ss:$84 sps:$4 sm:$0xff]  }
 0x347   : > { %5477 = vmatpush1.bf16.msra.mxu1 %v12000_v60  ;;  %5396 = vmatprep.subr.bf16.mxu0 %v12005_v61  ;;  %v12092_v60 = vld [vmem:[%s13317_s22 + $0xaac] ss:$84 sps:$4 sm:$0xff]  }
 0x348   : > { %5478 = vmatprep.subr.bf16.mxu1 %v12008_v62  ;;  %v12087_v61 = vld [vmem:[%s13317_s22 + $0xaa0] ss:$84 sps:$4 sm:$0xff]   ;;  %v12090_v62 = vld [vmem:[%s13317_s22 + $0xaa8] ss:$84 sps:$4 sm:$0xff]  }
 0x34a   : > { %5397 = vmatpush1.bf16.msra.mxu0 %v12003_v63  ;;  %v12095_v63 = vld [vmem:[%s13317_s22 + $0xb4c] ss:$84 sps:$4 sm:$0xff]  }
 0x34b   : > { %5479 = vmatpush1.bf16.msra.mxu1 %v12006_v0  ;;  %5398 = vmatprep.subr.bf16.mxu0 %v12011_v1  ;;  %v12098_v0 = vld [vmem:[%s13317_s22 + $0xb54] ss:$84 sps:$4 sm:$0xff]  }
 0x34c   : > { %5480 = vmatprep.subr.bf16.mxu1 %v12014_v2  ;;  %v12093_v1 = vld [vmem:[%s13317_s22 + $0xb48] ss:$84 sps:$4 sm:$0xff]   ;;  %v12096_v2 = vld [vmem:[%s13317_s22 + $0xb50] ss:$84 sps:$4 sm:$0xff]  }
 0x34e   : > { %5399 = vmatpush1.bf16.msra.mxu0 %v12009_v3  ;;  %v12101_v3 = vld [vmem:[%s13317_s22 + $0xbf4] ss:$84 sps:$4 sm:$0xff]  }
 0x34f   : > { %5481 = vmatpush1.bf16.msra.mxu1 %v12012_v4  ;;  %5400 = vmatprep.subr.bf16.mxu0 %v12017_v5  ;;  %v12104_v4 = vld [vmem:[%s13317_s22 + $0xbfc] ss:$84 sps:$4 sm:$0xff]  }
 0x350   : > { %5482 = vmatprep.subr.bf16.mxu1 %v12020_v6  ;;  %v12099_v5 = vld [vmem:[%s13317_s22 + $0xbf0] ss:$84 sps:$4 sm:$0xff]   ;;  %v12102_v6 = vld [vmem:[%s13317_s22 + $0xbf8] ss:$84 sps:$4 sm:$0xff]  }
 0x352   : > { %5401 = vmatpush1.bf16.msra.mxu0 %v12015_v7  ;;  %v12107_v7 = vld [vmem:[%s13317_s22 + $0xc9c] ss:$84 sps:$4 sm:$0xff]  }
 0x353   : > { %5483 = vmatpush1.bf16.msra.mxu1 %v12018_v8  ;;  %5402 = vmatprep.subr.bf16.mxu0 %v12023_v9  ;;  %v12110_v8 = vld [vmem:[%s13317_s22 + $0xca4] ss:$84 sps:$4 sm:$0xff]  }
 0x354   : > { %5484 = vmatprep.subr.bf16.mxu1 %v12026_v10  ;;  %v12105_v9 = vld [vmem:[%s13317_s22 + $0xc98] ss:$84 sps:$4 sm:$0xff]   ;;  %v12108_v10 = vld [vmem:[%s13317_s22 + $0xca0] ss:$84 sps:$4 sm:$0xff]  }
 0x356   : > { %5403 = vmatpush1.bf16.msra.mxu0 %v12021_v11  ;;  %v12113_v11 = vld [vmem:[%s13317_s22 + $0xd44] ss:$84 sps:$4 sm:$0xff]  }
 0x357   : > { %5485 = vmatpush1.bf16.msra.mxu1 %v12024_v12  ;;  %5404 = vmatprep.subr.bf16.mxu0 %v12029_v13  ;;  %v12116_v12 = vld [vmem:[%s13317_s22 + $0xd4c] ss:$84 sps:$4 sm:$0xff]  }
 0x358   : > { %5486 = vmatprep.subr.bf16.mxu1 %v12032_v15  ;;  %v12111_v13 = vld [vmem:[%s13317_s22 + $0xd40] ss:$84 sps:$4 sm:$0xff]   ;;  %v12114_v15 = vld [vmem:[%s13317_s22 + $0xd48] ss:$84 sps:$4 sm:$0xff]  }
 0x35a   : > { %5405 = vmatpush1.bf16.msra.mxu0 %v12027_v16  ;;  %v12119_v16 = vld [vmem:[%s13317_s22 + $0xdec] ss:$84 sps:$4 sm:$0xff]  }
 0x35b   : > { %5487 = vmatpush1.bf16.msra.mxu1 %v12030_v17  ;;  %5406 = vmatprep.subr.bf16.mxu0 %v12035_v18  ;;  %v12122_v17 = vld [vmem:[%s13317_s22 + $0xdf4] ss:$84 sps:$4 sm:$0xff]  }
 0x35c   : > { %5488 = vmatprep.subr.bf16.mxu1 %v12038_v20  ;;  %v12117_v18 = vld [vmem:[%s13317_s22 + $0xde8] ss:$84 sps:$4 sm:$0xff]   ;;  %v12120_v20 = vld [vmem:[%s13317_s22 + $0xdf0] ss:$84 sps:$4 sm:$0xff]  }
 0x35e   : > { %5407 = vmatpush1.bf16.msra.mxu0 %v12033_v21  ;;  %v12125_v21 = vld [vmem:[%s13317_s22 + $0xe94] ss:$84 sps:$4 sm:$0xff]  }
 0x35f   : > { %5489 = vmatpush1.bf16.msra.mxu1 %v12036_v22  ;;  %5408 = vmatprep.subr.bf16.mxu0 %v12041_v23 }
 0x360   : > { %5490 = vmatprep.subr.bf16.mxu1 %v12044_v24  ;;  %v12128_v24 = vld [vmem:[%s13317_s22 + $0xe9c] ss:$84 sps:$4 sm:$0xff]  }
 0x362   : > { %5409 = vmatpush1.bf16.msra.mxu0 %v12039_v25 }
 0x363   : > { %5491 = vmatpush1.bf16.msra.mxu1 %v12042_v26  ;;  %5410 = vmatprep.subr.bf16.mxu0 %v12047_v27 }
 0x364   : > { %5492 = vmatprep.subr.bf16.mxu1 %v12050_v28 }
 0x366   : > { %5411 = vmatpush1.bf16.msra.mxu0 %v12045_v29  ;;  %v12123_v29 = vld [vmem:[%s13317_s22 + $0xe90] ss:$84 sps:$4 sm:$0xff]  }
 0x367   : > { %5493 = vmatpush1.bf16.msra.mxu1 %v12048_v30  ;;  %5412 = vmatprep.subr.bf16.mxu0 %v12053_v32 }
 0x368   : > { %5494 = vmatprep.subr.bf16.mxu1 %v12056_v33  ;;  %v12126_v33 = vld [vmem:[%s13317_s22 + $0xe98] ss:$84 sps:$4 sm:$0xff]  }
 0x36a   : > { %5413 = vmatpush1.bf16.msra.mxu0 %v12051_v35  ;;  %v12131_v35 = vld [vmem:[%s13317_s22 + $0xf3c] ss:$84 sps:$4 sm:$0xff]  }
 0x36b   : > { %5495 = vmatpush1.bf16.msra.mxu1 %v12054_v36  ;;  %5414 = vmatprep.subr.bf16.mxu0 %v12059_v38  ;;  %v12134_v36 = vld [vmem:[%s13317_s22 + $0xf44] ss:$84 sps:$4 sm:$0xff]  }
 0x36c   : > { %5496 = vmatprep.subr.bf16.mxu1 %v12062_v39  ;;  %v12129_v38 = vld [vmem:[%s13317_s22 + $0xf38] ss:$84 sps:$4 sm:$0xff]   ;;  %v12132_v39 = vld [vmem:[%s13317_s22 + $0xf40] ss:$84 sps:$4 sm:$0xff]  }
 0x36e   : > { %5415 = vmatpush1.bf16.msra.mxu0 %v12057_v41  ;;  %v12137_v41 = vld [vmem:[%s13317_s22 + $0xfe4] ss:$84 sps:$4 sm:$0xff]  }
 0x36f   : > { %5497 = vmatpush1.bf16.msra.mxu1 %v12060_v42  ;;  %5416 = vmatprep.subr.bf16.mxu0 %v12065_v43  ;;  %v12140_v42 = vld [vmem:[%s13317_s22 + $0xfec] ss:$84 sps:$4 sm:$0xff]  }
 0x370   : > { %5498 = vmatprep.subr.bf16.mxu1 %v12068_v45  ;;  %v12135_v43 = vld [vmem:[%s13317_s22 + $0xfe0] ss:$84 sps:$4 sm:$0xff]   ;;  %v12138_v45 = vld [vmem:[%s13317_s22 + $0xfe8] ss:$84 sps:$4 sm:$0xff]  }
 0x372   : > { %5417 = vmatpush1.bf16.msra.mxu0 %v12063_v46  ;;  %v12143_v46 = vld [vmem:[%s13317_s22 + $0x108c] ss:$84 sps:$4 sm:$0xff]  }
 0x373   : > { %5499 = vmatpush1.bf16.msra.mxu1 %v12066_v47  ;;  %5418 = vmatprep.subr.bf16.mxu0 %v12071_v48  ;;  %v12146_v47 = vld [vmem:[%s13317_s22 + $0x1094] ss:$84 sps:$4 sm:$0xff]  }
 0x374   : > { %5500 = vmatprep.subr.bf16.mxu1 %v12074_v31  ;;  %v12141_v48 = vld [vmem:[%s13317_s22 + $0x1088] ss:$84 sps:$4 sm:$0xff]   ;;  %v12144_v31 = vld [vmem:[%s13317_s22 + $0x1090] ss:$84 sps:$4 sm:$0xff]  }
 0x376   : > { %5419 = vmatpush1.bf16.msra.mxu0 %v12069_v49  ;;  %v12149_v49 = vld [vmem:[%s13317_s22 + $0x1134] ss:$84 sps:$4 sm:$0xff]  }
 0x377   : > { %5501 = vmatpush1.bf16.msra.mxu1 %v12072_v50  ;;  %5420 = vmatprep.subr.bf16.mxu0 %v12077_v51  ;;  %v12152_v50 = vld [vmem:[%s13317_s22 + $0x113c] ss:$84 sps:$4 sm:$0xff]  }
 0x378   : > { %5502 = vmatprep.subr.bf16.mxu1 %v12080_v52  ;;  %v12147_v51 = vld [vmem:[%s13317_s22 + $0x1130] ss:$84 sps:$4 sm:$0xff]   ;;  %v12150_v52 = vld [vmem:[%s13317_s22 + $0x1138] ss:$84 sps:$4 sm:$0xff]  }
 0x37a   : > { %5421 = vmatpush1.bf16.msra.mxu0 %v12075_v53  ;;  %v12155_v53 = vld [vmem:[%s13317_s22 + $0x11dc] ss:$84 sps:$4 sm:$0xff]  }
 0x37b   : > { %5503 = vmatpush1.bf16.msra.mxu1 %v12078_v54  ;;  %5422 = vmatprep.subr.bf16.mxu0 %v12083_v55  ;;  %v12158_v54 = vld [vmem:[%s13317_s22 + $0x11e4] ss:$84 sps:$4 sm:$0xff]  }
 0x37c   : > { %5504 = vmatprep.subr.bf16.mxu1 %v12086_v56  ;;  %v12153_v55 = vld [vmem:[%s13317_s22 + $0x11d8] ss:$84 sps:$4 sm:$0xff]   ;;  %v12156_v56 = vld [vmem:[%s13317_s22 + $0x11e0] ss:$84 sps:$4 sm:$0xff]  }
 0x37e   : > { %5423 = vmatpush1.bf16.msra.mxu0 %v12081_v57  ;;  %v12161_v57 = vld [vmem:[%s13317_s22 + $0x1284] ss:$84 sps:$4 sm:$0xff]  }
 0x37f   : > { %5505 = vmatpush1.bf16.msra.mxu1 %v12084_v58  ;;  %5433 = vmatprep.subr.bf16.mxu0 %v12089_v59  ;;  %v12164_v58 = vld [vmem:[%s13317_s22 + $0x128c] ss:$84 sps:$4 sm:$0xff]  }
 0x380   : > { %5515 = vmatprep.subr.bf16.mxu1 %v12092_v60  ;;  %v12159_v59 = vld [vmem:[%s13317_s22 + $0x1280] ss:$84 sps:$4 sm:$0xff]   ;;  %v12162_v60 = vld [vmem:[%s13317_s22 + $0x1288] ss:$84 sps:$4 sm:$0xff]  }
 0x381   : > { %5425 = vmatmul.mubr.bf16.vlgmr.msra.gmra.mrb[12].mxu0 %v13438_v37 }
 0x382   : > { %5507 = vmatmul.mubr.bf16.vlgmr.msra.gmra.mrb[12].mxu1 %v13438_v37  ;;  %5434 = vmatpush1.bf16.msra.mxu0 %v12087_v61  ;;  %v12167_v61 = vld [vmem:[%s13317_s22 + $0x132c] ss:$84 sps:$4 sm:$0xff]  }
 0x383   : > { %5465 = vmatprep.mubr.bf16.mxu0 %v13444_v40  ;;  %5516 = vmatpush1.bf16.msra.mxu1 %v12090_v62  ;;  %v12170_v62 = vld [vmem:[%s13317_s22 + $0x1334] ss:$84 sps:$4 sm:$0xff]  }
 0x384   : > { %5547 = vmatprep.mubr.bf16.mxu1 %v13444_v40  ;;  %5435 = vmatprep.subr.bf16.mxu0 %v12095_v63  ;;  %v12165_v63 = vld [vmem:[%s13317_s22 + $0x1328] ss:$84 sps:$4 sm:$0xff]  }
 0x385   : > { %5517 = vmatprep.subr.bf16.mxu1 %v12098_v0  ;;  %v12168_v0 = vld [vmem:[%s13317_s22 + $0x1330] ss:$84 sps:$4 sm:$0xff]  }
 0x386   : > { %5436 = vmatpush1.bf16.msra.mxu0 %v12093_v1  ;;  %v12173_v1 = vld [vmem:[%s13317_s22 + $0x13d4] ss:$84 sps:$4 sm:$0xff]  }
 0x387   : > { %5518 = vmatpush1.bf16.msra.mxu1 %v12096_v2  ;;  %5437 = vmatprep.subr.bf16.mxu0 %v12101_v3  ;;  %v12176_v2 = vld [vmem:[%s13317_s22 + $0x13dc] ss:$84 sps:$4 sm:$0xff]  }
 0x388   : > { %5519 = vmatprep.subr.bf16.mxu1 %v12104_v4  ;;  %v12171_v3 = vld [vmem:[%s13317_s22 + $0x13d0] ss:$84 sps:$4 sm:$0xff]   ;;  %v12174_v4 = vld [vmem:[%s13317_s22 + $0x13d8] ss:$84 sps:$4 sm:$0xff]  }
 0x38a   : > { %5438 = vmatpush1.bf16.msra.mxu0 %v12099_v5  ;;  %v12179_v5 = vld [vmem:[%s13317_s22 + $0x147c] ss:$84 sps:$4 sm:$0xff]  }
 0x38b   : > { %5520 = vmatpush1.bf16.msra.mxu1 %v12102_v6  ;;  %5439 = vmatprep.subr.bf16.mxu0 %v12107_v7  ;;  %v12182_v6 = vld [vmem:[%s13317_s22 + $0x1484] ss:$84 sps:$4 sm:$0xff]  }
 0x38c   : > { %5521 = vmatprep.subr.bf16.mxu1 %v12110_v8  ;;  %v12177_v7 = vld [vmem:[%s13317_s22 + $0x1478] ss:$84 sps:$4 sm:$0xff]   ;;  %v12180_v8 = vld [vmem:[%s13317_s22 + $0x1480] ss:$84 sps:$4 sm:$0xff]  }
 0x38e   : > { %5440 = vmatpush1.bf16.msra.mxu0 %v12105_v9  ;;  %v12185_v9 = vld [vmem:[%s13317_s22 + $0x34] ss:$84 sps:$4 sm:$0xff]  }
 0x38f   : > { %5522 = vmatpush1.bf16.msra.mxu1 %v12108_v10  ;;  %5441 = vmatprep.subr.bf16.mxu0 %v12113_v11  ;;  %v12188_v10 = vld [vmem:[%s13317_s22 + $0x3c] ss:$84 sps:$4 sm:$0xff]  }
 0x390   : > { %5523 = vmatprep.subr.bf16.mxu1 %v12116_v12  ;;  %v12183_v11 = vld [vmem:[%s13317_s22 + $0x30] ss:$84 sps:$4 sm:$0xff]   ;;  %v12186_v12 = vld [vmem:[%s13317_s22 + $0x38] ss:$84 sps:$4 sm:$0xff]  }
 0x392   : > { %5442 = vmatpush1.bf16.msra.mxu0 %v12111_v13  ;;  %v12191_v13 = vld [vmem:[%s13317_s22 + $0xdc] ss:$84 sps:$4 sm:$0xff]  }
 0x393   : > { %5524 = vmatpush1.bf16.msra.mxu1 %v12114_v15  ;;  %5443 = vmatprep.subr.bf16.mxu0 %v12119_v16  ;;  %v12194_v15 = vld [vmem:[%s13317_s22 + $0xe4] ss:$84 sps:$4 sm:$0xff]  }
 0x394   : > { %v13745_v22 = vpop.f32.mrb[4].mxu0  ;;  %v13747_v23 = vpop.f32.mrb[4].mxu1  ;;  %5525 = vmatprep.subr.bf16.mxu1 %v12122_v17  ;;  %v12189_v16 = vld [vmem:[%s13317_s22 + $0xd8] ss:$84 sps:$4 sm:$0xff]   ;;  %v12192_v17 = vld [vmem:[%s13317_s22 + $0xe0] ss:$84 sps:$4 sm:$0xff]  }
 0x395   : > { %v13750_v25 = vpop.f32.mrb[5].mxu0  ;;  %v13752_v26 = vpop.f32.mrb[5].mxu1 }
 0x396   : > { %v5143_v27 = vpop.f32.mrb[6].mxu0  ;;  %v5225_v28 = vpop.f32.mrb[6].mxu1  ;;  %5444 = vmatpush1.bf16.msra.mxu0 %v12117_v18  ;;  %v12197_v18 = vld [vmem:[%s13317_s22 + $0x184] ss:$84 sps:$4 sm:$0xff]  }
 0x397   : > { %5526 = vmatpush1.bf16.msra.mxu1 %v12120_v20  ;;  %v5144_v30 = vpop.f32.mrb[7].mxu0  ;;  %v5226_v32 = vpop.f32.mrb[7].mxu1  ;;  %5445 = vmatprep.subr.bf16.mxu0 %v12125_v21  ;;  %v12200_v20 = vld [vmem:[%s13317_s22 + $0x18c] ss:$84 sps:$4 sm:$0xff]   ;;  %v12206_v28 = vld [vmem:[%s13317_s22 + $0x234] ss:$84 sps:$4 sm:$0xff]  }
 0x398   : > { %5527 = vmatprep.subr.bf16.mxu1 %v12128_v24  ;;  %v12195_v21 = vld [vmem:[%s13317_s22 + $0x180] ss:$84 sps:$4 sm:$0xff]   ;;  %v12198_v24 = vld [vmem:[%s13317_s22 + $0x188] ss:$84 sps:$4 sm:$0xff]   ;;  %v12204_v30 = vld [vmem:[%s13317_s22 + $0x230] ss:$84 sps:$4 sm:$0xff]  }
 0x399   : > { %v12203_v27 = vld [vmem:[%s13317_s22 + $0x22c] ss:$84 sps:$4 sm:$0xff]   ;;  %v12209_v32 = vld [vmem:[%s13317_s22 + $0x2d4] ss:$84 sps:$4 sm:$0xff]  }
 0x39a   : > { %5446 = vmatpush1.bf16.msra.mxu0 %v12123_v29  ;;  %v12201_v29 = vld [vmem:[%s13317_s22 + $0x228] ss:$84 sps:$4 sm:$0xff]  }
 0x39b   : > { %5528 = vmatpush1.bf16.msra.mxu1 %v12126_v33  ;;  %5447 = vmatprep.subr.bf16.mxu0 %v12131_v35  ;;  %v12212_v33 = vld [vmem:[%s13317_s22 + $0x2dc] ss:$84 sps:$4 sm:$0xff]  }
 0x39c   : > { %5529 = vmatprep.subr.bf16.mxu1 %v12134_v36  ;;  %v12207_v35 = vld [vmem:[%s13317_s22 + $0x2d0] ss:$84 sps:$4 sm:$0xff]   ;;  %v12210_v36 = vld [vmem:[%s13317_s22 + $0x2d8] ss:$84 sps:$4 sm:$0xff]  }
 0x39e   : > { %5448 = vmatpush1.bf16.msra.mxu0 %v12129_v38  ;;  %v12215_v38 = vld [vmem:[%s13317_s22 + $0x37c] ss:$84 sps:$4 sm:$0xff]  }
 0x39f   : > { %5530 = vmatpush1.bf16.msra.mxu1 %v12132_v39  ;;  %5449 = vmatprep.subr.bf16.mxu0 %v12137_v41  ;;  %v12218_v39 = vld [vmem:[%s13317_s22 + $0x384] ss:$84 sps:$4 sm:$0xff]  }
 0x3a0   : > { %5531 = vmatprep.subr.bf16.mxu1 %v12140_v42  ;;  %v12213_v41 = vld [vmem:[%s13317_s22 + $0x378] ss:$84 sps:$4 sm:$0xff]   ;;  %v12216_v42 = vld [vmem:[%s13317_s22 + $0x380] ss:$84 sps:$4 sm:$0xff]  }
 0x3a2   : > { %5450 = vmatpush1.bf16.msra.mxu0 %v12135_v43  ;;  %v12221_v43 = vld [vmem:[%s13317_s22 + $0x424] ss:$84 sps:$4 sm:$0xff]  }
 0x3a3   : > { %5532 = vmatpush1.bf16.msra.mxu1 %v12138_v45  ;;  %5451 = vmatprep.subr.bf16.mxu0 %v12143_v46  ;;  %v12224_v45 = vld [vmem:[%s13317_s22 + $0x42c] ss:$84 sps:$4 sm:$0xff]  }
 0x3a4   : > { %5533 = vmatprep.subr.bf16.mxu1 %v12146_v47  ;;  %v12219_v46 = vld [vmem:[%s13317_s22 + $0x420] ss:$84 sps:$4 sm:$0xff]   ;;  %v12222_v47 = vld [vmem:[%s13317_s22 + $0x428] ss:$84 sps:$4 sm:$0xff]  }
 0x3a6   : > { %5452 = vmatpush1.bf16.msra.mxu0 %v12141_v48  ;;  %v12227_v48 = vld [vmem:[%s13317_s22 + $0x4cc] ss:$84 sps:$4 sm:$0xff]  }
 0x3a7   : > { %5534 = vmatpush1.bf16.msra.mxu1 %v12144_v31  ;;  %5453 = vmatprep.subr.bf16.mxu0 %v12149_v49  ;;  %v12230_v31 = vld [vmem:[%s13317_s22 + $0x4d4] ss:$84 sps:$4 sm:$0xff]  }
 0x3a8   : > { %5535 = vmatprep.subr.bf16.mxu1 %v12152_v50  ;;  %v12225_v49 = vld [vmem:[%s13317_s22 + $0x4c8] ss:$84 sps:$4 sm:$0xff]   ;;  %v12228_v50 = vld [vmem:[%s13317_s22 + $0x4d0] ss:$84 sps:$4 sm:$0xff]  }
 0x3aa   : > { %5454 = vmatpush1.bf16.msra.mxu0 %v12147_v51  ;;  %v12233_v51 = vld [vmem:[%s13317_s22 + $0x574] ss:$84 sps:$4 sm:$0xff]  }
 0x3ab   : > { %5536 = vmatpush1.bf16.msra.mxu1 %v12150_v52  ;;  %5455 = vmatprep.subr.bf16.mxu0 %v12155_v53  ;;  %v12236_v52 = vld [vmem:[%s13317_s22 + $0x57c] ss:$84 sps:$4 sm:$0xff]  }
 0x3ac   : > { %5537 = vmatprep.subr.bf16.mxu1 %v12158_v54  ;;  %v12231_v53 = vld [vmem:[%s13317_s22 + $0x570] ss:$84 sps:$4 sm:$0xff]   ;;  %v12234_v54 = vld [vmem:[%s13317_s22 + $0x578] ss:$84 sps:$4 sm:$0xff]  }
 0x3ae   : > { %5456 = vmatpush1.bf16.msra.mxu0 %v12153_v55  ;;  %v12239_v55 = vld [vmem:[%s13317_s22 + $0x61c] ss:$84 sps:$4 sm:$0xff]  }
 0x3af   : > { %5538 = vmatpush1.bf16.msra.mxu1 %v12156_v56  ;;  %5457 = vmatprep.subr.bf16.mxu0 %v12161_v57  ;;  %v12242_v56 = vld [vmem:[%s13317_s22 + $0x624] ss:$84 sps:$4 sm:$0xff]  }
 0x3b0   : > { %5539 = vmatprep.subr.bf16.mxu1 %v12164_v58  ;;  %v12237_v57 = vld [vmem:[%s13317_s22 + $0x618] ss:$84 sps:$4 sm:$0xff]   ;;  %v12240_v58 = vld [vmem:[%s13317_s22 + $0x620] ss:$84 sps:$4 sm:$0xff]  }
 0x3b2   : > { %5458 = vmatpush1.bf16.msra.mxu0 %v12159_v59  ;;  %v12245_v59 = vld [vmem:[%s13317_s22 + $0x6c4] ss:$84 sps:$4 sm:$0xff]  }
 0x3b3   : > { %5540 = vmatpush1.bf16.msra.mxu1 %v12162_v60  ;;  %5459 = vmatprep.subr.bf16.mxu0 %v12167_v61  ;;  %v12248_v60 = vld [vmem:[%s13317_s22 + $0x6cc] ss:$84 sps:$4 sm:$0xff]  }
 0x3b4   : > { %5541 = vmatprep.subr.bf16.mxu1 %v12170_v62  ;;  %v12243_v61 = vld [vmem:[%s13317_s22 + $0x6c0] ss:$84 sps:$4 sm:$0xff]   ;;  %v12246_v62 = vld [vmem:[%s13317_s22 + $0x6c8] ss:$84 sps:$4 sm:$0xff]  }
 0x3b6   : > { %5460 = vmatpush1.bf16.msra.mxu0 %v12165_v63  ;;  %v12251_v63 = vld [vmem:[%s13317_s22 + $0x76c] ss:$84 sps:$4 sm:$0xff]  }
 0x3b7   : > { %5542 = vmatpush1.bf16.msra.mxu1 %v12168_v0  ;;  %5461 = vmatprep.subr.bf16.mxu0 %v12173_v1  ;;  %v12254_v0 = vld [vmem:[%s13317_s22 + $0x774] ss:$84 sps:$4 sm:$0xff]  }
 0x3b8   : > { %5543 = vmatprep.subr.bf16.mxu1 %v12176_v2  ;;  %v12249_v1 = vld [vmem:[%s13317_s22 + $0x768] ss:$84 sps:$4 sm:$0xff]   ;;  %v12252_v2 = vld [vmem:[%s13317_s22 + $0x770] ss:$84 sps:$4 sm:$0xff]  }
 0x3ba   : > { %5462 = vmatpush1.bf16.msra.mxu0 %v12171_v3  ;;  %v12257_v3 = vld [vmem:[%s13317_s22 + $0x814] ss:$84 sps:$4 sm:$0xff]  }
 0x3bb   : > { %5544 = vmatpush1.bf16.msra.mxu1 %v12174_v4  ;;  %5463 = vmatprep.subr.bf16.mxu0 %v12179_v5  ;;  %v12260_v4 = vld [vmem:[%s13317_s22 + $0x81c] ss:$84 sps:$4 sm:$0xff]  }
 0x3bc   : > { %5545 = vmatprep.subr.bf16.mxu1 %v12182_v6  ;;  %v12255_v5 = vld [vmem:[%s13317_s22 + $0x810] ss:$84 sps:$4 sm:$0xff]   ;;  %v12258_v6 = vld [vmem:[%s13317_s22 + $0x818] ss:$84 sps:$4 sm:$0xff]  }
 0x3be   : > { %5464 = vmatpush1.bf16.msra.mxu0 %v12177_v7  ;;  %v12263_v7 = vld [vmem:[%s13317_s22 + $0x8bc] ss:$84 sps:$4 sm:$0xff]  }
 0x3bf   : > { %5546 = vmatpush1.bf16.msra.mxu1 %v12180_v8  ;;  %5556 = vmatprep.subr.bf16.mxu0 %v12185_v9  ;;  %v12266_v8 = vld [vmem:[%s13317_s22 + $0x8c4] ss:$84 sps:$4 sm:$0xff]  }
 0x3c0   : > { %5638 = vmatprep.subr.bf16.mxu1 %v12188_v10  ;;  %v12261_v9 = vld [vmem:[%s13317_s22 + $0x8b8] ss:$84 sps:$4 sm:$0xff]   ;;  %v12264_v10 = vld [vmem:[%s13317_s22 + $0x8c0] ss:$84 sps:$4 sm:$0xff]  }
 0x3c1   : > { %5466 = vmatmul.mubr.bf16.vlgmr.msra.gmra.mrb[12].mxu0 %v13513_v44 }
 0x3c2   : > { %5548 = vmatmul.mubr.bf16.vlgmr.msra.gmra.mrb[12].mxu1 %v13513_v44  ;;  %5557 = vmatpush1.bf16.msra.mxu0 %v12183_v11  ;;  %v12269_v11 = vld [vmem:[%s13317_s22 + $0x964] ss:$84 sps:$4 sm:$0xff]  }
 0x3c3   : > { %5588 = vmatprep.mubr.bf16.mxu0 %v13434_v34  ;;  %5639 = vmatpush1.bf16.msra.mxu1 %v12186_v12  ;;  %v12272_v12 = vld [vmem:[%s13317_s22 + $0x96c] ss:$84 sps:$4 sm:$0xff]  }
 0x3c4   : > { %5670 = vmatprep.mubr.bf16.mxu1 %v13434_v34  ;;  %5558 = vmatprep.subr.bf16.mxu0 %v12191_v13  ;;  %v12267_v13 = vld [vmem:[%s13317_s22 + $0x960] ss:$84 sps:$4 sm:$0xff]  }
 0x3c5   : > { %5640 = vmatprep.subr.bf16.mxu1 %v12194_v15  ;;  %v12270_v15 = vld [vmem:[%s13317_s22 + $0x968] ss:$84 sps:$4 sm:$0xff]  }
 0x3c6   : > { %5559 = vmatpush1.bf16.msra.mxu0 %v12189_v16  ;;  %v12275_v16 = vld [vmem:[%s13317_s22 + $0xa0c] ss:$84 sps:$4 sm:$0xff]  }
 0x3c7   : > { %5641 = vmatpush1.bf16.msra.mxu1 %v12192_v17  ;;  %5560 = vmatprep.subr.bf16.mxu0 %v12197_v18  ;;  %v12278_v17 = vld [vmem:[%s13317_s22 + $0xa14] ss:$84 sps:$4 sm:$0xff]  }
 0x3c8   : > { %5642 = vmatprep.subr.bf16.mxu1 %v12200_v20  ;;  %v12273_v18 = vld [vmem:[%s13317_s22 + $0xa08] ss:$84 sps:$4 sm:$0xff]   ;;  %v12276_v20 = vld [vmem:[%s13317_s22 + $0xa10] ss:$84 sps:$4 sm:$0xff]  }
 0x3ca   : > { %5561 = vmatpush1.bf16.msra.mxu0 %v12195_v21  ;;  %v12281_v21 = vld [vmem:[%s13317_s22 + $0xab4] ss:$84 sps:$4 sm:$0xff]  }
 0x3cb   : > { %5643 = vmatpush1.bf16.msra.mxu1 %v12198_v24  ;;  %5562 = vmatprep.subr.bf16.mxu0 %v12203_v27  ;;  %v12284_v24 = vld [vmem:[%s13317_s22 + $0xabc] ss:$84 sps:$4 sm:$0xff]  }
 0x3cc   : > { %5644 = vmatprep.subr.bf16.mxu1 %v12206_v28  ;;  %v12279_v27 = vld [vmem:[%s13317_s22 + $0xab0] ss:$84 sps:$4 sm:$0xff]   ;;  %v12282_v28 = vld [vmem:[%s13317_s22 + $0xab8] ss:$84 sps:$4 sm:$0xff]  }
 0x3ce   : > { %5563 = vmatpush1.bf16.msra.mxu0 %v12201_v29  ;;  %v12287_v29 = vld [vmem:[%s13317_s22 + $0xb5c] ss:$84 sps:$4 sm:$0xff]  }
 0x3cf   : > { %5645 = vmatpush1.bf16.msra.mxu1 %v12204_v30  ;;  %5564 = vmatprep.subr.bf16.mxu0 %v12209_v32  ;;  %v12290_v30 = vld [vmem:[%s13317_s22 + $0xb64] ss:$84 sps:$4 sm:$0xff]  }
 0x3d0   : > { %5646 = vmatprep.subr.bf16.mxu1 %v12212_v33  ;;  %v12285_v32 = vld [vmem:[%s13317_s22 + $0xb58] ss:$84 sps:$4 sm:$0xff]   ;;  %v12288_v33 = vld [vmem:[%s13317_s22 + $0xb60] ss:$84 sps:$4 sm:$0xff]  }
 0x3d2   : > { %5565 = vmatpush1.bf16.msra.mxu0 %v12207_v35  ;;  %v12293_v35 = vld [vmem:[%s13317_s22 + $0xc04] ss:$84 sps:$4 sm:$0xff]  }
 0x3d3   : > { %5647 = vmatpush1.bf16.msra.mxu1 %v12210_v36  ;;  %5566 = vmatprep.subr.bf16.mxu0 %v12215_v38  ;;  %v12296_v36 = vld [vmem:[%s13317_s22 + $0xc0c] ss:$84 sps:$4 sm:$0xff]  }
 0x3d4   : > { %5648 = vmatprep.subr.bf16.mxu1 %v12218_v39  ;;  %v12291_v38 = vld [vmem:[%s13317_s22 + $0xc00] ss:$84 sps:$4 sm:$0xff]   ;;  %v12294_v39 = vld [vmem:[%s13317_s22 + $0xc08] ss:$84 sps:$4 sm:$0xff]  }
 0x3d6   : > { %5567 = vmatpush1.bf16.msra.mxu0 %v12213_v41  ;;  %v12299_v41 = vld [vmem:[%s13317_s22 + $0xcac] ss:$84 sps:$4 sm:$0xff]  }
 0x3d7   : > { %5649 = vmatpush1.bf16.msra.mxu1 %v12216_v42  ;;  %5568 = vmatprep.subr.bf16.mxu0 %v12221_v43  ;;  %v12302_v42 = vld [vmem:[%s13317_s22 + $0xcb4] ss:$84 sps:$4 sm:$0xff]  }
 0x3d8   : > { %5650 = vmatprep.subr.bf16.mxu1 %v12224_v45  ;;  %v12297_v43 = vld [vmem:[%s13317_s22 + $0xca8] ss:$84 sps:$4 sm:$0xff]   ;;  %v12300_v45 = vld [vmem:[%s13317_s22 + $0xcb0] ss:$84 sps:$4 sm:$0xff]  }
 0x3da   : > { %5569 = vmatpush1.bf16.msra.mxu0 %v12219_v46  ;;  %v12305_v46 = vld [vmem:[%s13317_s22 + $0xd54] ss:$84 sps:$4 sm:$0xff]  }
 0x3db   : > { %5651 = vmatpush1.bf16.msra.mxu1 %v12222_v47  ;;  %5570 = vmatprep.subr.bf16.mxu0 %v12227_v48  ;;  %v12308_v47 = vld [vmem:[%s13317_s22 + $0xd5c] ss:$84 sps:$4 sm:$0xff]  }
 0x3dc   : > { %5652 = vmatprep.subr.bf16.mxu1 %v12230_v31  ;;  %v12303_v48 = vld [vmem:[%s13317_s22 + $0xd50] ss:$84 sps:$4 sm:$0xff]   ;;  %v12306_v31 = vld [vmem:[%s13317_s22 + $0xd58] ss:$84 sps:$4 sm:$0xff]  }
 0x3de   : > { %5571 = vmatpush1.bf16.msra.mxu0 %v12225_v49  ;;  %v12311_v49 = vld [vmem:[%s13317_s22 + $0xdfc] ss:$84 sps:$4 sm:$0xff]  }
 0x3df   : > { %5653 = vmatpush1.bf16.msra.mxu1 %v12228_v50  ;;  %5572 = vmatprep.subr.bf16.mxu0 %v12233_v51  ;;  %v12314_v50 = vld [vmem:[%s13317_s22 + $0xe04] ss:$84 sps:$4 sm:$0xff]  }
 0x3e0   : > { %5654 = vmatprep.subr.bf16.mxu1 %v12236_v52  ;;  %v12309_v51 = vld [vmem:[%s13317_s22 + $0xdf8] ss:$84 sps:$4 sm:$0xff]   ;;  %v12312_v52 = vld [vmem:[%s13317_s22 + $0xe00] ss:$84 sps:$4 sm:$0xff]  }
 0x3e2   : > { %5573 = vmatpush1.bf16.msra.mxu0 %v12231_v53  ;;  %v12317_v53 = vld [vmem:[%s13317_s22 + $0xea4] ss:$84 sps:$4 sm:$0xff]  }
 0x3e3   : > { %5655 = vmatpush1.bf16.msra.mxu1 %v12234_v54  ;;  %5574 = vmatprep.subr.bf16.mxu0 %v12239_v55  ;;  %v12320_v55 = vld [vmem:[%s13317_s22 + $0xeac] ss:$84 sps:$4 sm:$0xff]  }
 0x3e4   : > { %5656 = vmatprep.subr.bf16.mxu1 %v12242_v56 }
 0x3e6   : > { %5575 = vmatpush1.bf16.msra.mxu0 %v12237_v57 }
 0x3e7   : > { %5657 = vmatpush1.bf16.msra.mxu1 %v12240_v58  ;;  %5576 = vmatprep.subr.bf16.mxu0 %v12245_v59 }
 0x3e8   : > { %5658 = vmatprep.subr.bf16.mxu1 %v12248_v60  ;;  %v12315_v60 = vld [vmem:[%s13317_s22 + $0xea0] ss:$84 sps:$4 sm:$0xff]  }
 0x3ea   : > { %5577 = vmatpush1.bf16.msra.mxu0 %v12243_v61 }
 0x3eb   : > { %5659 = vmatpush1.bf16.msra.mxu1 %v12246_v62  ;;  %5578 = vmatprep.subr.bf16.mxu0 %v12251_v63  ;;  %v12318_v63 = vld [vmem:[%s13317_s22 + $0xea8] ss:$84 sps:$4 sm:$0xff]  }
 0x3ec   : > { %5660 = vmatprep.subr.bf16.mxu1 %v12254_v0  ;;  %v12323_v0 = vld [vmem:[%s13317_s22 + $0xf4c] ss:$84 sps:$4 sm:$0xff]  }
 0x3ee   : > { %5579 = vmatpush1.bf16.msra.mxu0 %v12249_v1 }
 0x3ef   : > { %5661 = vmatpush1.bf16.msra.mxu1 %v12252_v2  ;;  %5580 = vmatprep.subr.bf16.mxu0 %v12257_v3  ;;  %v12326_v2 = vld [vmem:[%s13317_s22 + $0xf54] ss:$84 sps:$4 sm:$0xff]  }
 0x3f0   : > { %5662 = vmatprep.subr.bf16.mxu1 %v12260_v4  ;;  %v12321_v3 = vld [vmem:[%s13317_s22 + $0xf48] ss:$84 sps:$4 sm:$0xff]   ;;  %v12324_v4 = vld [vmem:[%s13317_s22 + $0xf50] ss:$84 sps:$4 sm:$0xff]  }
 0x3f2   : > { %5581 = vmatpush1.bf16.msra.mxu0 %v12255_v5  ;;  %v12329_v5 = vld [vmem:[%s13317_s22 + $0xff4] ss:$84 sps:$4 sm:$0xff]  }
 0x3f3   : > { %5663 = vmatpush1.bf16.msra.mxu1 %v12258_v6  ;;  %5582 = vmatprep.subr.bf16.mxu0 %v12263_v7  ;;  %v12332_v6 = vld [vmem:[%s13317_s22 + $0xffc] ss:$84 sps:$4 sm:$0xff]  }
 0x3f4   : > { %5664 = vmatprep.subr.bf16.mxu1 %v12266_v8  ;;  %v12327_v7 = vld [vmem:[%s13317_s22 + $0xff0] ss:$84 sps:$4 sm:$0xff]   ;;  %v12330_v8 = vld [vmem:[%s13317_s22 + $0xff8] ss:$84 sps:$4 sm:$0xff]  }
 0x3f6   : > { %5583 = vmatpush1.bf16.msra.mxu0 %v12261_v9  ;;  %v12335_v9 = vld [vmem:[%s13317_s22 + $0x109c] ss:$84 sps:$4 sm:$0xff]  }
 0x3f7   : > { %5665 = vmatpush1.bf16.msra.mxu1 %v12264_v10  ;;  %5584 = vmatprep.subr.bf16.mxu0 %v12269_v11  ;;  %v12338_v10 = vld [vmem:[%s13317_s22 + $0x10a4] ss:$84 sps:$4 sm:$0xff]  }
 0x3f8   : > { %5666 = vmatprep.subr.bf16.mxu1 %v12272_v12  ;;  %v12333_v11 = vld [vmem:[%s13317_s22 + $0x1098] ss:$84 sps:$4 sm:$0xff]   ;;  %v12336_v12 = vld [vmem:[%s13317_s22 + $0x10a0] ss:$84 sps:$4 sm:$0xff]  }
 0x3fa   : > { %5585 = vmatpush1.bf16.msra.mxu0 %v12267_v13  ;;  %v12341_v13 = vld [vmem:[%s13317_s22 + $0x1144] ss:$84 sps:$4 sm:$0xff]  }
 0x3fb   : > { %5667 = vmatpush1.bf16.msra.mxu1 %v12270_v15  ;;  %5586 = vmatprep.subr.bf16.mxu0 %v12275_v16  ;;  %v12344_v15 = vld [vmem:[%s13317_s22 + $0x114c] ss:$84 sps:$4 sm:$0xff]  }
 0x3fc   : > { %5668 = vmatprep.subr.bf16.mxu1 %v12278_v17  ;;  %v12339_v16 = vld [vmem:[%s13317_s22 + $0x1140] ss:$84 sps:$4 sm:$0xff]   ;;  %v12342_v17 = vld [vmem:[%s13317_s22 + $0x1148] ss:$84 sps:$4 sm:$0xff]  }
 0x3fe   : > { %5587 = vmatpush1.bf16.msra.mxu0 %v12273_v18  ;;  %v12347_v18 = vld [vmem:[%s13317_s22 + $0x11ec] ss:$84 sps:$4 sm:$0xff]  }
 0x3ff   : > { %5669 = vmatpush1.bf16.msra.mxu1 %v12276_v20  ;;  %5597 = vmatprep.subr.bf16.mxu0 %v12281_v21  ;;  %v12350_v20 = vld [vmem:[%s13317_s22 + $0x11f4] ss:$84 sps:$4 sm:$0xff]  }
 0x400   : > { %5679 = vmatprep.subr.bf16.mxu1 %v12284_v24  ;;  %v12345_v21 = vld [vmem:[%s13317_s22 + $0x11e8] ss:$84 sps:$4 sm:$0xff]   ;;  %v12348_v24 = vld [vmem:[%s13317_s22 + $0x11f0] ss:$84 sps:$4 sm:$0xff]  }
 0x401   : > { %5589 = vmatmul.mubr.bf16.vlgmr.msra.gmra.mrb[16].mxu0 %v13438_v37 }
 0x402   : > { %5671 = vmatmul.mubr.bf16.vlgmr.msra.gmra.mrb[16].mxu1 %v13438_v37  ;;  %5598 = vmatpush1.bf16.msra.mxu0 %v12279_v27  ;;  %v12353_v27 = vld [vmem:[%s13317_s22 + $0x1294] ss:$84 sps:$4 sm:$0xff]  }
 0x403   : > { %5629 = vmatprep.mubr.bf16.mxu0 %v13444_v40  ;;  %5680 = vmatpush1.bf16.msra.mxu1 %v12282_v28  ;;  %v12356_v28 = vld [vmem:[%s13317_s22 + $0x129c] ss:$84 sps:$4 sm:$0xff]  }
 0x404   : > { %5711 = vmatprep.mubr.bf16.mxu1 %v13444_v40  ;;  %5599 = vmatprep.subr.bf16.mxu0 %v12287_v29  ;;  %v12351_v29 = vld [vmem:[%s13317_s22 + $0x1290] ss:$84 sps:$4 sm:$0xff]  }
 0x405   : > { %5681 = vmatprep.subr.bf16.mxu1 %v12290_v30  ;;  %v12354_v30 = vld [vmem:[%s13317_s22 + $0x1298] ss:$84 sps:$4 sm:$0xff]  }
 0x406   : > { %5600 = vmatpush1.bf16.msra.mxu0 %v12285_v32  ;;  %v12359_v32 = vld [vmem:[%s13317_s22 + $0x133c] ss:$84 sps:$4 sm:$0xff]  }
 0x407   : > { %5682 = vmatpush1.bf16.msra.mxu1 %v12288_v33  ;;  %5601 = vmatprep.subr.bf16.mxu0 %v12293_v35  ;;  %v12362_v33 = vld [vmem:[%s13317_s22 + $0x1344] ss:$84 sps:$4 sm:$0xff]  }
 0x408   : > { %5683 = vmatprep.subr.bf16.mxu1 %v12296_v36  ;;  %v12357_v35 = vld [vmem:[%s13317_s22 + $0x1338] ss:$84 sps:$4 sm:$0xff]   ;;  %v12360_v36 = vld [vmem:[%s13317_s22 + $0x1340] ss:$84 sps:$4 sm:$0xff]  }
 0x40a   : > { %5602 = vmatpush1.bf16.msra.mxu0 %v12291_v38  ;;  %v12365_v38 = vld [vmem:[%s13317_s22 + $0x13e4] ss:$84 sps:$4 sm:$0xff]  }
 0x40b   : > { %5684 = vmatpush1.bf16.msra.mxu1 %v12294_v39  ;;  %5603 = vmatprep.subr.bf16.mxu0 %v12299_v41  ;;  %v12368_v39 = vld [vmem:[%s13317_s22 + $0x13ec] ss:$84 sps:$4 sm:$0xff]  }
 0x40c   : > { %5685 = vmatprep.subr.bf16.mxu1 %v12302_v42  ;;  %v12363_v41 = vld [vmem:[%s13317_s22 + $0x13e0] ss:$84 sps:$4 sm:$0xff]   ;;  %v12366_v42 = vld [vmem:[%s13317_s22 + $0x13e8] ss:$84 sps:$4 sm:$0xff]  }
 0x40e   : > { %5604 = vmatpush1.bf16.msra.mxu0 %v12297_v43  ;;  %v12371_v43 = vld [vmem:[%s13317_s22 + $0x148c] ss:$84 sps:$4 sm:$0xff]  }
 0x40f   : > { %5686 = vmatpush1.bf16.msra.mxu1 %v12300_v45  ;;  %5605 = vmatprep.subr.bf16.mxu0 %v12305_v46  ;;  %v12374_v45 = vld [vmem:[%s13317_s22 + $0x1494] ss:$84 sps:$4 sm:$0xff]  }
 0x410   : > { %5687 = vmatprep.subr.bf16.mxu1 %v12308_v47  ;;  %v12369_v46 = vld [vmem:[%s13317_s22 + $0x1488] ss:$84 sps:$4 sm:$0xff]   ;;  %v12372_v47 = vld [vmem:[%s13317_s22 + $0x1490] ss:$84 sps:$4 sm:$0xff]  }
 0x412   : > { %5606 = vmatpush1.bf16.msra.mxu0 %v12303_v48  ;;  %v12377_v48 = vld [vmem:[%s13317_s22 + $0x44] ss:$84 sps:$4 sm:$0xff]  }
 0x413   : > { %5688 = vmatpush1.bf16.msra.mxu1 %v12306_v31  ;;  %5607 = vmatprep.subr.bf16.mxu0 %v12311_v49  ;;  %v12380_v31 = vld [vmem:[%s13317_s22 + $0x4c] ss:$84 sps:$4 sm:$0xff]  }
 0x414   : > { %v13889_v54 = vpop.f32.mrb[8].mxu0  ;;  %5689 = vmatprep.subr.bf16.mxu1 %v12314_v50  ;;  %v12375_v49 = vld [vmem:[%s13317_s22 + $0x40] ss:$84 sps:$4 sm:$0xff]   ;;  %v12378_v50 = vld [vmem:[%s13317_s22 + $0x48] ss:$84 sps:$4 sm:$0xff]  }
 0x415   : > { %v13892_v56 = vpop.f32.mrb[8].mxu1  ;;  %v13894_v57 = vpop.f32.mrb[9].mxu0 }
 0x416   : > { %v13896_v58 = vpop.f32.mrb[9].mxu1  ;;  %v5307_v59 = vpop.f32.mrb[10].mxu0  ;;  %5608 = vmatpush1.bf16.msra.mxu0 %v12309_v51  ;;  %v12383_v51 = vld [vmem:[%s13317_s22 + $0xec] ss:$84 sps:$4 sm:$0xff]  }
 0x417   : > { %v5389_v61 = vpop.f32.mrb[10].mxu1  ;;  %5690 = vmatpush1.bf16.msra.mxu1 %v12312_v52  ;;  %v5308_v62 = vpop.f32.mrb[11].mxu0  ;;  %5609 = vmatprep.subr.bf16.mxu0 %v12317_v53  ;;  %v12386_v52 = vld [vmem:[%s13317_s22 + $0xf4] ss:$84 sps:$4 sm:$0xff]  }
 0x418   : > { %v5390_v1 = vpop.f32.mrb[11].mxu1  ;;  %5691 = vmatprep.subr.bf16.mxu1 %v12320_v55  ;;  %v12381_v53 = vld [vmem:[%s13317_s22 + $0xe8] ss:$84 sps:$4 sm:$0xff]   ;;  %v12384_v55 = vld [vmem:[%s13317_s22 + $0xf0] ss:$84 sps:$4 sm:$0xff]  }
 0x419   : > { %v12389_v59 = vld [vmem:[%s13317_s22 + $0x194] ss:$84 sps:$4 sm:$0xff]   ;;  %v12387_v61 = vld [vmem:[%s13317_s22 + $0x190] ss:$84 sps:$4 sm:$0xff]   ;;  %v12390_v62 = vld [vmem:[%s13317_s22 + $0x198] ss:$84 sps:$4 sm:$0xff]  }
 0x41a   : > { %5610 = vmatpush1.bf16.msra.mxu0 %v12315_v60  ;;  %v12392_v60 = vld [vmem:[%s13317_s22 + $0x19c] ss:$84 sps:$4 sm:$0xff]   ;;  %v12393_v1 = vld [vmem:[%s13317_s22 + $0x238] ss:$84 sps:$4 sm:$0xff]  }
 0x41b   : > { %5692 = vmatpush1.bf16.msra.mxu1 %v12318_v63  ;;  %5611 = vmatprep.subr.bf16.mxu0 %v12323_v0  ;;  %v12395_v63 = vld [vmem:[%s13317_s22 + $0x23c] ss:$84 sps:$4 sm:$0xff]   ;;  %v12398_v0 = vld [vmem:[%s13317_s22 + $0x244] ss:$84 sps:$4 sm:$0xff]  }
 0x41c   : > { %5693 = vmatprep.subr.bf16.mxu1 %v12326_v2  ;;  %v12396_v2 = vld [vmem:[%s13317_s22 + $0x240] ss:$84 sps:$4 sm:$0xff]  }
 0x41e   : > { %5612 = vmatpush1.bf16.msra.mxu0 %v12321_v3  ;;  %v12401_v3 = vld [vmem:[%s13317_s22 + $0x2e4] ss:$84 sps:$4 sm:$0xff]  }
 0x41f   : > { %5694 = vmatpush1.bf16.msra.mxu1 %v12324_v4  ;;  %5613 = vmatprep.subr.bf16.mxu0 %v12329_v5  ;;  %v12404_v4 = vld [vmem:[%s13317_s22 + $0x2ec] ss:$84 sps:$4 sm:$0xff]  }
 0x420   : > { %5695 = vmatprep.subr.bf16.mxu1 %v12332_v6  ;;  %v12399_v5 = vld [vmem:[%s13317_s22 + $0x2e0] ss:$84 sps:$4 sm:$0xff]   ;;  %v12402_v6 = vld [vmem:[%s13317_s22 + $0x2e8] ss:$84 sps:$4 sm:$0xff]  }
 0x422   : > { %5614 = vmatpush1.bf16.msra.mxu0 %v12327_v7  ;;  %v12407_v7 = vld [vmem:[%s13317_s22 + $0x38c] ss:$84 sps:$4 sm:$0xff]  }
 0x423   : > { %5696 = vmatpush1.bf16.msra.mxu1 %v12330_v8  ;;  %5615 = vmatprep.subr.bf16.mxu0 %v12335_v9  ;;  %v12410_v8 = vld [vmem:[%s13317_s22 + $0x394] ss:$84 sps:$4 sm:$0xff]  }
 0x424   : > { %5697 = vmatprep.subr.bf16.mxu1 %v12338_v10  ;;  %v12405_v9 = vld [vmem:[%s13317_s22 + $0x388] ss:$84 sps:$4 sm:$0xff]   ;;  %v12408_v10 = vld [vmem:[%s13317_s22 + $0x390] ss:$84 sps:$4 sm:$0xff]  }
 0x426   : > { %5616 = vmatpush1.bf16.msra.mxu0 %v12333_v11  ;;  %v12413_v11 = vld [vmem:[%s13317_s22 + $0x434] ss:$84 sps:$4 sm:$0xff]  }
 0x427   : > { %5698 = vmatpush1.bf16.msra.mxu1 %v12336_v12  ;;  %5617 = vmatprep.subr.bf16.mxu0 %v12341_v13  ;;  %v12416_v12 = vld [vmem:[%s13317_s22 + $0x43c] ss:$84 sps:$4 sm:$0xff]  }
 0x428   : > { %5699 = vmatprep.subr.bf16.mxu1 %v12344_v15  ;;  %v12411_v13 = vld [vmem:[%s13317_s22 + $0x430] ss:$84 sps:$4 sm:$0xff]   ;;  %v12414_v15 = vld [vmem:[%s13317_s22 + $0x438] ss:$84 sps:$4 sm:$0xff]  }
 0x42a   : > { %5618 = vmatpush1.bf16.msra.mxu0 %v12339_v16  ;;  %v12419_v16 = vld [vmem:[%s13317_s22 + $0x4dc] ss:$84 sps:$4 sm:$0xff]  }
 0x42b   : > { %5700 = vmatpush1.bf16.msra.mxu1 %v12342_v17  ;;  %5619 = vmatprep.subr.bf16.mxu0 %v12347_v18  ;;  %v12422_v17 = vld [vmem:[%s13317_s22 + $0x4e4] ss:$84 sps:$4 sm:$0xff]  }
 0x42c   : > { %5701 = vmatprep.subr.bf16.mxu1 %v12350_v20  ;;  %v12417_v18 = vld [vmem:[%s13317_s22 + $0x4d8] ss:$84 sps:$4 sm:$0xff]   ;;  %v12420_v20 = vld [vmem:[%s13317_s22 + $0x4e0] ss:$84 sps:$4 sm:$0xff]  }
 0x42e   : > { %5620 = vmatpush1.bf16.msra.mxu0 %v12345_v21  ;;  %v12425_v21 = vld [vmem:[%s13317_s22 + $0x584] ss:$84 sps:$4 sm:$0xff]  }
 0x42f   : > { %5702 = vmatpush1.bf16.msra.mxu1 %v12348_v24  ;;  %5621 = vmatprep.subr.bf16.mxu0 %v12353_v27  ;;  %v12428_v24 = vld [vmem:[%s13317_s22 + $0x58c] ss:$84 sps:$4 sm:$0xff]  }
 0x430   : > { %5703 = vmatprep.subr.bf16.mxu1 %v12356_v28  ;;  %v12423_v27 = vld [vmem:[%s13317_s22 + $0x580] ss:$84 sps:$4 sm:$0xff]   ;;  %v12426_v28 = vld [vmem:[%s13317_s22 + $0x588] ss:$84 sps:$4 sm:$0xff]  }
 0x432   : > { %5622 = vmatpush1.bf16.msra.mxu0 %v12351_v29  ;;  %v12431_v29 = vld [vmem:[%s13317_s22 + $0x62c] ss:$84 sps:$4 sm:$0xff]  }
 0x433   : > { %5704 = vmatpush1.bf16.msra.mxu1 %v12354_v30  ;;  %5623 = vmatprep.subr.bf16.mxu0 %v12359_v32  ;;  %v12434_v30 = vld [vmem:[%s13317_s22 + $0x634] ss:$84 sps:$4 sm:$0xff]  }
 0x434   : > { %5705 = vmatprep.subr.bf16.mxu1 %v12362_v33  ;;  %v12429_v32 = vld [vmem:[%s13317_s22 + $0x628] ss:$84 sps:$4 sm:$0xff]   ;;  %v12432_v33 = vld [vmem:[%s13317_s22 + $0x630] ss:$84 sps:$4 sm:$0xff]  }
 0x436   : > { %5624 = vmatpush1.bf16.msra.mxu0 %v12357_v35  ;;  %v12437_v35 = vld [vmem:[%s13317_s22 + $0x6d4] ss:$84 sps:$4 sm:$0xff]  }
 0x437   : > { %5706 = vmatpush1.bf16.msra.mxu1 %v12360_v36  ;;  %5625 = vmatprep.subr.bf16.mxu0 %v12365_v38  ;;  %v12440_v36 = vld [vmem:[%s13317_s22 + $0x6dc] ss:$84 sps:$4 sm:$0xff]  }
 0x438   : > { %5707 = vmatprep.subr.bf16.mxu1 %v12368_v39  ;;  %v12435_v38 = vld [vmem:[%s13317_s22 + $0x6d0] ss:$84 sps:$4 sm:$0xff]   ;;  %v12438_v39 = vld [vmem:[%s13317_s22 + $0x6d8] ss:$84 sps:$4 sm:$0xff]  }
 0x43a   : > { %5626 = vmatpush1.bf16.msra.mxu0 %v12363_v41  ;;  %v12443_v41 = vld [vmem:[%s13317_s22 + $0x77c] ss:$84 sps:$4 sm:$0xff]  }
 0x43b   : > { %5708 = vmatpush1.bf16.msra.mxu1 %v12366_v42  ;;  %5627 = vmatprep.subr.bf16.mxu0 %v12371_v43  ;;  %v12446_v42 = vld [vmem:[%s13317_s22 + $0x784] ss:$84 sps:$4 sm:$0xff]  }
 0x43c   : > { %5709 = vmatprep.subr.bf16.mxu1 %v12374_v45  ;;  %v12441_v43 = vld [vmem:[%s13317_s22 + $0x778] ss:$84 sps:$4 sm:$0xff]   ;;  %v12444_v45 = vld [vmem:[%s13317_s22 + $0x780] ss:$84 sps:$4 sm:$0xff]  }
 0x43e   : > { %5628 = vmatpush1.bf16.msra.mxu0 %v12369_v46  ;;  %v12449_v46 = vld [vmem:[%s13317_s22 + $0x824] ss:$84 sps:$4 sm:$0xff]  }
 0x43f   : > { %5710 = vmatpush1.bf16.msra.mxu1 %v12372_v47  ;;  %5720 = vmatprep.subr.bf16.mxu0 %v12377_v48  ;;  %v12452_v47 = vld [vmem:[%s13317_s22 + $0x82c] ss:$84 sps:$4 sm:$0xff]  }
 0x440   : > { %5802 = vmatprep.subr.bf16.mxu1 %v12380_v31  ;;  %v12447_v48 = vld [vmem:[%s13317_s22 + $0x820] ss:$84 sps:$4 sm:$0xff]   ;;  %v12450_v31 = vld [vmem:[%s13317_s22 + $0x828] ss:$84 sps:$4 sm:$0xff]  }
 0x441   : > { %5630 = vmatmul.mubr.bf16.vlgmr.msra.gmra.mrb[16].mxu0 %v13513_v44 }
 0x442   : > { %5712 = vmatmul.mubr.bf16.vlgmr.msra.gmra.mrb[16].mxu1 %v13513_v44  ;;  %5721 = vmatpush1.bf16.msra.mxu0 %v12375_v49  ;;  %v12455_v49 = vld [vmem:[%s13317_s22 + $0x8cc] ss:$84 sps:$4 sm:$0xff]  }
 0x443   : > { %5752 = vmatprep.mubr.bf16.mxu0 %v13434_v34  ;;  %5803 = vmatpush1.bf16.msra.mxu1 %v12378_v50  ;;  %v12458_v50 = vld [vmem:[%s13317_s22 + $0x8d4] ss:$84 sps:$4 sm:$0xff]  }
 0x444   : > { %5834 = vmatprep.mubr.bf16.mxu1 %v13434_v34  ;;  %5722 = vmatprep.subr.bf16.mxu0 %v12383_v51  ;;  %v12453_v51 = vld [vmem:[%s13317_s22 + $0x8c8] ss:$84 sps:$4 sm:$0xff]  }
 0x445   : > { %5804 = vmatprep.subr.bf16.mxu1 %v12386_v52  ;;  %v12456_v52 = vld [vmem:[%s13317_s22 + $0x8d0] ss:$84 sps:$4 sm:$0xff]  }
 0x446   : > { %5723 = vmatpush1.bf16.msra.mxu0 %v12381_v53  ;;  %v12461_v53 = vld [vmem:[%s13317_s22 + $0x974] ss:$84 sps:$4 sm:$0xff]  }
 0x447   : > { %5805 = vmatpush1.bf16.msra.mxu1 %v12384_v55  ;;  %5724 = vmatprep.subr.bf16.mxu0 %v12389_v59  ;;  %v12464_v55 = vld [vmem:[%s13317_s22 + $0x97c] ss:$84 sps:$4 sm:$0xff]  }
 0x448   : > { %5806 = vmatprep.subr.bf16.mxu1 %v12392_v60  ;;  %v12459_v59 = vld [vmem:[%s13317_s22 + $0x970] ss:$84 sps:$4 sm:$0xff]   ;;  %v12462_v60 = vld [vmem:[%s13317_s22 + $0x978] ss:$84 sps:$4 sm:$0xff]  }
 0x44a   : > { %5725 = vmatpush1.bf16.msra.mxu0 %v12387_v61  ;;  %v12467_v61 = vld [vmem:[%s13317_s22 + $0xa1c] ss:$84 sps:$4 sm:$0xff]  }
 0x44b   : > { %5807 = vmatpush1.bf16.msra.mxu1 %v12390_v62  ;;  %5726 = vmatprep.subr.bf16.mxu0 %v12395_v63  ;;  %v12470_v62 = vld [vmem:[%s13317_s22 + $0xa24] ss:$84 sps:$4 sm:$0xff]  }
 0x44c   : > { %5808 = vmatprep.subr.bf16.mxu1 %v12398_v0  ;;  %v12465_v63 = vld [vmem:[%s13317_s22 + $0xa18] ss:$84 sps:$4 sm:$0xff]   ;;  %v12468_v0 = vld [vmem:[%s13317_s22 + $0xa20] ss:$84 sps:$4 sm:$0xff]  }
 0x44e   : > { %5727 = vmatpush1.bf16.msra.mxu0 %v12393_v1  ;;  %v12473_v1 = vld [vmem:[%s13317_s22 + $0xac4] ss:$84 sps:$4 sm:$0xff]  }
 0x44f   : > { %5809 = vmatpush1.bf16.msra.mxu1 %v12396_v2  ;;  %5728 = vmatprep.subr.bf16.mxu0 %v12401_v3  ;;  %v12476_v2 = vld [vmem:[%s13317_s22 + $0xacc] ss:$84 sps:$4 sm:$0xff]  }
 0x450   : > { %5810 = vmatprep.subr.bf16.mxu1 %v12404_v4  ;;  %v12471_v3 = vld [vmem:[%s13317_s22 + $0xac0] ss:$84 sps:$4 sm:$0xff]   ;;  %v12474_v4 = vld [vmem:[%s13317_s22 + $0xac8] ss:$84 sps:$4 sm:$0xff]  }
 0x452   : > { %5729 = vmatpush1.bf16.msra.mxu0 %v12399_v5  ;;  %v12479_v5 = vld [vmem:[%s13317_s22 + $0xb6c] ss:$84 sps:$4 sm:$0xff]  }
 0x453   : > { %5811 = vmatpush1.bf16.msra.mxu1 %v12402_v6  ;;  %5730 = vmatprep.subr.bf16.mxu0 %v12407_v7  ;;  %v12482_v6 = vld [vmem:[%s13317_s22 + $0xb74] ss:$84 sps:$4 sm:$0xff]  }
 0x454   : > { %5812 = vmatprep.subr.bf16.mxu1 %v12410_v8  ;;  %v12477_v7 = vld [vmem:[%s13317_s22 + $0xb68] ss:$84 sps:$4 sm:$0xff]   ;;  %v12480_v8 = vld [vmem:[%s13317_s22 + $0xb70] ss:$84 sps:$4 sm:$0xff]  }
 0x456   : > { %5731 = vmatpush1.bf16.msra.mxu0 %v12405_v9  ;;  %v12485_v9 = vld [vmem:[%s13317_s22 + $0xc14] ss:$84 sps:$4 sm:$0xff]  }
 0x457   : > { %5813 = vmatpush1.bf16.msra.mxu1 %v12408_v10  ;;  %5732 = vmatprep.subr.bf16.mxu0 %v12413_v11  ;;  %v12488_v10 = vld [vmem:[%s13317_s22 + $0xc1c] ss:$84 sps:$4 sm:$0xff]  }
 0x458   : > { %5814 = vmatprep.subr.bf16.mxu1 %v12416_v12  ;;  %v12483_v11 = vld [vmem:[%s13317_s22 + $0xc10] ss:$84 sps:$4 sm:$0xff]   ;;  %v12486_v12 = vld [vmem:[%s13317_s22 + $0xc18] ss:$84 sps:$4 sm:$0xff]  }
 0x45a   : > { %5733 = vmatpush1.bf16.msra.mxu0 %v12411_v13  ;;  %v12491_v13 = vld [vmem:[%s13317_s22 + $0xcbc] ss:$84 sps:$4 sm:$0xff]  }
 0x45b   : > { %5815 = vmatpush1.bf16.msra.mxu1 %v12414_v15  ;;  %5734 = vmatprep.subr.bf16.mxu0 %v12419_v16  ;;  %v12494_v15 = vld [vmem:[%s13317_s22 + $0xcc4] ss:$84 sps:$4 sm:$0xff]  }
 0x45c   : > { %5816 = vmatprep.subr.bf16.mxu1 %v12422_v17  ;;  %v12489_v16 = vld [vmem:[%s13317_s22 + $0xcb8] ss:$84 sps:$4 sm:$0xff]   ;;  %v12492_v17 = vld [vmem:[%s13317_s22 + $0xcc0] ss:$84 sps:$4 sm:$0xff]  }
 0x45e   : > { %5735 = vmatpush1.bf16.msra.mxu0 %v12417_v18  ;;  %v12497_v18 = vld [vmem:[%s13317_s22 + $0xd64] ss:$84 sps:$4 sm:$0xff]  }
 0x45f   : > { %5817 = vmatpush1.bf16.msra.mxu1 %v12420_v20  ;;  %5736 = vmatprep.subr.bf16.mxu0 %v12425_v21  ;;  %v12500_v20 = vld [vmem:[%s13317_s22 + $0xd6c] ss:$84 sps:$4 sm:$0xff]  }
 0x460   : > { %5818 = vmatprep.subr.bf16.mxu1 %v12428_v24  ;;  %v12495_v21 = vld [vmem:[%s13317_s22 + $0xd60] ss:$84 sps:$4 sm:$0xff]   ;;  %v12498_v24 = vld [vmem:[%s13317_s22 + $0xd68] ss:$84 sps:$4 sm:$0xff]  }
 0x462   : > { %5737 = vmatpush1.bf16.msra.mxu0 %v12423_v27  ;;  %v12503_v27 = vld [vmem:[%s13317_s22 + $0xe0c] ss:$84 sps:$4 sm:$0xff]  }
 0x463   : > { %5819 = vmatpush1.bf16.msra.mxu1 %v12426_v28  ;;  %5738 = vmatprep.subr.bf16.mxu0 %v12431_v29  ;;  %v12506_v28 = vld [vmem:[%s13317_s22 + $0xe14] ss:$84 sps:$4 sm:$0xff]  }
 0x464   : > { %5820 = vmatprep.subr.bf16.mxu1 %v12434_v30  ;;  %v12501_v29 = vld [vmem:[%s13317_s22 + $0xe08] ss:$84 sps:$4 sm:$0xff]   ;;  %v12504_v30 = vld [vmem:[%s13317_s22 + $0xe10] ss:$84 sps:$4 sm:$0xff]  }
 0x466   : > { %5739 = vmatpush1.bf16.msra.mxu0 %v12429_v32  ;;  %v12509_v32 = vld [vmem:[%s13317_s22 + $0xeb4] ss:$84 sps:$4 sm:$0xff]  }
 0x467   : > { %5821 = vmatpush1.bf16.msra.mxu1 %v12432_v33  ;;  %5740 = vmatprep.subr.bf16.mxu0 %v12437_v35  ;;  %v12512_v35 = vld [vmem:[%s13317_s22 + $0xebc] ss:$84 sps:$4 sm:$0xff]  }
 0x468   : > { %5822 = vmatprep.subr.bf16.mxu1 %v12440_v36 }
 0x46a   : > { %5741 = vmatpush1.bf16.msra.mxu0 %v12435_v38 }
 0x46b   : > { %5823 = vmatpush1.bf16.msra.mxu1 %v12438_v39  ;;  %5742 = vmatprep.subr.bf16.mxu0 %v12443_v41 }
 0x46c   : > { %5824 = vmatprep.subr.bf16.mxu1 %v12446_v42  ;;  %v12507_v42 = vld [vmem:[%s13317_s22 + $0xeb0] ss:$84 sps:$4 sm:$0xff]  }
 0x46e   : > { %5743 = vmatpush1.bf16.msra.mxu0 %v12441_v43 }
 0x46f   : > { %5825 = vmatpush1.bf16.msra.mxu1 %v12444_v45  ;;  %5744 = vmatprep.subr.bf16.mxu0 %v12449_v46  ;;  %v12510_v46 = vld [vmem:[%s13317_s22 + $0xeb8] ss:$84 sps:$4 sm:$0xff]  }
 0x470   : > { %5826 = vmatprep.subr.bf16.mxu1 %v12452_v47  ;;  %v12515_v47 = vld [vmem:[%s13317_s22 + $0xf5c] ss:$84 sps:$4 sm:$0xff]  }
 0x472   : > { %5745 = vmatpush1.bf16.msra.mxu0 %v12447_v48 }
 0x473   : > { %5827 = vmatpush1.bf16.msra.mxu1 %v12450_v31  ;;  %5746 = vmatprep.subr.bf16.mxu0 %v12455_v49  ;;  %v12518_v31 = vld [vmem:[%s13317_s22 + $0xf64] ss:$84 sps:$4 sm:$0xff]  }
 0x474   : > { %5828 = vmatprep.subr.bf16.mxu1 %v12458_v50  ;;  %v12513_v49 = vld [vmem:[%s13317_s22 + $0xf58] ss:$84 sps:$4 sm:$0xff]   ;;  %v12516_v50 = vld [vmem:[%s13317_s22 + $0xf60] ss:$84 sps:$4 sm:$0xff]  }
 0x476   : > { %5747 = vmatpush1.bf16.msra.mxu0 %v12453_v51  ;;  %v12521_v51 = vld [vmem:[%s13317_s22 + $0x1004] ss:$84 sps:$4 sm:$0xff]  }
 0x477   : > { %5829 = vmatpush1.bf16.msra.mxu1 %v12456_v52  ;;  %5748 = vmatprep.subr.bf16.mxu0 %v12461_v53  ;;  %v12524_v52 = vld [vmem:[%s13317_s22 + $0x100c] ss:$84 sps:$4 sm:$0xff]  }
 0x478   : > { %5830 = vmatprep.subr.bf16.mxu1 %v12464_v55  ;;  %v12519_v53 = vld [vmem:[%s13317_s22 + $0x1000] ss:$84 sps:$4 sm:$0xff]   ;;  %v12522_v55 = vld [vmem:[%s13317_s22 + $0x1008] ss:$84 sps:$4 sm:$0xff]  }
 0x47a   : > { %5749 = vmatpush1.bf16.msra.mxu0 %v12459_v59  ;;  %v12527_v59 = vld [vmem:[%s13317_s22 + $0x10ac] ss:$84 sps:$4 sm:$0xff]  }
 0x47b   : > { %5831 = vmatpush1.bf16.msra.mxu1 %v12462_v60  ;;  %5750 = vmatprep.subr.bf16.mxu0 %v12467_v61  ;;  %v12530_v60 = vld [vmem:[%s13317_s22 + $0x10b4] ss:$84 sps:$4 sm:$0xff]  }
 0x47c   : > { %5832 = vmatprep.subr.bf16.mxu1 %v12470_v62  ;;  %v12525_v61 = vld [vmem:[%s13317_s22 + $0x10a8] ss:$84 sps:$4 sm:$0xff]   ;;  %v12528_v62 = vld [vmem:[%s13317_s22 + $0x10b0] ss:$84 sps:$4 sm:$0xff]  }
 0x47e   : > { %5751 = vmatpush1.bf16.msra.mxu0 %v12465_v63  ;;  %v12533_v63 = vld [vmem:[%s13317_s22 + $0x1154] ss:$84 sps:$4 sm:$0xff]  }
 0x47f   : > { %5833 = vmatpush1.bf16.msra.mxu1 %v12468_v0  ;;  %5761 = vmatprep.subr.bf16.mxu0 %v12473_v1  ;;  %v12536_v0 = vld [vmem:[%s13317_s22 + $0x115c] ss:$84 sps:$4 sm:$0xff]  }
 0x480   : > { %5843 = vmatprep.subr.bf16.mxu1 %v12476_v2  ;;  %v12531_v1 = vld [vmem:[%s13317_s22 + $0x1150] ss:$84 sps:$4 sm:$0xff]   ;;  %v12534_v2 = vld [vmem:[%s13317_s22 + $0x1158] ss:$84 sps:$4 sm:$0xff]  }
 0x481   : > { %5753 = vmatmul.mubr.bf16.vlgmr.msra.gmra.mrb[20].mxu0 %v13438_v37 }
 0x482   : > { %5835 = vmatmul.mubr.bf16.vlgmr.msra.gmra.mrb[20].mxu1 %v13438_v37  ;;  %5762 = vmatpush1.bf16.msra.mxu0 %v12471_v3  ;;  %v12539_v3 = vld [vmem:[%s13317_s22 + $0x11fc] ss:$84 sps:$4 sm:$0xff]  }
 0x483   : > { %5793 = vmatprep.mubr.bf16.mxu0 %v13444_v40  ;;  %5844 = vmatpush1.bf16.msra.mxu1 %v12474_v4  ;;  %v12542_v4 = vld [vmem:[%s13317_s22 + $0x1204] ss:$84 sps:$4 sm:$0xff]  }
 0x484   : > { %5875 = vmatprep.mubr.bf16.mxu1 %v13444_v40  ;;  %5763 = vmatprep.subr.bf16.mxu0 %v12479_v5  ;;  %v12537_v5 = vld [vmem:[%s13317_s22 + $0x11f8] ss:$84 sps:$4 sm:$0xff]  }
 0x485   : > { %5845 = vmatprep.subr.bf16.mxu1 %v12482_v6  ;;  %v12540_v6 = vld [vmem:[%s13317_s22 + $0x1200] ss:$84 sps:$4 sm:$0xff]  }
 0x486   : > { %5764 = vmatpush1.bf16.msra.mxu0 %v12477_v7  ;;  %v12545_v7 = vld [vmem:[%s13317_s22 + $0x12a4] ss:$84 sps:$4 sm:$0xff]  }
 0x487   : > { %5846 = vmatpush1.bf16.msra.mxu1 %v12480_v8  ;;  %5765 = vmatprep.subr.bf16.mxu0 %v12485_v9  ;;  %v12548_v8 = vld [vmem:[%s13317_s22 + $0x12ac] ss:$84 sps:$4 sm:$0xff]  }
 0x488   : > { %5847 = vmatprep.subr.bf16.mxu1 %v12488_v10  ;;  %v12543_v9 = vld [vmem:[%s13317_s22 + $0x12a0] ss:$84 sps:$4 sm:$0xff]   ;;  %v12546_v10 = vld [vmem:[%s13317_s22 + $0x12a8] ss:$84 sps:$4 sm:$0xff]  }
 0x48a   : > { %5766 = vmatpush1.bf16.msra.mxu0 %v12483_v11  ;;  %v12551_v11 = vld [vmem:[%s13317_s22 + $0x134c] ss:$84 sps:$4 sm:$0xff]  }
 0x48b   : > { %5848 = vmatpush1.bf16.msra.mxu1 %v12486_v12  ;;  %5767 = vmatprep.subr.bf16.mxu0 %v12491_v13  ;;  %v12554_v12 = vld [vmem:[%s13317_s22 + $0x1354] ss:$84 sps:$4 sm:$0xff]  }
 0x48c   : > { %5849 = vmatprep.subr.bf16.mxu1 %v12494_v15  ;;  %v12549_v13 = vld [vmem:[%s13317_s22 + $0x1348] ss:$84 sps:$4 sm:$0xff]   ;;  %v12552_v15 = vld [vmem:[%s13317_s22 + $0x1350] ss:$84 sps:$4 sm:$0xff]  }
 0x48e   : > { %5768 = vmatpush1.bf16.msra.mxu0 %v12489_v16  ;;  %v12557_v16 = vld [vmem:[%s13317_s22 + $0x13f4] ss:$84 sps:$4 sm:$0xff]  }
 0x48f   : > { %5850 = vmatpush1.bf16.msra.mxu1 %v12492_v17  ;;  %5769 = vmatprep.subr.bf16.mxu0 %v12497_v18  ;;  %v12560_v17 = vld [vmem:[%s13317_s22 + $0x13fc] ss:$84 sps:$4 sm:$0xff]  }
 0x490   : > { %5851 = vmatprep.subr.bf16.mxu1 %v12500_v20  ;;  %v12555_v18 = vld [vmem:[%s13317_s22 + $0x13f0] ss:$84 sps:$4 sm:$0xff]   ;;  %v12558_v20 = vld [vmem:[%s13317_s22 + $0x13f8] ss:$84 sps:$4 sm:$0xff]  }
 0x492   : > { %5770 = vmatpush1.bf16.msra.mxu0 %v12495_v21  ;;  %v12563_v21 = vld [vmem:[%s13317_s22 + $0x149c] ss:$84 sps:$4 sm:$0xff]  }
 0x493   : > { %5852 = vmatpush1.bf16.msra.mxu1 %v12498_v24  ;;  %5771 = vmatprep.subr.bf16.mxu0 %v12503_v27  ;;  %v12566_v24 = vld [vmem:[%s13317_s22 + $0x14a4] ss:$84 sps:$4 sm:$0xff]  }
 0x494   : > { %v14033_v33 = vpop.f32.mrb[12].mxu0  ;;  %5853 = vmatprep.subr.bf16.mxu1 %v12506_v28  ;;  %v12561_v27 = vld [vmem:[%s13317_s22 + $0x1498] ss:$84 sps:$4 sm:$0xff]   ;;  %v12564_v28 = vld [vmem:[%s13317_s22 + $0x14a0] ss:$84 sps:$4 sm:$0xff]  }
 0x495   : > { %v14036_v36 = vpop.f32.mrb[12].mxu1  ;;  %v14038_v38 = vpop.f32.mrb[13].mxu0 }
 0x496   : > { %v14040_v39 = vpop.f32.mrb[13].mxu1  ;;  %v5471_v41 = vpop.f32.mrb[14].mxu0  ;;  %5772 = vmatpush1.bf16.msra.mxu0 %v12501_v29  ;;  %v12567_v29 = vld [vmem:[%s13317_s22 + $0x590] ss:$84 sps:$4 sm:$0xff]  }
 0x497   : > { %v5553_v43 = vpop.f32.mrb[14].mxu1  ;;  %5854 = vmatpush1.bf16.msra.mxu1 %v12504_v30  ;;  %v5472_v45 = vpop.f32.mrb[15].mxu0  ;;  %5773 = vmatprep.subr.bf16.mxu0 %v12509_v32  ;;  %v12568_v30 = vld [vmem:[%s13317_s22 + $0x1010] ss:$84 sps:$4 sm:$0xff]   ;;  %v12571_v41 = vld [vmem:[%s13317_s22 + $0x638] ss:$84 sps:$4 sm:$0xff]  }
 0x498   : > { %v5554_v48 = vpop.f32.mrb[15].mxu1  ;;  %5855 = vmatprep.subr.bf16.mxu1 %v12512_v35  ;;  %v12569_v32 = vld [vmem:[%s13317_s22 + $0x50] ss:$84 sps:$4 sm:$0xff]   ;;  %v12573_v43 = vld [vmem:[%s13317_s22 + $0xf8] ss:$84 sps:$4 sm:$0xff]  }
 0x499   : > { %v12570_v35 = vld [vmem:[%s13317_s22 + $0xad0] ss:$84 sps:$4 sm:$0xff]   ;;  %v12574_v45 = vld [vmem:[%s13317_s22 + $0xb78] ss:$84 sps:$4 sm:$0xff]   ;;  %v12577_v48 = vld [vmem:[%s13317_s22 + $0x1a0] ss:$84 sps:$4 sm:$0xff]  }
 0x49a   : > { %5774 = vmatpush1.bf16.msra.mxu0 %v12507_v42  ;;  %v12572_v42 = vld [vmem:[%s13317_s22 + $0x10b8] ss:$84 sps:$4 sm:$0xff]  }
 0x49b   : > { %5856 = vmatpush1.bf16.msra.mxu1 %v12510_v46  ;;  %5775 = vmatprep.subr.bf16.mxu0 %v12515_v47  ;;  %v12575_v46 = vld [vmem:[%s13317_s22 + $0x6e0] ss:$84 sps:$4 sm:$0xff]  }
 0x49c   : > { %5857 = vmatprep.subr.bf16.mxu1 %v12518_v31  ;;  %v12576_v47 = vld [vmem:[%s13317_s22 + $0x1160] ss:$84 sps:$4 sm:$0xff]   ;;  %v12579_v31 = vld [vmem:[%s13317_s22 + $0x788] ss:$84 sps:$4 sm:$0xff]  }
 0x49e   : > { %5776 = vmatpush1.bf16.msra.mxu0 %v12513_v49  ;;  %v12580_v49 = vld [vmem:[%s13317_s22 + $0x1208] ss:$84 sps:$4 sm:$0xff]  }
 0x49f   : > { %5858 = vmatpush1.bf16.msra.mxu1 %v12516_v50  ;;  %5777 = vmatprep.subr.bf16.mxu0 %v12521_v51  ;;  %v12582_v50 = vld [vmem:[%s13317_s22 + $0xcc8] ss:$84 sps:$4 sm:$0xff]   ;;  %v12583_v51 = vld [vmem:[%s13317_s22 + $0x830] ss:$84 sps:$4 sm:$0xff]  }
 0x4a0   : > { %5859 = vmatprep.subr.bf16.mxu1 %v12524_v52  ;;  %v12584_v52 = vld [vmem:[%s13317_s22 + $0x12b0] ss:$84 sps:$4 sm:$0xff]  }
 0x4a2   : > { %5778 = vmatpush1.bf16.msra.mxu0 %v12519_v53  ;;  %v12585_v53 = vld [vmem:[%s13317_s22 + $0x2f0] ss:$84 sps:$4 sm:$0xff]  }
 0x4a3   : > { %5860 = vmatpush1.bf16.msra.mxu1 %v12522_v55  ;;  %5779 = vmatprep.subr.bf16.mxu0 %v12527_v59  ;;  %v12586_v55 = vld [vmem:[%s13317_s22 + $0xd70] ss:$84 sps:$4 sm:$0xff]   ;;  %v12587_v59 = vld [vmem:[%s13317_s22 + $0x8d8] ss:$84 sps:$4 sm:$0xff]  }
 0x4a4   : > { %5861 = vmatprep.subr.bf16.mxu1 %v12530_v60  ;;  %v12588_v60 = vld [vmem:[%s13317_s22 + $0x1358] ss:$84 sps:$4 sm:$0xff]  }
 0x4a6   : > { %5780 = vmatpush1.bf16.msra.mxu0 %v12525_v61  ;;  %v12589_v61 = vld [vmem:[%s13317_s22 + $0x398] ss:$84 sps:$4 sm:$0xff]  }
 0x4a7   : > { %5862 = vmatpush1.bf16.msra.mxu1 %v12528_v62  ;;  %5781 = vmatprep.subr.bf16.mxu0 %v12533_v63  ;;  %v12590_v62 = vld [vmem:[%s13317_s22 + $0xe18] ss:$84 sps:$4 sm:$0xff]   ;;  %v12591_v63 = vld [vmem:[%s13317_s22 + $0x980] ss:$84 sps:$4 sm:$0xff]  }
 0x4a8   : > { %5863 = vmatprep.subr.bf16.mxu1 %v12536_v0  ;;  %v12592_v0 = vld [vmem:[%s13317_s22 + $0x1400] ss:$84 sps:$4 sm:$0xff]  }
 0x4aa   : > { %5782 = vmatpush1.bf16.msra.mxu0 %v12531_v1  ;;  %v14115_v1 = vsub.s32 1, %v13365_v19 }
 0x4ab   : > { %5864 = vmatpush1.bf16.msra.mxu1 %v12534_v2  ;;  %5783 = vmatprep.subr.bf16.mxu0 %v12539_v3  ;;  %v14123_v2 = vld [vmem:[%s13323_s15] sm:$0xff] }
 0x4ac   : > { %5865 = vmatprep.subr.bf16.mxu1 %v12542_v4  ;;  %v12593_v3 = vld [vmem:[%s13317_s22 + $0x440] ss:$84 sps:$4 sm:$0xff]  }
 0x4ad   : > { %v12594_v4 = vld [vmem:[%s13317_s22 + $0xec0] ss:$84 sps:$4 sm:$0xff]  }
 0x4ae   : > { %5784 = vmatpush1.bf16.msra.mxu0 %v12537_v5  ;;  %v12595_v5 = vld [vmem:[%s13317_s22 + $0xa28] ss:$84 sps:$4 sm:$0xff]  }
 0x4af   : > { %5866 = vmatpush1.bf16.msra.mxu1 %v12540_v6  ;;  %5785 = vmatprep.subr.bf16.mxu0 %v12545_v7  ;;  %v12596_v6 = vld [vmem:[%s13317_s22 + $0x14a8] ss:$84 sps:$4 sm:$0xff]   ;;  %v6001_v7 = vld [vmem:[%s14120_s26 + $0x80] sm:$0xff] }
 0x4b0   : > { %5867 = vmatprep.subr.bf16.mxu1 %v12548_v8  ;;  %v6002_v8 = vld [vmem:[%s14120_s26 + $0x88] sm:$0xff] }
 0x4b2   : > { %5786 = vmatpush1.bf16.msra.mxu0 %v12543_v9  ;;  %v1574_v9 = vrot.slane %v14123_v2, %v14115_v1 }
 0x4b3   : > { %5868 = vmatpush1.bf16.msra.mxu1 %v12546_v10  ;;  %5787 = vmatprep.subr.bf16.mxu0 %v12551_v11  ;;  %v12597_v10 = vld [vmem:[%s13317_s22 + $0x4e8] ss:$84 sps:$4 sm:$0xff]  }
 0x4b4   : > { %5869 = vmatprep.subr.bf16.mxu1 %v12554_v12  ;;  %v12598_v11 = vld [vmem:[%s13317_s22 + $0xf68] ss:$84 sps:$4 sm:$0xff]   ;;  %v10919_v12 = vpack.c.bf16 %v6002_v8, %v6001_v7  ;;  %v6011_v7 = vld [vmem:[%s14120_s26 + $0xd0] sm:$0xff] }
 0x4b5   : > { %v6012_v8 = vld [vmem:[%s14120_s26 + $0xd8] sm:$0xff] }
 0x4b6   : > { %5788 = vmatpush1.bf16.msra.mxu0 %v12549_v13  ;;  %v5985_v13 = vld [vmem:[%s14120_s26] sm:$0xff] }
 0x4b7   : > { %5870 = vmatpush1.bf16.msra.mxu1 %v12552_v15  ;;  %5789 = vmatprep.subr.bf16.mxu0 %v12557_v16  ;;  %v5986_v15 = vld [vmem:[%s14120_s26 + $0x8] sm:$0xff]  ;;  %v6017_v16 = vld [vmem:[%s14120_s26 + $0x100] sm:$0xff] }
 0x4b8   : > { %5871 = vmatprep.subr.bf16.mxu1 %v12560_v17  ;;  %v6018_v17 = vld [vmem:[%s14120_s26 + $0x108] sm:$0xff] }
 0x4ba   : > { %5790 = vmatpush1.bf16.msra.mxu0 %v12555_v18  ;;  %v11438_v18 = vadd.f32 %v13750_v25, %v1574_v9  ;;  %v6005_v25 = vld [vmem:[%s14120_s26 + $0xa0] sm:$0xff] }
 0x4bb   : > { %5872 = vmatpush1.bf16.msra.mxu1 %v12558_v20  ;;  %5791 = vmatprep.subr.bf16.mxu0 %v12563_v21  ;;  %v6003_v20 = vld [vmem:[%s14120_s26 + $0x90] sm:$0xff]  ;;  %v6004_v21 = vld [vmem:[%s14120_s26 + $0x98] sm:$0xff] }
 0x4bc   : > { %5873 = vmatprep.subr.bf16.mxu1 %v12566_v24  ;;  %v10921_v24 = vpack.c.bf16 %v5986_v15, %v5985_v13  ;;  %v5996_v13 = vld [vmem:[%s14120_s26 + $0x58] sm:$0xff]  ;;  %v6027_v15 = vld [vmem:[%s14120_s26 + $0x150] sm:$0xff] }
 0x4be   : > { %5792 = vmatpush1.bf16.msra.mxu0 %v12561_v27  ;;  %v10952_v27 = vpack.c.bf16 %v6018_v17, %v6017_v16  ;;  %v6028_v16 = vld [vmem:[%s14120_s26 + $0x158] sm:$0xff]  ;;  %v6013_v17 = vld [vmem:[%s14120_s26 + $0xe0] sm:$0xff] }
 0x4bf   : > { %5874 = vmatpush1.bf16.msra.mxu1 %v12564_v28  ;;  %9958 = vmatprep.subr.bf16.mxu0 %v12567_v29  ;;  %v5987_v28 = vld [vmem:[%s14120_s26 + $0x10] sm:$0xff]  ;;  %v5988_v29 = vld [vmem:[%s14120_s26 + $0x18] sm:$0xff] }
 0x4c0   : > { %9980 = vmatprep.subr.bf16.mxu1 %v12568_v30  ;;  %v6019_v30 = vld [vmem:[%s14120_s26 + $0x110] sm:$0xff] }
 0x4c1   : > { %5794 = vmatmul.mubr.bf16.vlgmr.msra.gmra.mrb[20].mxu0 %v13513_v44 }
 0x4c2   : > { %5876 = vmatmul.mubr.bf16.vlgmr.msra.gmra.mrb[20].mxu1 %v13513_v44  ;;  %9959 = vmatpush3.bf16.msra.mxu0 %v12569_v32  ;;  %v12906_v32 = vmov 0.0|0.0  }
 0x4c3   : > { %5916 = vmatprep.mubr.bf16.mxu0 %v13434_v34  ;;  %9981 = vmatpush3.bf16.msra.mxu1 %v12570_v35  ;;  %v12578_v34 = vld [vmem:[%s13317_s22 + $0xc20] ss:$84 sps:$4 sm:$0xff]   ;;  %v10923_v35 = vpack.c.bf16 %v6004_v21, %v6003_v20  ;;  %v14182_v21 = vsub.s32 0, %v13365_v19 }
 0x4c4   : > { %5956 = vmatprep.mubr.bf16.mxu1 %v13444_v40  ;;  %9960 = vmatprep.subr.bf16.mxu0 %v12571_v41  ;;  %v12581_v40 = vld [vmem:[%s13317_s22 + $0x248] ss:$84 sps:$4 sm:$0xff]  }
 0x4c5   : > { %9982 = vmatprep.subr.bf16.mxu1 %v12572_v42  ;;  %v6020_v41 = vld [vmem:[%s14120_s26 + $0x118] sm:$0xff]  ;;  %v6006_v42 = vld [vmem:[%s14120_s26 + $0xa8] sm:$0xff] }
 0x4c6   : > { %9961 = vmatpush3.bf16.msra.mxu0 %v12573_v43  ;;  %v5965_v43 = vmax.f32 %v11438_v18, 0.0  ;;  %v6014_v18 = vld [vmem:[%s14120_s26 + $0xe8] sm:$0xff] }
 0x4c7   : > { %9983 = vmatpush3.bf16.msra.mxu1 %v12574_v45  ;;  %9962 = vmatprep.subr.bf16.mxu0 %v12575_v46  ;;  %v10925_v45 = vpack.c.bf16 %v5988_v29, %v5987_v28  ;;  %v10955_v46 = vpack.c.bf16 %v6020_v41, %v6019_v30  ;;  %v5997_v28 = vld [vmem:[%s14120_s26 + $0x60] sm:$0xff]  ;;  %v5998_v29 = vld [vmem:[%s14120_s26 + $0x68] sm:$0xff] }
 0x4c8   : > { %9984 = vmatprep.subr.bf16.mxu1 %v12576_v47  ;;  %v10927_v47 = vpack.c.bf16 %v6006_v42, %v6005_v25  ;;  %v6029_v30 = vld [vmem:[%s14120_s26 + $0x160] sm:$0xff]  ;;  %v6030_v41 = vld [vmem:[%s14120_s26 + $0x168] sm:$0xff]  ;;  %v6015_v25 = vld [vmem:[%s14120_s26 + $0xf0] sm:$0xff] }
 0x4c9   : > { %v6016_v42 = vld [vmem:[%s14120_s26 + $0xf8] sm:$0xff] }
 0x4ca   : > { %9963 = vmatpush3.bf16.msra.mxu0 %v12577_v48  ;;  %v5989_v48 = vld [vmem:[%s14120_s26 + $0x20] sm:$0xff] }
 0x4cb   : > { %9985 = vmatpush3.bf16.msra.mxu1 %v12578_v34  ;;  %9964 = vmatprep.subr.bf16.mxu0 %v12579_v31  ;;  %v5990_v34 = vld [vmem:[%s14120_s26 + $0x28] sm:$0xff]  ;;  %v6021_v31 = vld [vmem:[%s14120_s26 + $0x120] sm:$0xff] }
 0x4cc   : > { %9986 = vmatprep.subr.bf16.mxu1 %v12580_v49  ;;  %v6022_v49 = vld [vmem:[%s14120_s26 + $0x128] sm:$0xff] }
 0x4ce   : > { %9965 = vmatpush3.bf16.msra.mxu0 %v12581_v40  ;;  %v10929_v40 = vpack.c.bf16 %v5990_v34, %v5989_v48  ;;  %v5999_v48 = vld [vmem:[%s14120_s26 + $0x70] sm:$0xff]  ;;  %v6000_v34 = vld [vmem:[%s14120_s26 + $0x78] sm:$0xff] }
 0x4cf   : > { %9987 = vmatpush3.bf16.msra.mxu1 %v12582_v50  ;;  %9966 = vmatprep.subr.bf16.mxu0 %v12583_v51  ;;  %v10958_v50 = vpack.c.bf16 %v6022_v49, %v6021_v31  ;;  %v6031_v49 = vld [vmem:[%s14120_s26 + $0x170] sm:$0xff] }
 0x4d0   : > { %9988 = vmatprep.subr.bf16.mxu1 %v12584_v52  ;;  %v5991_v52 = vld [vmem:[%s14120_s26 + $0x30] sm:$0xff] }
 0x4d2   : > { %9967 = vmatpush3.bf16.msra.mxu0 %v12585_v53  ;;  %v5992_v53 = vld [vmem:[%s14120_s26 + $0x38] sm:$0xff] }
 0x4d3   : > { %9989 = vmatpush3.bf16.msra.mxu1 %v12586_v55  ;;  %9968 = vmatprep.subr.bf16.mxu0 %v12587_v59  ;;  %v6023_v55 = vld [vmem:[%s14120_s26 + $0x130] sm:$0xff]  ;;  %v6024_v59 = vld [vmem:[%s14120_s26 + $0x138] sm:$0xff] }
 0x4d4   : > { %9990 = vmatprep.subr.bf16.mxu1 %v12588_v60  ;;  %v6009_v60 = vld [vmem:[%s14120_s26 + $0xc0] sm:$0xff] }
 0x4d6   : > { %9969 = vmatpush3.bf16.msra.mxu0 %v12589_v61  ;;  %v6010_v61 = vld [vmem:[%s14120_s26 + $0xc8] sm:$0xff] }
 0x4d7   : > { %9991 = vmatpush3.bf16.msra.mxu1 %v12590_v62  ;;  %9970 = vmatprep.subr.bf16.mxu0 %v12591_v63  ;;  %v10933_v62 = vpack.c.bf16 %v5992_v53, %v5991_v52  ;;  %v10961_v63 = vpack.c.bf16 %v6024_v59, %v6023_v55 }
 0x4d8   : > { %9992 = vmatprep.subr.bf16.mxu1 %v12592_v0  ;;  %v10935_v0 = vpack.c.bf16 %v6010_v61, %v6009_v60 }
 0x4da   : > { %9971 = vmatpush3.bf16.msra.mxu0 %v12593_v3  ;;  %v5993_v3 = vld [vmem:[%s14120_s26 + $0x40] sm:$0xff] }
 0x4db   : > { %9993 = vmatpush3.bf16.msra.mxu1 %v12594_v4  ;;  %9972 = vmatprep.subr.bf16.mxu0 %v12595_v5  ;;  %v5994_v4 = vld [vmem:[%s14120_s26 + $0x48] sm:$0xff]  ;;  %v6025_v5 = vld [vmem:[%s14120_s26 + $0x140] sm:$0xff] }
 0x4dc   : > { %9994 = vmatprep.subr.bf16.mxu1 %v12596_v6  ;;  %v6026_v6 = vld [vmem:[%s14120_s26 + $0x148] sm:$0xff]  ;;  %v10937_v9 = vpack.c.bf16 %v5994_v4, %v5993_v3  ;;  %v6182_v3 = vld [vmem:[%s13331_s12 + $0x8] sm:$0xff] }
 0x4de   : > { %9973 = vmatpush3.bf16.msra.mxu0 %v12597_v10  ;;  %v10964_v10 = vpack.c.bf16 %v6026_v6, %v6025_v5  ;;  %v6183_v5 = vld [vmem:[%s13331_s12 + $0x10] sm:$0xff]  ;;  %v6184_v6 = vld [vmem:[%s13331_s12 + $0x18] sm:$0xff] }
 0x4df   : > { %9995 = vmatpush3.bf16.msra.mxu1 %v12598_v11  ;;  %10920 = vmatprep.subr.bf16.mxu0 %v10919_v12  ;;  %v10939_v11 = vpack.c.bf16 %v6012_v8, %v6011_v7  ;;  %v5995_v12 = vld [vmem:[%s14120_s26 + $0x50] sm:$0xff]  ;;  %v10979_v7 = vpack.c.bf16 %v6184_v6, %v6183_v5  ;;  %v6185_v8 = vld [vmem:[%s13331_s12 + $0x20] sm:$0xff] }
 0x4e0   : > { %10951 = vmatprep.subr.bf16.mxu1 %v12906_v32  ;;  %v10941_v20 = vpack.c.bf16 %v5996_v13, %v5995_v12  ;;  %v9554_v12 = vld [vmem:[%s14120_s26 + $0x208] sm:$0xff] }
 0x4e1   : > { %5917 = vmatmul.mubr.bf16.vlgmr.msra.gmra.mrb[24].mxu0 %v13438_v37  ;;  %v6007_v37 = vld [vmem:[%s14120_s26 + $0xb0] sm:$0xff] }
 0x4e2   : > { %5957 = vmatmul.mubr.bf16.vlgmr.msra.gmra.mrb[24].mxu1 %v13513_v44  ;;  %10922 = vmatpush3.bf16.msra.mxu0 %v10921_v24  ;;  %v6008_v44 = vld [vmem:[%s14120_s26 + $0xb8] sm:$0xff]  ;;  %v10967_v24 = vpack.c.bf16 %v6028_v16, %v6027_v15 }
 0x4e3   : > { %6104 = vmatprep.mubr.f32.mxu0 %v5965_v43  ;;  %10953 = vmatpush3.bf16.msra.mxu1 %v10952_v27  ;;  %v10931_v51 = vpack.c.bf16 %v6008_v44, %v6007_v37  ;;  %v10943_v27 = vpack.c.bf16 %v6014_v18, %v6013_v17  ;;  %v10945_v43 = vpack.c.bf16 %v5998_v29, %v5997_v28  ;;  %v6032_v37 = vld [vmem:[%s14120_s26 + $0x178] sm:$0xff] }
 0x4e4   : > { %10924 = vmatprep.subr.bf16.mxu0 %v10923_v35  ;;  %10954 = vmatprep.subr.bf16.mxu1 %v12906_v32  ;;  %v14188_v35 = vsub.s32 2, %v13365_v19  ;;  %v10949_v44 = vpack.c.bf16 %v6000_v34, %v5999_v48  ;;  %v6269_v15 = vld [vmem:[%s13339_s29] sm:$0xff]  ;;  %v6270_v16 = vld [vmem:[%s13339_s29 + $0x8] sm:$0xff]  ;;  %v6271_v17 = vld [vmem:[%s13339_s29 + $0x10] sm:$0xff] }
 0x4e5   : > { %10496 = vmatprep.mubr.msk.f32.mxu1 %vm12907_vm3, %v12905_v14  ;;  %v10985_v18 = vpack.c.bf16 %v6270_v16, %v6269_v15 }
 0x4e6   : > { %10926 = vmatpush3.bf16.msra.mxu0 %v10925_v45  ;;  %v1570_v45 = vrot.slane %v14123_v2, %v14182_v21  ;;  %v1578_v31 = vrot.slane %v14123_v2, %v14188_v35 }
 0x4e7   : > { %10956 = vmatpush3.bf16.msra.mxu1 %v10955_v46  ;;  %10928 = vmatprep.subr.bf16.mxu0 %v10927_v47  ;;  %v10970_v46 = vpack.c.bf16 %v6030_v41, %v6029_v30  ;;  %v10947_v47 = vpack.c.bf16 %v6016_v42, %v6015_v25 }
 0x4e8   : > { %10957 = vmatprep.subr.bf16.mxu1 %v12906_v32 }
 0x4ea   : > { %10930 = vmatpush3.bf16.msra.mxu0 %v10929_v40  ;;  %v11437_v40 = vadd.f32 %v13745_v22, %v1570_v45  ;;  %v14245_v45 = vsub.s32 4, %v13365_v19 }
 0x4eb   : > { %10959 = vmatpush3.bf16.msra.mxu1 %v10958_v50  ;;  %10932 = vmatprep.subr.bf16.mxu0 %v10931_v51  ;;  %v10973_v50 = vpack.c.bf16 %v6032_v37, %v6031_v49  ;;  %v11439_v51 = vadd.f32 %v13747_v23, %v1578_v31 }
 0x4ec   : > { %10960 = vmatprep.subr.bf16.mxu1 %v12906_v32  ;;  %v5964_v52 = vmax.f32 %v11437_v40, 0.0 }
 0x4ed   : > { %v5966_v53 = vmax.f32 %v11439_v51, 0.0 }
 0x4ee   : > { %10934 = vmatpush3.bf16.msra.mxu0 %v10933_v62 }
 0x4ef   : > { %10962 = vmatpush3.bf16.msra.mxu1 %v10961_v63  ;;  %10936 = vmatprep.subr.bf16.mxu0 %v10935_v0  ;;  %v6181_v0 = vld [vmem:[%s13331_s12] sm:$0xff] }
 0x4f0   : > { %10963 = vmatprep.subr.bf16.mxu1 %v12906_v32  ;;  %v10976_v4 = vpack.c.bf16 %v6182_v3, %v6181_v0  ;;  %v9532_v0 = vld [vmem:[%s13325_s21] ss:$0 sm:$0xff] }
 0x4f2   : > { %10938 = vmatpush3.bf16.msra.mxu0 %v10937_v9  ;;  %v6186_v9 = vld [vmem:[%s13331_s12 + $0x28] sm:$0xff] }
 0x4f3   : > { %10965 = vmatpush3.bf16.msra.mxu1 %v10964_v10  ;;  %10940 = vmatprep.subr.bf16.mxu0 %v10939_v11  ;;  %v10982_v10 = vpack.c.bf16 %v6186_v9, %v6185_v8  ;;  %v9553_v11 = vld [vmem:[%s14120_s26 + $0x200] sm:$0xff]  ;;  %v9538_v8 = vld [vmem:[%s14120_s26 + $0x188] sm:$0xff] }
 0x4f4   : > { %10966 = vmatprep.subr.bf16.mxu1 %v12906_v32  ;;  %v10993_v13 = vpack.c.bf16 %v9554_v12, %v9553_v11  ;;  %v9556_v11 = vld [vmem:[%s14120_s26 + $0x218] sm:$0xff] }
 0x4f6   : > { %10942 = vmatpush3.bf16.msra.mxu0 %v10941_v20  ;;  %v6272_v20 = vld [vmem:[%s13339_s29 + $0x18] sm:$0xff] }
 0x4f7   : > { %10968 = vmatpush3.bf16.msra.mxu1 %v10967_v24  ;;  %10944 = vmatprep.subr.bf16.mxu0 %v10943_v27  ;;  %v10988_v24 = vpack.c.bf16 %v6272_v20, %v6271_v17  ;;  %v9539_v17 = vld [vmem:[%s14120_s26 + $0x190] sm:$0xff] }
 0x4f8   : > { %10969 = vmatprep.subr.bf16.mxu1 %v12906_v32 }
 0x4fa   : > { %10946 = vmatpush3.bf16.msra.mxu0 %v10945_v43 }
 0x4fb   : > { %10971 = vmatpush3.bf16.msra.mxu1 %v10970_v46  ;;  %10948 = vmatprep.subr.bf16.mxu0 %v10947_v47  ;;  %v1563_v46 = vld [vmem:[%s13323_s15 + $0x10] sm:$0x1f] }
 0x4fc   : > { %10972 = vmatprep.subr.bf16.mxu1 %v12906_v32  ;;  %v1650_v48 = vrot.slane %v1563_v46, %v14245_v45  ;;  %v9559_v46 = vld [vmem:[%s14120_s26 + $0x230] sm:$0xff] }
 0x4fe   : > { %10950 = vmatpush3.bf16.msra.mxu0 %v10949_v44 }
 0x4ff   : > { %10974 = vmatpush3.bf16.msra.mxu1 %v10973_v50  ;;  %10975 = vmatprep.subr.bf16.mxu0 %v12906_v32 }
 0x500   : > { %10984 = vmatprep.subr.bf16.mxu1 %v12906_v32 }
 0x501   : > { %6105 = vmatmul.mubr.f32.vlgmr.msra.gmra.mrb[2].mxu0 %v5964_v52 }
 0x502   : > { %10497 = vmatmul.mubr.f32.vlgmr.msra.gmra.mrb[2].mxu1 %v5966_v53  ;;  %10511 = vmatprep.mubr.msk.f32.mxu0 %vm12907_vm3, %v12905_v14 }
 0x503   : > { %10526 = vmatprep.mubr.msk.f32.mxu1 %vm12907_vm3, %v12905_v14  ;;  %10977 = vmatpush3.bf16.msra.mxu0 %v10976_v4 }
 0x504   : > { %10978 = vmatprep.subr.bf16.mxu0 %v12906_v32  ;;  %10986 = vmatpush3.bf16.msra.mxu1 %v10985_v18  ;;  %v9540_v18 = vld [vmem:[%s14120_s26 + $0x198] sm:$0xff] }
 0x505   : > { %10987 = vmatprep.subr.bf16.mxu1 %v12906_v32 }
 0x507   : > { %10980 = vmatpush3.bf16.msra.mxu0 %v10979_v7  ;;  %v9537_v7 = vld [vmem:[%s14120_s26 + $0x180] sm:$0xff] }
 0x508   : > { %10981 = vmatprep.subr.bf16.mxu0 %v12906_v32  ;;  %10989 = vmatpush3.bf16.msra.mxu1 %v10988_v24  ;;  %v9557_v24 = vld [vmem:[%s14120_s26 + $0x220] sm:$0xff] }
 0x509   : > { %10990 = vmatprep.subr.bf16.mxu1 %v12906_v32 }
 0x50b   : > { %10983 = vmatpush3.bf16.msra.mxu0 %v10982_v10  ;;  %v9555_v10 = vld [vmem:[%s14120_s26 + $0x210] sm:$0xff] }
 0x50c   : > { %10994 = vmatprep.subr.bf16.mxu0 %v10993_v13  ;;  %v10995_v13 = vpack.c.bf16 %v9538_v8, %v9537_v7  ;;  %v10997_v16 = vpack.c.bf16 %v9556_v11, %v9555_v10  ;;  %v14281_v7 = vsub.s32 3, %v13365_v19  ;;  %v9550_v10 = vld [vmem:[%s14120_s26 + $0x1e8] sm:$0xff]  ;;  %v9567_v11 = vld [vmem:[%s14120_s26 + $0x270] sm:$0xff] }
 0x514   : > { %v14212_v22 = vpop.f32.mrb[16].mxu0 }
 0x515   : > { %v14214_v23 = vpop.f32.mrb[16].mxu1  ;;  %v14216_v55 = vpop.f32.mrb[17].mxu0 }
 0x516   : > { %v14218_v59 = vpop.f32.mrb[17].mxu1  ;;  %v5635_v60 = vpop.f32.mrb[18].mxu0 }
 0x517   : > { %v5717_v61 = vpop.f32.mrb[18].mxu1  ;;  %v5636_v62 = vpop.f32.mrb[19].mxu0 }
 0x518   : > { %v5718_v63 = vpop.f32.mrb[19].mxu1  ;;  %v1586_v62 = vrot.slane %v14123_v2, %v14245_v45 }
 0x51a   : > { %v11441_v9 = vadd.f32 %v13889_v54, %v1586_v62  ;;  %v10999_v54 = vpack.c.bf16 %v9540_v18, %v9539_v17  ;;  %v9551_v17 = vld [vmem:[%s14120_s26 + $0x1f0] sm:$0xff]  ;;  %v9552_v18 = vld [vmem:[%s14120_s26 + $0x1f8] sm:$0xff] }
 0x51c   : > { %v5968_v20 = vmax.f32 %v11441_v9, 0.0  ;;  %v9549_v9 = vld [vmem:[%s14120_s26 + $0x1e0] sm:$0xff] }
 0x594   : > { %v14236_v27 = vpop.f32.mrb[20].mxu0 }
 0x595   : > { %v14238_v28 = vpop.f32.mrb[20].mxu1  ;;  %v14240_v29 = vpop.f32.mrb[21].mxu0 }
 0x596   : > { %v14242_v30 = vpop.f32.mrb[21].mxu1  ;;  %v5799_v41 = vpop.f32.mrb[22].mxu0 }
 0x597   : > { %v5881_v25 = vpop.f32.mrb[22].mxu1  ;;  %v5800_v42 = vpop.f32.mrb[23].mxu0  ;;  %v9558_v41 = vld [vmem:[%s14120_s26 + $0x228] sm:$0xff] }
 0x598   : > { %v5882_v43 = vpop.f32.mrb[23].mxu1  ;;  %v11001_v25 = vpack.c.bf16 %v9558_v41, %v9557_v24  ;;  %v9541_v42 = vld [vmem:[%s14120_s26 + $0x1a0] sm:$0xff] }
 0x599   : > { %v9542_v43 = vld [vmem:[%s14120_s26 + $0x1a8] sm:$0xff] }
 0x5b4   : > { %v9974_v47 = vpop.f32.mrb[24].mxu0 }
 0x5b5   : > { %v9996_v34 = vpop.f32.mrb[24].mxu1  ;;  %v9975_v31 = vpop.f32.mrb[25].mxu0 }
 0x5b6   : > { %v9976_v49 = vadd.f32 %v9975_v31, %v9974_v47  ;;  %v9997_v37 = vpop.f32.mrb[25].mxu1  ;;  %v9977_v44 = vpop.f32.mrb[26].mxu0  ;;  %v9560_v47 = vld [vmem:[%s14120_s26 + $0x238] sm:$0xff]  ;;  %v9543_v31 = vld [vmem:[%s14120_s26 + $0x1b0] sm:$0xff] }
 0x5b7   : > { %v9998_v40 = vadd.f32 %v9997_v37, %v9996_v34  ;;  %v9999_v50 = vpop.f32.mrb[26].mxu1  ;;  %v9978_v51 = vpop.f32.mrb[27].mxu0  ;;  %v11005_v34 = vpack.c.bf16 %v9560_v47, %v9559_v46  ;;  %v9561_v37 = vld [vmem:[%s14120_s26 + $0x240] sm:$0xff]  ;;  %v9562_v44 = vld [vmem:[%s14120_s26 + $0x248] sm:$0xff] }
 0x5b8   : > { %v5919_v52 = vadd.f32 %v9976_v49, %v1650_v48  ;;  %v10000_v53 = vpop.f32.mrb[27].mxu1  ;;  %v11003_v48 = vpack.c.bf16 %v9542_v43, %v9541_v42  ;;  %v9544_v49 = vld [vmem:[%s14120_s26 + $0x1b8] sm:$0xff]  ;;  %v11009_v50 = vpack.c.bf16 %v9562_v44, %v9561_v37  ;;  %v9545_v51 = vld [vmem:[%s14120_s26 + $0x1c0] sm:$0xff]  ;;  %v9533_v43 = vld [vmem:[%s13333_s28] ss:$0 sm:$0xff] }
 0x5b9   : > { %v9563_v53 = vld [vmem:[%s14120_s26 + $0x250] sm:$0xff]  ;;  %v9570_v46 = vld [vmem:[%s14120_s26 + $0x288] sm:$0xff]  ;;  %v9572_v44 = vld [vmem:[%s14120_s26 + $0x298] sm:$0xff] }
 0x5ba   : > { %v14249_v60 = vadd.f32 %v9998_v40, %v5919_v52  ;;  %v11007_v40 = vpack.c.bf16 %v9544_v49, %v9543_v31  ;;  %v9546_v52 = vld [vmem:[%s14120_s26 + $0x1c8] sm:$0xff]  ;;  %v9571_v37 = vld [vmem:[%s14120_s26 + $0x290] sm:$0xff] }
 0x5bb   : > { %v11011_v62 = vpack.c.bf16 %v9546_v52, %v9545_v51  ;;  %v9574_v51 = vld [vmem:[%s14120_s26 + $0x2a8] sm:$0xff] }
 0x5d4   : > { %v10034_v61 = vpop.f32.mrb[2].mxu0 }
 0x5d5   : > { %v6176_v63 = vpop.f32.mrb[2].mxu1  ;;  %v10035_v3 = vpop.f32.mrb[3].mxu0 }
 0x5d6   : > { %v10036_v4 = vadd.f32 %v10035_v3, %v10034_v61  ;;  %v10498_v5 = vpop.f32.mrb[3].mxu1  ;;  %v9564_v61 = vld [vmem:[%s14120_s26 + $0x258] sm:$0xff] }
 0x5d7   : > { %v9548_v3 = vld [vmem:[%s14120_s26 + $0x1d8] sm:$0xff]  ;;  %v9566_v5 = vld [vmem:[%s14120_s26 + $0x268] sm:$0xff] }
 0x5d8   : > { %v6107_v6 = vadd.f32 %v10036_v4, %v9532_v0  ;;  %v9547_v0 = vld [vmem:[%s14120_s26 + $0x1d0] sm:$0xff]  ;;  %v9565_v4 = vld [vmem:[%s14120_s26 + $0x260] sm:$0xff] }
 0x5d9   : > { %v11017_v8 = vpack.c.bf16 %v9566_v5, %v9565_v4  ;;  %v9579_v4 = vld [vmem:[%s14120_s26 + $0x2d0] sm:$0xff]  ;;  %v9580_v5 = vld [vmem:[%s14120_s26 + $0x2d8] sm:$0xff] }
 0x5da   : > { %v6177_v12 = vadd.f32 %v6176_v63, %v6107_v6  ;;  %v11013_v63 = vpack.c.bf16 %v9564_v61, %v9563_v53  ;;  %v11015_v6 = vpack.c.bf16 %v9548_v3, %v9547_v0  ;;  %v9575_v53 = vld [vmem:[%s14120_s26 + $0x2b0] sm:$0xff]  ;;  %v9576_v61 = vld [vmem:[%s14120_s26 + $0x2b8] sm:$0xff]  ;;  %v9578_v0 = vld [vmem:[%s14120_s26 + $0x2c8] sm:$0xff] }
 0x5dc   : > { %v6180_v15 = vmax.f32 %v6177_v12, 0.0  ;;  %v9568_v12 = vld [vmem:[%s14120_s26 + $0x278] sm:$0xff] }
 0x5de   : > { %10512 = vmatmul.mubr.msk.f32.vlgmr.msra.gmra.mrb[28].mxu0 %vm6194_vm4, %v6180_v15  ;;  %v1582_v15 = vrot.slane %v14123_v2, %v14281_v7 }
 0x5df   : > { %10996 = vmatpush3.bf16.msra.mxu0 %v10995_v13  ;;  %6477 = vmatprep.mubr.f32.mxu0 %v5968_v20  ;;  %v11019_v13 = vpack.c.bf16 %v9550_v10, %v9549_v9  ;;  %v11023_v20 = vpack.c.bf16 %v9552_v18, %v9551_v17  ;;  %v9581_v9 = vld [vmem:[%s14120_s26 + $0x2e0] sm:$0xff]  ;;  %v9582_v10 = vld [vmem:[%s14120_s26 + $0x2e8] sm:$0xff] }
 0x5e0   : > { %10998 = vmatprep.subr.bf16.mxu0 %v10997_v16  ;;  %v11021_v16 = vpack.c.bf16 %v9568_v12, %v9567_v11  ;;  %v11440_v24 = vadd.f32 %v13752_v26, %v1582_v15  ;;  %v9569_v26 = vld [vmem:[%s14120_s26 + $0x280] sm:$0xff]  ;;  %v11044_v11 = vpack.c.bf16 %v9582_v10, %v9581_v9  ;;  %v9584_v15 = vld [vmem:[%s14120_s26 + $0x2f8] sm:$0xff]  ;;  %v9607_v9 = vld [vmem:[%s14120_s26 + $0x308] sm:$0xff] }
 0x5e1   : > { %v11026_v31 = vpack.c.bf16 %v9570_v46, %v9569_v26  ;;  %v9591_v46 = vld [vmem:[%s13331_s12 + $0x50] sm:$0xff] }
 0x5e2   : > { %v5967_v41 = vmax.f32 %v11440_v24, 0.0 }
 0x5e3   : > { %11000 = vmatpush3.bf16.msra.mxu0 %v10999_v54  ;;  %v6273_v54 = vld [vmem:[%s13339_s29 + $0x20] sm:$0xff] }
 0x5e4   : > { %11002 = vmatprep.subr.bf16.mxu0 %v11001_v25  ;;  %v6274_v25 = vld [vmem:[%s13339_s29 + $0x28] sm:$0xff] }
 0x5e5   : > { %v10991_v42 = vpack.c.bf16 %v6274_v25, %v6273_v54  ;;  %v9587_v54 = vld [vmem:[%s13331_s12 + $0x30] sm:$0xff]  ;;  %v9588_v25 = vld [vmem:[%s13331_s12 + $0x38] sm:$0xff] }
 0x5e7   : > { %11004 = vmatpush3.bf16.msra.mxu0 %v11003_v48  ;;  %10992 = vmatpush3.bf16.msra.mxu1 %v10991_v42  ;;  %v11050_v42 = vpack.c.bf16 %v9588_v25, %v9587_v54  ;;  %v9609_v54 = vld [vmem:[%s14120_s26 + $0x318] sm:$0xff]  ;;  %v9626_v25 = vld [vmem:[%s14120_s26 + $0x3a0] sm:$0xff] }
 0x5e8   : > { %11006 = vmatprep.subr.bf16.mxu0 %v11005_v34  ;;  %11025 = vmatprep.subr.bf16.mxu1 %v12906_v32 }
 0x5eb   : > { %11008 = vmatpush3.bf16.msra.mxu0 %v11007_v40  ;;  %v11029_v40 = vpack.c.bf16 %v9572_v44, %v9571_v37  ;;  %v9596_v37 = vld [vmem:[%s13339_s29 + $0x30] sm:$0xff]  ;;  %v9597_v44 = vld [vmem:[%s13339_s29 + $0x38] sm:$0xff] }
 0x5ec   : > { %11010 = vmatprep.subr.bf16.mxu0 %v11009_v50  ;;  %v9573_v50 = vld [vmem:[%s14120_s26 + $0x2a0] sm:$0xff] }
 0x5ed   : > { %v11032_v52 = vpack.c.bf16 %v9574_v51, %v9573_v50  ;;  %v11059_v50 = vpack.c.bf16 %v9597_v44, %v9596_v37  ;;  %v9599_v51 = vld [vmem:[%s13339_s29 + $0x48] sm:$0xff] }
 0x5ee   : > { %v9630_v37 = vld [vmem:[%s14120_s26 + $0x3c0] sm:$0xff]  ;;  %v9631_v44 = vld [vmem:[%s14120_s26 + $0x3c8] sm:$0xff] }
 0x5ef   : > { %11012 = vmatpush3.bf16.msra.mxu0 %v11011_v62  ;;  %v11035_v62 = vpack.c.bf16 %v9576_v61, %v9575_v53  ;;  %v9535_v53 = vld [vmem:[%s13341_s19] ss:$0 sm:$0xff] }
 0x5f0   : > { %11014 = vmatprep.subr.bf16.mxu0 %v11013_v63  ;;  %v9577_v63 = vld [vmem:[%s14120_s26 + $0x2c0] sm:$0xff] }
 0x5f1   : > { %v11038_v3 = vpack.c.bf16 %v9578_v0, %v9577_v63  ;;  %v1597_v0 = vsub.s32 7, %v13365_v19 }
 0x5f3   : > { %11016 = vmatpush3.bf16.msra.mxu0 %v11015_v6  ;;  %v11041_v6 = vpack.c.bf16 %v9580_v5, %v9579_v4  ;;  %v9586_v4 = vld [vmem:[%s13325_s21 + $0x1] ss:$0 sm:$0xff] }
 0x5f4   : > { %11018 = vmatprep.subr.bf16.mxu0 %v11017_v8  ;;  %v1589_v8 = vsub.s32 5, %v13365_v19 }
 0x5f6   : > { %v1590_v12 = vrot.slane %v14123_v2, %v1589_v8 }
 0x5f7   : > { %11020 = vmatpush3.bf16.msra.mxu0 %v11019_v13  ;;  %v9583_v13 = vld [vmem:[%s14120_s26 + $0x2f0] sm:$0xff] }
 0x5f8   : > { %11022 = vmatprep.subr.bf16.mxu0 %v11021_v16  ;;  %v11047_v16 = vpack.c.bf16 %v9584_v15, %v9583_v13  ;;  %v11442_v17 = vadd.f32 %v13894_v57, %v1590_v12  ;;  %v9589_v57 = vld [vmem:[%s13331_s12 + $0x40] sm:$0xff]  ;;  %v9624_v12 = vld [vmem:[%s14120_s26 + $0x390] sm:$0xff] }
 0x5f9   : > { %v9625_v13 = vld [vmem:[%s14120_s26 + $0x398] sm:$0xff] }
 0x5fb   : > { %11024 = vmatpush3.bf16.msra.mxu0 %v11023_v20 }
 0x5fc   : > { %11049 = vmatprep.subr.bf16.mxu0 %v12906_v32 }
 0x5fe   : > { %6478 = vmatmul.mubr.f32.vlgmr.msra.gmra.mrb[30].mxu0 %v5967_v41  ;;  %v5969_v41 = vmax.f32 %v11442_v17, 0.0 }
 0x5ff   : > { %10576 = vmatprep.mubr.msk.f32.mxu0 %vm12907_vm3, %v12905_v14  ;;  %11051 = vmatpush3.bf16.msra.mxu0 %v11050_v42 }
 0x600   : > { %11052 = vmatprep.subr.bf16.mxu0 %v12906_v32 }
 0x6b1   : > { %v6264_v47 = vpop.f32.mrb[28].mxu0 }
 0x6b2   : > { %v6265_v48 = vadd.f32 %v9533_v43, %v6264_v47  ;;  %v10513_v34 = vpop.f32.mrb[29].mxu0  ;;  %v9590_v43 = vld [vmem:[%s13331_s12 + $0x48] sm:$0xff]  ;;  %v9592_v47 = vld [vmem:[%s13331_s12 + $0x58] sm:$0xff] }
 0x6b3   : > { %v11053_v26 = vpack.c.bf16 %v9590_v43, %v9589_v57  ;;  %v9622_v34 = vld [vmem:[%s14120_s26 + $0x380] sm:$0xff]  ;;  %v9627_v57 = vld [vmem:[%s14120_s26 + $0x3a8] sm:$0xff] }
 0x6b4   : > { %v6268_v49 = vmax.f32 %v6265_v48, 0.0  ;;  %v11056_v48 = vpack.c.bf16 %v9592_v47, %v9591_v46  ;;  %v11075_v42 = vpack.c.bf16 %v9627_v57, %v9626_v25  ;;  %v9610_v43 = vld [vmem:[%s14120_s26 + $0x320] sm:$0xff]  ;;  %v9628_v46 = vld [vmem:[%s14120_s26 + $0x3b0] sm:$0xff]  ;;  %v9629_v47 = vld [vmem:[%s14120_s26 + $0x3b8] sm:$0xff] }
 0x6b5   : > { %11054 = vmatpush3.bf16.msra.mxu0 %v11053_v26  ;;  %v9611_v26 = vld [vmem:[%s14120_s26 + $0x328] sm:$0xff] }
 0x6b6   : > { %10527 = vmatmul.mubr.msk.f32.vlgmr.msra.gmra.mrb[28].mxu1 %vm6194_vm4, %v6268_v49  ;;  %11055 = vmatprep.subr.bf16.mxu0 %v12906_v32 }
 0x6b7   : > { %11027 = vmatpush3.bf16.msra.mxu1 %v11026_v31  ;;  %10561 = vmatprep.mubr.msk.f32.mxu1 %vm12907_vm3, %v12905_v14  ;;  %v9623_v31 = vld [vmem:[%s14120_s26 + $0x388] sm:$0xff] }
 0x6b8   : > { %11028 = vmatprep.subr.bf16.mxu1 %v12906_v32  ;;  %v11067_v49 = vpack.c.bf16 %v9623_v31, %v9622_v34  ;;  %v11079_v34 = vpack.c.bf16 %v9629_v47, %v9628_v46  ;;  %v9612_v31 = vld [vmem:[%s14120_s26 + $0x330] sm:$0xff] }
 0x6b9   : > { %11057 = vmatpush3.bf16.msra.mxu0 %v11056_v48  ;;  %v11077_v48 = vpack.c.bf16 %v9611_v26, %v9610_v43  ;;  %v9594_v43 = vld [vmem:[%s13333_s28 + $0x1] ss:$0 sm:$0xff] }
 0x6ba   : > { %11068 = vmatprep.subr.bf16.mxu0 %v11067_v49  ;;  %v9613_v49 = vld [vmem:[%s14120_s26 + $0x338] sm:$0xff]  ;;  %v9639_v26 = vld [vmem:[%s14120_s26 + $0x408] sm:$0xff] }
 0x6bb   : > { %11030 = vmatpush3.bf16.msra.mxu1 %v11029_v40  ;;  %v9598_v40 = vld [vmem:[%s13339_s29 + $0x40] sm:$0xff] }
 0x6bc   : > { %11031 = vmatprep.subr.bf16.mxu1 %v12906_v32 }
 0x6bf   : > { %11033 = vmatpush3.bf16.msra.mxu1 %v11032_v52  ;;  %v11062_v52 = vpack.c.bf16 %v9599_v51, %v9598_v40  ;;  %v11081_v40 = vpack.c.bf16 %v9613_v49, %v9612_v31  ;;  %v9614_v51 = vld [vmem:[%s14120_s26 + $0x340] sm:$0xff]  ;;  %v9640_v49 = vld [vmem:[%s14120_s26 + $0x410] sm:$0xff] }
 0x6c0   : > { %11034 = vmatprep.subr.bf16.mxu1 %v12906_v32 }
 0x6c3   : > { %11036 = vmatpush3.bf16.msra.mxu1 %v11035_v62 }
 0x6c4   : > { %11037 = vmatprep.subr.bf16.mxu1 %v12906_v32 }
 0x6c7   : > { %11039 = vmatpush3.bf16.msra.mxu1 %v11038_v3  ;;  %v1598_v3 = vrot.slane %v14123_v2, %v1597_v0 }
 0x6c8   : > { %11040 = vmatprep.subr.bf16.mxu1 %v12906_v32 }
 0x6c9   : > { %v11444_v10 = vadd.f32 %v13896_v58, %v1598_v3  ;;  %v9616_v3 = vld [vmem:[%s14120_s26 + $0x350] sm:$0xff] }
 0x6cb   : > { %11042 = vmatpush3.bf16.msra.mxu1 %v11041_v6  ;;  %v9606_v6 = vld [vmem:[%s14120_s26 + $0x300] sm:$0xff] }
 0x6cc   : > { %11043 = vmatprep.subr.bf16.mxu1 %v12906_v32  ;;  %v11069_v17 = vpack.c.bf16 %v9607_v9, %v9606_v6  ;;  %v9635_v6 = vld [vmem:[%s14120_s26 + $0x3e8] sm:$0xff] }
 0x6cf   : > { %11045 = vmatpush3.bf16.msra.mxu1 %v11044_v11 }
 0x6d0   : > { %11046 = vmatprep.subr.bf16.mxu1 %v12906_v32 }
 0x6d1   : > { %v10100_v18 = vpop.f32.mrb[30].mxu0 }
 0x6d2   : > { %v10101_v20 = vpop.f32.mrb[31].mxu0 }
 0x6d3   : > { %v10102_v24 = vadd.f32 %v10101_v20, %v10100_v18  ;;  %11048 = vmatpush3.bf16.msra.mxu1 %v11047_v16  ;;  %v11071_v20 = vpack.c.bf16 %v9625_v13, %v9624_v12  ;;  %v9618_v12 = vld [vmem:[%s14120_s26 + $0x360] sm:$0xff]  ;;  %v9619_v13 = vld [vmem:[%s14120_s26 + $0x368] sm:$0xff] }
 0x6d4   : > { %11058 = vmatprep.subr.bf16.mxu1 %v12906_v32 }
 0x6d5   : > { %v6480_v5 = vadd.f32 %v10102_v24, %v9586_v4  ;;  %v5971_v24 = vmax.f32 %v11444_v10, 0.0  ;;  %v9617_v4 = vld [vmem:[%s14120_s26 + $0x358] sm:$0xff]  ;;  %v1593_v10 = vsub.s32 6, %v13365_v19 }
 0x6d6   : > { %10562 = vmatmul.mubr.f32.vlgmr.msra.gmra.mrb[30].mxu1 %v5969_v41  ;;  %v9608_v41 = vld [vmem:[%s14120_s26 + $0x310] sm:$0xff]  ;;  %v11089_v9 = vpack.c.bf16 %v9617_v4, %v9616_v3 }
 0x6d7   : > { %10591 = vmatprep.mubr.msk.f32.mxu1 %vm12907_vm3, %v12905_v14  ;;  %11060 = vmatpush3.bf16.msra.mxu1 %v11059_v50  ;;  %v11073_v58 = vpack.c.bf16 %v9609_v54, %v9608_v41  ;;  %v11083_v50 = vpack.c.bf16 %v9631_v44, %v9630_v37  ;;  %v9620_v41 = vld [vmem:[%s14120_s26 + $0x370] sm:$0xff]  ;;  %v9621_v54 = vld [vmem:[%s14120_s26 + $0x378] sm:$0xff] }
 0x6d8   : > { %11061 = vmatprep.subr.bf16.mxu1 %v12906_v32  ;;  %v9641_v37 = vld [vmem:[%s14120_s26 + $0x418] sm:$0xff]  ;;  %v9648_v4 = vld [vmem:[%s14120_s26 + $0x450] sm:$0xff] }
 0x6d9   : > { %v11103_v44 = vpack.c.bf16 %v9641_v37, %v9640_v49  ;;  %v9666_v49 = vld [vmem:[%s13339_s29 + $0x68] sm:$0xff]  ;;  %v9667_v37 = vld [vmem:[%s13339_s29 + $0x70] sm:$0xff]  ;;  %v9807_v19 = vld [vmem:[%s13339_s29 + $0xe0] sm:$0xff] }
 0x6db   : > { %11063 = vmatpush3.bf16.msra.mxu1 %v11062_v52  ;;  %v9615_v52 = vld [vmem:[%s14120_s26 + $0x348] sm:$0xff] }
 0x6dc   : > { %11064 = vmatprep.subr.bf16.mxu1 %v12906_v32 }
 0x789   : > { %v6351_v61 = vpop.f32.mrb[28].mxu1 }
 0x78a   : > { %v6352_v62 = vadd.f32 %v9535_v53, %v6351_v61  ;;  %v10528_v63 = vpop.f32.mrb[29].mxu1  ;;  %v9632_v53 = vld [vmem:[%s14120_s26 + $0x3d0] sm:$0xff]  ;;  %v9633_v61 = vld [vmem:[%s14120_s26 + $0x3d8] sm:$0xff] }
 0x78b   : > { %v11087_v63 = vpack.c.bf16 %v9633_v61, %v9632_v53  ;;  %v9645_v53 = vld [vmem:[%s14120_s26 + $0x438] sm:$0xff] }
 0x78c   : > { %6355 = vst [vmem:[%s14354_s17] sm:$0x3] %v6352_v62  ;;  %v11085_v62 = vpack.c.bf16 %v9615_v52, %v9614_v51  ;;  %v9644_v52 = vld [vmem:[%s14120_s26 + $0x430] sm:$0xff] }
 0x78d   : > { %v11109_v61 = vpack.c.bf16 %v9645_v53, %v9644_v52 }
 0x7a9   : > { %v6549_v11 = vpop.f32.mrb[30].mxu1 }
 0x7aa   : > { %v6550_v15 = vadd.f32 %v6549_v11, %v6480_v5  ;;  %v10563_v16 = vpop.f32.mrb[31].mxu1  ;;  %v9634_v5 = vld [vmem:[%s14120_s26 + $0x3e0] sm:$0xff] }
 0x7ab   : > { %v11091_v11 = vpack.c.bf16 %v9635_v6, %v9634_v5  ;;  %v9637_v16 = vld [vmem:[%s14120_s26 + $0x3f8] sm:$0xff] }
 0x7ac   : > { %v6553_v18 = vmax.f32 %v6550_v15, 0.0  ;;  %v9636_v15 = vld [vmem:[%s14120_s26 + $0x3f0] sm:$0xff]  ;;  %v9649_v5 = vld [vmem:[%s14120_s26 + $0x458] sm:$0xff] }
 0x7ad   : > { %v11115_v6 = vpack.c.bf16 %v9649_v5, %v9648_v4  ;;  %v9675_v4 = vld [vmem:[%s14120_s26 + $0x480] sm:$0xff]  ;;  %v9676_v5 = vld [vmem:[%s14120_s26 + $0x488] sm:$0xff] }
 0x7ae   : > { %10577 = vmatmul.mubr.msk.f32.vlgmr.msra.gmra.mrb[32].mxu0 %vm6194_vm4, %v6553_v18  ;;  %v1594_v18 = vrot.slane %v14123_v2, %v1593_v10  ;;  %v9600_v2 = vld [vmem:[%s13339_s29 + $0x50] sm:$0xff] }
 0x7af   : > { %11070 = vmatpush3.bf16.msra.mxu0 %v11069_v17  ;;  %6854 = vmatprep.mubr.f32.mxu0 %v5971_v24  ;;  %v11093_v17 = vpack.c.bf16 %v9619_v13, %v9618_v12  ;;  %v11097_v24 = vpack.c.bf16 %v9621_v54, %v9620_v41  ;;  %v14429_v12 = vld [vmem:[%s13323_s15 + $0x8] sm:$0xff] }
 0x7b0   : > { %11072 = vmatprep.subr.bf16.mxu0 %v11071_v20  ;;  %v11095_v20 = vpack.c.bf16 %v9637_v16, %v9636_v15  ;;  %v11443_v25 = vadd.f32 %v13892_v56, %v1594_v18  ;;  %v9638_v56 = vld [vmem:[%s14120_s26 + $0x400] sm:$0xff]  ;;  %v1602_v15 = vrot.slane %v14429_v12, %v14182_v21  ;;  %v9652_v16 = vld [vmem:[%s14120_s26 + $0x470] sm:$0xff] }
 0x7b2   : > { %v5970_v57 = vmax.f32 %v11443_v25, 0.0 }
 0x7b3   : > { %11074 = vmatpush3.bf16.msra.mxu0 %v11073_v58  ;;  %v9601_v58 = vld [vmem:[%s13339_s29 + $0x58] sm:$0xff] }
 0x7b4   : > { %11076 = vmatprep.subr.bf16.mxu0 %v11075_v42  ;;  %v11065_v42 = vpack.c.bf16 %v9601_v58, %v9600_v2  ;;  %v9657_v2 = vld [vmem:[%s13331_s12 + $0x68] sm:$0xff] }
 0x7b6   : > { %11066 = vmatpush3.bf16.msra.mxu1 %v11065_v42  ;;  %v9659_v42 = vld [vmem:[%s13331_s12 + $0x78] sm:$0xff] }
 0x7b7   : > { %11078 = vmatpush3.bf16.msra.mxu0 %v11077_v48  ;;  %11099 = vmatprep.subr.bf16.mxu1 %v12906_v32 }
 0x7b8   : > { %11080 = vmatprep.subr.bf16.mxu0 %v11079_v34  ;;  %v11100_v34 = vpack.c.bf16 %v9639_v26, %v9638_v56  ;;  %v9660_v56 = vld [vmem:[%s13331_s12 + $0x80] sm:$0xff]  ;;  %v9661_v26 = vld [vmem:[%s13331_s12 + $0x88] sm:$0xff] }
 0x7bb   : > { %11082 = vmatpush3.bf16.msra.mxu0 %v11081_v40  ;;  %v9642_v40 = vld [vmem:[%s14120_s26 + $0x420] sm:$0xff] }
 0x7bc   : > { %11084 = vmatprep.subr.bf16.mxu0 %v11083_v50  ;;  %v9643_v50 = vld [vmem:[%s14120_s26 + $0x428] sm:$0xff] }
 0x7bd   : > { %v11106_v51 = vpack.c.bf16 %v9643_v50, %v9642_v40  ;;  %v9668_v40 = vld [vmem:[%s13339_s29 + $0x78] sm:$0xff] }
 0x7be   : > { %v11136_v50 = vpack.c.bf16 %v9668_v40, %v9667_v37  ;;  %v9683_v37 = vld [vmem:[%s14120_s26 + $0x4c0] sm:$0xff]  ;;  %v9701_v40 = vld [vmem:[%s14120_s26 + $0x550] sm:$0xff] }
 0x7bf   : > { %11086 = vmatpush3.bf16.msra.mxu0 %v11085_v62  ;;  %v9646_v62 = vld [vmem:[%s14120_s26 + $0x440] sm:$0xff] }
 0x7c0   : > { %11088 = vmatprep.subr.bf16.mxu0 %v11087_v63  ;;  %v9647_v63 = vld [vmem:[%s14120_s26 + $0x448] sm:$0xff] }
 0x7c1   : > { %v11112_v3 = vpack.c.bf16 %v9647_v63, %v9646_v62  ;;  %v1610_v62 = vrot.slane %v14429_v12, %v14188_v35  ;;  %v9655_v63 = vld [vmem:[%s13325_s21 + $0x2] ss:$0 sm:$0xff] }
 0x7c3   : > { %11090 = vmatpush3.bf16.msra.mxu0 %v11089_v9  ;;  %v9650_v9 = vld [vmem:[%s14120_s26 + $0x460] sm:$0xff] }
 0x7c4   : > { %11092 = vmatprep.subr.bf16.mxu0 %v11091_v11  ;;  %v9651_v11 = vld [vmem:[%s14120_s26 + $0x468] sm:$0xff] }
 0x7c5   : > { %v11118_v13 = vpack.c.bf16 %v9651_v11, %v9650_v9  ;;  %v9693_v11 = vld [vmem:[%s14120_s26 + $0x510] sm:$0xff] }
 0x7c7   : > { %11094 = vmatpush3.bf16.msra.mxu0 %v11093_v17  ;;  %v9653_v17 = vld [vmem:[%s14120_s26 + $0x478] sm:$0xff] }
 0x7c8   : > { %11096 = vmatprep.subr.bf16.mxu0 %v11095_v20  ;;  %v11121_v18 = vpack.c.bf16 %v9653_v17, %v9652_v16  ;;  %v11445_v20 = vadd.f32 %v14033_v33, %v1602_v15  ;;  %v9658_v33 = vld [vmem:[%s13331_s12 + $0x70] sm:$0xff]  ;;  %v11143_v17 = vpack.c.bf16 %v9676_v5, %v9675_v4  ;;  %v9687_v5 = vld [vmem:[%s14120_s26 + $0x4e0] sm:$0xff] }
 0x7ca   : > { %v5972_v25 = vmax.f32 %v11445_v20, 0.0 }
 0x7cb   : > { %11098 = vmatpush3.bf16.msra.mxu0 %v11097_v24 }
 0x7cc   : > { %11123 = vmatprep.subr.bf16.mxu0 %v12906_v32 }
 0x7ce   : > { %6855 = vmatmul.mubr.f32.vlgmr.msra.gmra.mrb[34].mxu0 %v5970_v57  ;;  %v9656_v57 = vld [vmem:[%s13331_s12 + $0x60] sm:$0xff] }
 0x7cf   : > { %10641 = vmatprep.mubr.msk.f32.mxu0 %vm12907_vm3, %v12905_v14  ;;  %v11124_v58 = vpack.c.bf16 %v9657_v2, %v9656_v57  ;;  %v9696_v57 = vld [vmem:[%s14120_s26 + $0x528] sm:$0xff] }
 0x7d1   : > { %11125 = vmatpush3.bf16.msra.mxu0 %v11124_v58  ;;  %v9680_v58 = vld [vmem:[%s14120_s26 + $0x4a8] sm:$0xff] }
 0x7d2   : > { %11126 = vmatprep.subr.bf16.mxu0 %v12906_v32 }
 0x881   : > { %v6638_v46 = vpop.f32.mrb[32].mxu0 }
 0x882   : > { %v6639_v47 = vadd.f32 %v9594_v43, %v6638_v46  ;;  %v10578_v48 = vpop.f32.mrb[33].mxu0  ;;  %v11127_v43 = vpack.c.bf16 %v9659_v42, %v9658_v33  ;;  %v11130_v46 = vpack.c.bf16 %v9661_v26, %v9660_v56  ;;  %v9679_v33 = vld [vmem:[%s14120_s26 + $0x4a0] sm:$0xff]  ;;  %v9697_v42 = vld [vmem:[%s14120_s26 + $0x530] sm:$0xff] }
 0x883   : > { %v9692_v48 = vld [vmem:[%s14120_s26 + $0x508] sm:$0xff]  ;;  %v11151_v56 = vpack.c.bf16 %v9680_v58, %v9679_v33 }
 0x884   : > { %v6642_v31 = vmax.f32 %v6639_v47, 0.0  ;;  %11128 = vmatpush3.bf16.msra.mxu0 %v11127_v43  ;;  %v9691_v47 = vld [vmem:[%s14120_s26 + $0x500] sm:$0xff]  ;;  %v9698_v43 = vld [vmem:[%s14120_s26 + $0x538] sm:$0xff] }
 0x885   : > { %11129 = vmatprep.subr.bf16.mxu0 %v12906_v32  ;;  %v11153_v26 = vpack.c.bf16 %v9698_v43, %v9697_v42 }
 0x886   : > { %10592 = vmatmul.mubr.msk.f32.vlgmr.msra.gmra.mrb[32].mxu1 %vm6194_vm4, %v6642_v31  ;;  %v9665_v31 = vld [vmem:[%s13339_s29 + $0x60] sm:$0xff] }
 0x887   : > { %11101 = vmatpush3.bf16.msra.mxu1 %v11100_v34  ;;  %10626 = vmatprep.mubr.msk.f32.mxu1 %vm12907_vm3, %v12905_v14  ;;  %v11141_v34 = vpack.c.bf16 %v9692_v48, %v9691_v47  ;;  %v9682_v47 = vld [vmem:[%s14120_s26 + $0x4b8] sm:$0xff]  ;;  %v9699_v48 = vld [vmem:[%s14120_s26 + $0x540] sm:$0xff] }
 0x888   : > { %11102 = vmatprep.subr.bf16.mxu1 %v12906_v32  ;;  %11131 = vmatpush3.bf16.msra.mxu0 %v11130_v46  ;;  %v9681_v46 = vld [vmem:[%s14120_s26 + $0x4b0] sm:$0xff] }
 0x889   : > { %11142 = vmatprep.subr.bf16.mxu0 %v11141_v34  ;;  %v9700_v34 = vld [vmem:[%s14120_s26 + $0x548] sm:$0xff] }
 0x88b   : > { %11104 = vmatpush3.bf16.msra.mxu1 %v11103_v44  ;;  %v11133_v44 = vpack.c.bf16 %v9666_v49, %v9665_v31  ;;  %v11155_v31 = vpack.c.bf16 %v9682_v47, %v9681_v46  ;;  %v11157_v49 = vpack.c.bf16 %v9700_v34, %v9699_v48  ;;  %v9710_v46 = vld [vmem:[%s14120_s26 + $0x598] sm:$0xff]  ;;  %v9711_v48 = vld [vmem:[%s14120_s26 + $0x5a0] sm:$0xff]  ;;  %v9712_v34 = vld [vmem:[%s14120_s26 + $0x5a8] sm:$0xff] }
 0x88c   : > { %11105 = vmatprep.subr.bf16.mxu1 %v12906_v32 }
 0x88f   : > { %11107 = vmatpush3.bf16.msra.mxu1 %v11106_v51  ;;  %v9603_v51 = vld [vmem:[%s13341_s19 + $0x1] ss:$0 sm:$0xff] }
 0x890   : > { %11108 = vmatprep.subr.bf16.mxu1 %v12906_v32 }
 0x893   : > { %11110 = vmatpush3.bf16.msra.mxu1 %v11109_v61 }
 0x894   : > { %11111 = vmatprep.subr.bf16.mxu1 %v12906_v32 }
 0x897   : > { %11113 = vmatpush3.bf16.msra.mxu1 %v11112_v3 }
 0x898   : > { %11114 = vmatprep.subr.bf16.mxu1 %v12906_v32 }
 0x89b   : > { %11116 = vmatpush3.bf16.msra.mxu1 %v11115_v6  ;;  %v11447_v6 = vadd.f32 %v14036_v36, %v1610_v62  ;;  %v9703_v62 = vld [vmem:[%s14120_s26 + $0x560] sm:$0xff] }
 0x89c   : > { %11117 = vmatprep.subr.bf16.mxu1 %v12906_v32 }
 0x89f   : > { %11119 = vmatpush3.bf16.msra.mxu1 %v11118_v13  ;;  %v9694_v13 = vld [vmem:[%s14120_s26 + $0x518] sm:$0xff] }
 0x8a0   : > { %11120 = vmatprep.subr.bf16.mxu1 %v12906_v32  ;;  %v11145_v20 = vpack.c.bf16 %v9694_v13, %v9693_v11  ;;  %v9706_v11 = vld [vmem:[%s14120_s26 + $0x578] sm:$0xff] }
 0x8a1   : > { %v10166_v41 = vpop.f32.mrb[34].mxu0 }
 0x8a2   : > { %v10167_v54 = vpop.f32.mrb[35].mxu0 }
 0x8a3   : > { %v10168_v24 = vadd.f32 %v10167_v54, %v10166_v41  ;;  %11122 = vmatpush3.bf16.msra.mxu1 %v11121_v18  ;;  %v9677_v41 = vld [vmem:[%s14120_s26 + $0x490] sm:$0xff]  ;;  %v9678_v54 = vld [vmem:[%s14120_s26 + $0x498] sm:$0xff] }
 0x8a4   : > { %11132 = vmatprep.subr.bf16.mxu1 %v12906_v32  ;;  %v11147_v36 = vpack.c.bf16 %v9678_v54, %v9677_v41 }
 0x8a5   : > { %v6857_v3 = vadd.f32 %v10168_v24, %v9655_v63  ;;  %v5974_v24 = vmax.f32 %v11447_v6, 0.0  ;;  %v9704_v63 = vld [vmem:[%s14120_s26 + $0x568] sm:$0xff] }
 0x8a6   : > { %10627 = vmatmul.mubr.f32.vlgmr.msra.gmra.mrb[34].mxu1 %v5972_v25  ;;  %v9695_v25 = vld [vmem:[%s14120_s26 + $0x520] sm:$0xff]  ;;  %v11165_v4 = vpack.c.bf16 %v9704_v63, %v9703_v62  ;;  %v9688_v6 = vld [vmem:[%s14120_s26 + $0x4e8] sm:$0xff] }
 0x8a7   : > { %10656 = vmatprep.mubr.msk.f32.mxu1 %vm12907_vm3, %v12905_v14  ;;  %11134 = vmatpush3.bf16.msra.mxu1 %v11133_v44  ;;  %v11149_v2 = vpack.c.bf16 %v9696_v57, %v9695_v25  ;;  %v9684_v44 = vld [vmem:[%s14120_s26 + $0x4c8] sm:$0xff]  ;;  %v11167_v13 = vpack.c.bf16 %v9688_v6, %v9687_v5  ;;  %v9719_v62 = vld [vmem:[%s14120_s26 + $0x5e0] sm:$0xff]  ;;  %v9721_v5 = vld [vmem:[%s14120_s26 + $0x5f0] sm:$0xff] }
 0x8a8   : > { %11135 = vmatprep.subr.bf16.mxu1 %v12906_v32  ;;  %v9670_v25 = vld [vmem:[%s13339_s29 + $0x88] sm:$0xff] }
 0x8a9   : > { %v9720_v63 = vld [vmem:[%s14120_s26 + $0x5e8] sm:$0xff]  ;;  %v9722_v6 = vld [vmem:[%s14120_s26 + $0x5f8] sm:$0xff] }
 0x8ab   : > { %11137 = vmatpush3.bf16.msra.mxu1 %v11136_v50  ;;  %v9702_v50 = vld [vmem:[%s14120_s26 + $0x558] sm:$0xff] }
 0x8ac   : > { %11138 = vmatprep.subr.bf16.mxu1 %v12906_v32 }
 0x959   : > { %v6727_v52 = vpop.f32.mrb[32].mxu1 }
 0x95a   : > { %v6728_v53 = vadd.f32 %v9603_v51, %v6727_v52  ;;  %v10593_v61 = vpop.f32.mrb[33].mxu1  ;;  %v11159_v51 = vpack.c.bf16 %v9684_v44, %v9683_v37  ;;  %v11161_v52 = vpack.c.bf16 %v9702_v50, %v9701_v40  ;;  %v9714_v37 = vld [vmem:[%s14120_s26 + $0x5b8] sm:$0xff]  ;;  %v9715_v40 = vld [vmem:[%s14120_s26 + $0x5c0] sm:$0xff]  ;;  %v9716_v50 = vld [vmem:[%s14120_s26 + $0x5c8] sm:$0xff] }
 0x95b   : > { %v9686_v61 = vld [vmem:[%s14120_s26 + $0x4d8] sm:$0xff] }
 0x95c   : > { %9605 = vst [vmem:[%s14354_s17 + $0x2] sm:$0x3] %v6728_v53  ;;  %v9685_v53 = vld [vmem:[%s14120_s26 + $0x4d0] sm:$0xff] }
 0x979   : > { %v6926_v9 = vpop.f32.mrb[34].mxu1 }
 0x97a   : > { %v6927_v15 = vadd.f32 %v6926_v9, %v6857_v3  ;;  %v10628_v16 = vpop.f32.mrb[35].mxu1  ;;  %v11163_v3 = vpack.c.bf16 %v9686_v61, %v9685_v53  ;;  %v9705_v9 = vld [vmem:[%s14120_s26 + $0x570] sm:$0xff]  ;;  %v9718_v53 = vld [vmem:[%s14120_s26 + $0x5d8] sm:$0xff] }
 0x97b   : > { %v11169_v16 = vpack.c.bf16 %v9706_v11, %v9705_v9  ;;  %v11195_v9 = vpack.c.bf16 %v9722_v6, %v9721_v5  ;;  %v9746_v5 = vld [vmem:[%s14120_s26 + $0x610] sm:$0xff]  ;;  %v9747_v6 = vld [vmem:[%s14120_s26 + $0x618] sm:$0xff] }
 0x97c   : > { %v6930_v18 = vmax.f32 %v6927_v15, 0.0  ;;  %v1606_v15 = vrot.slane %v14429_v12, %v14115_v1 }
 0x97e   : > { %10642 = vmatmul.mubr.msk.f32.vlgmr.msra.gmra.mrb[36].mxu0 %vm6194_vm4, %v6930_v18  ;;  %v9690_v18 = vld [vmem:[%s14120_s26 + $0x4f8] sm:$0xff]  ;;  %v11446_v41 = vadd.f32 %v14038_v38, %v1606_v15  ;;  %v9707_v38 = vld [vmem:[%s14120_s26 + $0x580] sm:$0xff] }
 0x97f   : > { %11144 = vmatpush3.bf16.msra.mxu0 %v11143_v17  ;;  %7231 = vmatprep.mubr.f32.mxu0 %v5974_v24  ;;  %v9689_v17 = vld [vmem:[%s14120_s26 + $0x4f0] sm:$0xff] }
 0x980   : > { %11146 = vmatprep.subr.bf16.mxu0 %v11145_v20  ;;  %v11171_v20 = vpack.c.bf16 %v9690_v18, %v9689_v17  ;;  %v5973_v54 = vmax.f32 %v11446_v41, 0.0  ;;  %v9669_v24 = vld [vmem:[%s13339_s29 + $0x80] sm:$0xff] }
 0x981   : > { %v11139_v57 = vpack.c.bf16 %v9670_v25, %v9669_v24  ;;  %v9725_v18 = vld [vmem:[%s13331_s12 + $0x90] sm:$0xff] }
 0x982   : > { %v9729_v25 = vld [vmem:[%s13331_s12 + $0xb0] sm:$0xff] }
 0x983   : > { %11148 = vmatpush3.bf16.msra.mxu0 %v11147_v36  ;;  %11140 = vmatpush3.bf16.msra.mxu1 %v11139_v57  ;;  %v9663_v36 = vld [vmem:[%s13333_s28 + $0x2] ss:$0 sm:$0xff] }
 0x984   : > { %11150 = vmatprep.subr.bf16.mxu0 %v11149_v2  ;;  %11173 = vmatprep.subr.bf16.mxu1 %v12906_v32  ;;  %v9708_v2 = vld [vmem:[%s14120_s26 + $0x588] sm:$0xff]  ;;  %v9730_v57 = vld [vmem:[%s13331_s12 + $0xb8] sm:$0xff] }
 0x985   : > { %v11174_v43 = vpack.c.bf16 %v9708_v2, %v9707_v38  ;;  %v9760_v38 = vld [vmem:[%s14120_s26 + $0x680] sm:$0xff]  ;;  %v9761_v2 = vld [vmem:[%s14120_s26 + $0x688] sm:$0xff] }
 0x987   : > { %11152 = vmatpush3.bf16.msra.mxu0 %v11151_v56 }
 0x988   : > { %11154 = vmatprep.subr.bf16.mxu0 %v11153_v26  ;;  %v9709_v26 = vld [vmem:[%s14120_s26 + $0x590] sm:$0xff] }
 0x989   : > { %v11177_v47 = vpack.c.bf16 %v9710_v46, %v9709_v26  ;;  %v9737_v26 = vld [vmem:[%s13339_s29 + $0xa8] sm:$0xff] }
 0x98b   : > { %11156 = vmatpush3.bf16.msra.mxu0 %v11155_v31  ;;  %v11180_v31 = vpack.c.bf16 %v9712_v34, %v9711_v48 }
 0x98c   : > { %11158 = vmatprep.subr.bf16.mxu0 %v11157_v49  ;;  %v9713_v49 = vld [vmem:[%s14120_s26 + $0x5b0] sm:$0xff] }
 0x98d   : > { %v11183_v44 = vpack.c.bf16 %v9714_v37, %v9713_v49  ;;  %v1622_v49 = vrot.slane %v14429_v12, %v1589_v8  ;;  %v9724_v37 = vld [vmem:[%s13325_s21 + $0x3] ss:$0 sm:$0xff] }
 0x98f   : > { %11160 = vmatpush3.bf16.msra.mxu0 %v11159_v51  ;;  %v11186_v51 = vpack.c.bf16 %v9716_v50, %v9715_v40  ;;  %v9744_v40 = vld [vmem:[%s14120_s26 + $0x600] sm:$0xff]  ;;  %v9745_v50 = vld [vmem:[%s14120_s26 + $0x608] sm:$0xff] }
 0x990   : > { %11162 = vmatprep.subr.bf16.mxu0 %v11161_v52  ;;  %v9717_v52 = vld [vmem:[%s14120_s26 + $0x5d0] sm:$0xff] }
 0x991   : > { %v11189_v61 = vpack.c.bf16 %v9718_v53, %v9717_v52  ;;  %v9762_v53 = vld [vmem:[%s14120_s26 + $0x690] sm:$0xff] }
 0x993   : > { %11164 = vmatpush3.bf16.msra.mxu0 %v11163_v3  ;;  %v11192_v3 = vpack.c.bf16 %v9720_v63, %v9719_v62 }
 0x994   : > { %11166 = vmatprep.subr.bf16.mxu0 %v11165_v4  ;;  %v1614_v4 = vrot.slane %v14429_v12, %v14281_v7 }
 0x996   : > { %v11448_v11 = vadd.f32 %v14040_v39, %v1614_v4  ;;  %v9727_v39 = vld [vmem:[%s13331_s12 + $0xa0] sm:$0xff] }
 0x997   : > { %11168 = vmatpush3.bf16.msra.mxu0 %v11167_v13 }
 0x998   : > { %11170 = vmatprep.subr.bf16.mxu0 %v11169_v16  ;;  %v5975_v17 = vmax.f32 %v11448_v11, 0.0  ;;  %v9764_v11 = vld [vmem:[%s14120_s26 + $0x6a0] sm:$0xff] }
 0x99b   : > { %11172 = vmatpush3.bf16.msra.mxu0 %v11171_v20  ;;  %v9726_v20 = vld [vmem:[%s13331_s12 + $0x98] sm:$0xff] }
 0x99c   : > { %11197 = vmatprep.subr.bf16.mxu0 %v12906_v32  ;;  %v11198_v41 = vpack.c.bf16 %v9726_v20, %v9725_v18  ;;  %v9766_v18 = vld [vmem:[%s14120_s26 + $0x6b0] sm:$0xff]  ;;  %v9767_v20 = vld [vmem:[%s14120_s26 + $0x6b8] sm:$0xff] }
 0x99e   : > { %7232 = vmatmul.mubr.f32.vlgmr.msra.gmra.mrb[38].mxu0 %v5973_v54  ;;  %v9728_v54 = vld [vmem:[%s13331_s12 + $0xa8] sm:$0xff] }
 0x99f   : > { %10706 = vmatprep.mubr.msk.f32.mxu0 %vm12907_vm3, %v12905_v14  ;;  %11199 = vmatpush3.bf16.msra.mxu0 %v11198_v41  ;;  %v11201_v24 = vpack.c.bf16 %v9728_v54, %v9727_v39  ;;  %v11227_v41 = vpack.c.bf16 %v9767_v20, %v9766_v18  ;;  %v9750_v54 = vld [vmem:[%s14120_s26 + $0x630] sm:$0xff]  ;;  %v9780_v20 = vld [vmem:[%s14120_s26 + $0x720] sm:$0xff] }
 0x9a0   : > { %11200 = vmatprep.subr.bf16.mxu0 %v12906_v32 }
 0x9a3   : > { %11202 = vmatpush3.bf16.msra.mxu0 %v11201_v24  ;;  %v9751_v24 = vld [vmem:[%s14120_s26 + $0x638] sm:$0xff] }
 0x9a4   : > { %11203 = vmatprep.subr.bf16.mxu0 %v12906_v32 }
 0xa51   : > { %v7015_v33 = vpop.f32.mrb[36].mxu0 }
 0xa52   : > { %v7016_v58 = vadd.f32 %v9663_v36, %v7015_v33  ;;  %v10643_v42 = vpop.f32.mrb[37].mxu0  ;;  %v11204_v36 = vpack.c.bf16 %v9730_v57, %v9729_v25  ;;  %v11215_v33 = vpack.c.bf16 %v9761_v2, %v9760_v38  ;;  %v9768_v25 = vld [vmem:[%s14120_s26 + $0x6c0] sm:$0xff]  ;;  %v9769_v57 = vld [vmem:[%s14120_s26 + $0x6c8] sm:$0xff] }
 0xa53   : > { %v9735_v42 = vld [vmem:[%s13339_s29 + $0x98] sm:$0xff]  ;;  %v11231_v38 = vpack.c.bf16 %v9769_v57, %v9768_v25 }
 0xa54   : > { %v7019_v56 = vmax.f32 %v7016_v58, 0.0  ;;  %11205 = vmatpush3.bf16.msra.mxu0 %v11204_v36  ;;  %v9734_v58 = vld [vmem:[%s13339_s29 + $0x90] sm:$0xff]  ;;  %v11229_v36 = vpack.c.bf16 %v9751_v24, %v9750_v54 }
 0xa55   : > { %11216 = vmatprep.subr.bf16.mxu0 %v11215_v33  ;;  %v9752_v2 = vld [vmem:[%s14120_s26 + $0x640] sm:$0xff]  ;;  %v9753_v33 = vld [vmem:[%s14120_s26 + $0x648] sm:$0xff]  ;;  %v9782_v54 = vld [vmem:[%s14120_s26 + $0x730] sm:$0xff] }
 0xa56   : > { %10657 = vmatmul.mubr.msk.f32.vlgmr.msra.gmra.mrb[36].mxu1 %vm6194_vm4, %v7019_v56  ;;  %v11207_v56 = vpack.c.bf16 %v9735_v42, %v9734_v58  ;;  %v9770_v58 = vld [vmem:[%s14120_s26 + $0x6d0] sm:$0xff]  ;;  %v9771_v42 = vld [vmem:[%s14120_s26 + $0x6d8] sm:$0xff]  ;;  %v9784_v57 = vld [vmem:[%s14120_s26 + $0x740] sm:$0xff] }
 0xa57   : > { %11175 = vmatpush3.bf16.msra.mxu1 %v11174_v43  ;;  %10691 = vmatprep.mubr.msk.f32.mxu1 %vm12907_vm3, %v12905_v14  ;;  %v9736_v43 = vld [vmem:[%s13339_s29 + $0xa0] sm:$0xff] }
 0xa58   : > { %11176 = vmatprep.subr.bf16.mxu1 %v12906_v32  ;;  %v11210_v46 = vpack.c.bf16 %v9737_v26, %v9736_v43  ;;  %v11233_v43 = vpack.c.bf16 %v9753_v33, %v9752_v2  ;;  %v9754_v26 = vld [vmem:[%s14120_s26 + $0x650] sm:$0xff]  ;;  %v9783_v24 = vld [vmem:[%s14120_s26 + $0x738] sm:$0xff] }
 0xa59   : > { %v11257_v25 = vpack.c.bf16 %v9783_v24, %v9782_v54  ;;  %v9786_v2 = vld [vmem:[%s14120_s26 + $0x750] sm:$0xff]  ;;  %v9787_v33 = vld [vmem:[%s14120_s26 + $0x758] sm:$0xff] }
 0xa5b   : > { %11178 = vmatpush3.bf16.msra.mxu1 %v11177_v47  ;;  %v9672_v47 = vld [vmem:[%s13341_s19 + $0x2] ss:$0 sm:$0xff] }
 0xa5c   : > { %11179 = vmatprep.subr.bf16.mxu1 %v12906_v32 }
 0xa5f   : > { %11181 = vmatpush3.bf16.msra.mxu1 %v11180_v31 }
 0xa60   : > { %11182 = vmatprep.subr.bf16.mxu1 %v12906_v32 }
 0xa63   : > { %11184 = vmatpush3.bf16.msra.mxu1 %v11183_v44 }
 0xa64   : > { %11185 = vmatprep.subr.bf16.mxu1 %v12906_v32 }
 0xa67   : > { %11187 = vmatpush3.bf16.msra.mxu1 %v11186_v51  ;;  %v11450_v51 = vadd.f32 %v14216_v55, %v1622_v49  ;;  %v11221_v55 = vpack.c.bf16 %v9747_v6, %v9746_v5  ;;  %v9756_v49 = vld [vmem:[%s14120_s26 + $0x660] sm:$0xff]  ;;  %v9732_v5 = vld [vmem:[%s13333_s28 + $0x3] ss:$0 sm:$0xff] }
 0xa68   : > { %11188 = vmatprep.subr.bf16.mxu1 %v12906_v32  ;;  %v9777_v6 = vld [vmem:[%s14120_s26 + $0x708] sm:$0xff] }
 0xa6b   : > { %11190 = vmatpush3.bf16.msra.mxu1 %v11189_v61  ;;  %v9763_v61 = vld [vmem:[%s14120_s26 + $0x698] sm:$0xff] }
 0xa6c   : > { %11191 = vmatprep.subr.bf16.mxu1 %v12906_v32  ;;  %v11219_v8 = vpack.c.bf16 %v9763_v61, %v9762_v53  ;;  %v9758_v53 = vld [vmem:[%s14120_s26 + $0x670] sm:$0xff]  ;;  %v9759_v61 = vld [vmem:[%s14120_s26 + $0x678] sm:$0xff] }
 0xa6f   : > { %11193 = vmatpush3.bf16.msra.mxu1 %v11192_v3  ;;  %v11217_v3 = vpack.c.bf16 %v9745_v50, %v9744_v40  ;;  %v9775_v40 = vld [vmem:[%s14120_s26 + $0x6f8] sm:$0xff] }
 0xa70   : > { %11194 = vmatprep.subr.bf16.mxu1 %v12906_v32 }
 0xa71   : > { %v10232_v13 = vpop.f32.mrb[38].mxu0 }
 0xa72   : > { %v10233_v15 = vpop.f32.mrb[39].mxu0 }
 0xa73   : > { %v10234_v16 = vadd.f32 %v10233_v15, %v10232_v13  ;;  %11196 = vmatpush3.bf16.msra.mxu1 %v11195_v9  ;;  %v5977_v9 = vmax.f32 %v11450_v51, 0.0  ;;  %v9765_v13 = vld [vmem:[%s14120_s26 + $0x6a8] sm:$0xff]  ;;  %v1618_v51 = vrot.slane %v14429_v12, %v14245_v45 }
 0xa74   : > { %11206 = vmatprep.subr.bf16.mxu1 %v12906_v32  ;;  %v11223_v15 = vpack.c.bf16 %v9765_v13, %v9764_v11  ;;  %v9738_v45 = vld [vmem:[%s13339_s29 + $0xb0] sm:$0xff] }
 0xa75   : > { %v7234_v44 = vadd.f32 %v10234_v16, %v9724_v37  ;;  %v9748_v16 = vld [vmem:[%s14120_s26 + $0x620] sm:$0xff]  ;;  %v9757_v37 = vld [vmem:[%s14120_s26 + $0x668] sm:$0xff] }
 0xa76   : > { %10692 = vmatmul.mubr.f32.vlgmr.msra.gmra.mrb[38].mxu1 %v5975_v17  ;;  %v9749_v17 = vld [vmem:[%s14120_s26 + $0x628] sm:$0xff]  ;;  %v11241_v50 = vpack.c.bf16 %v9757_v37, %v9756_v49 }
 0xa77   : > { %10721 = vmatprep.mubr.msk.f32.mxu1 %vm12907_vm3, %v12905_v14  ;;  %11208 = vmatpush3.bf16.msra.mxu1 %v11207_v56  ;;  %v11225_v39 = vpack.c.bf16 %v9749_v17, %v9748_v16  ;;  %v11235_v56 = vpack.c.bf16 %v9771_v42, %v9770_v58  ;;  %v9778_v16 = vld [vmem:[%s14120_s26 + $0x710] sm:$0xff]  ;;  %v9779_v17 = vld [vmem:[%s14120_s26 + $0x718] sm:$0xff]  ;;  %v11263_v58 = vpack.c.bf16 %v9787_v33, %v9786_v2  ;;  %v9788_v42 = vld [vmem:[%s14120_s26 + $0x760] sm:$0xff] }
 0xa78   : > { %11209 = vmatprep.subr.bf16.mxu1 %v12906_v32  ;;  %v11251_v18 = vpack.c.bf16 %v9779_v17, %v9778_v16  ;;  %v14652_v16 = vld [vmem:[%s13323_s15 + $0x10] sm:$0x1f] }
 0xa79   : > { %v1634_v17 = vrot.slane %v14652_v16, %v14182_v21 }
 0xa7b   : > { %11211 = vmatpush3.bf16.msra.mxu1 %v11210_v46  ;;  %v9755_v46 = vld [vmem:[%s14120_s26 + $0x658] sm:$0xff]  ;;  %v11453_v54 = vadd.f32 %v14236_v27, %v1634_v17  ;;  %v1630_v17 = vrot.slane %v14429_v12, %v1597_v0 }
 0xa7c   : > { %11212 = vmatprep.subr.bf16.mxu1 %v12906_v32  ;;  %v9808_v0 = vld [vmem:[%s13339_s29 + $0xe8] sm:$0xff] }
 0xb29   : > { %v7104_v48 = vpop.f32.mrb[36].mxu1 }
 0xb2a   : > { %v7105_v34 = vadd.f32 %v9672_v47, %v7104_v48  ;;  %v10658_v31 = vpop.f32.mrb[37].mxu1  ;;  %v9772_v47 = vld [vmem:[%s14120_s26 + $0x6e0] sm:$0xff]  ;;  %v9773_v48 = vld [vmem:[%s14120_s26 + $0x6e8] sm:$0xff] }
 0xb2b   : > { %v11239_v31 = vpack.c.bf16 %v9773_v48, %v9772_v47  ;;  %v9791_v47 = vld [vmem:[%s14120_s26 + $0x778] sm:$0xff] }
 0xb2c   : > { %9674 = vst [vmem:[%s14354_s17 + $0x4] sm:$0x3] %v7105_v34  ;;  %v11237_v34 = vpack.c.bf16 %v9755_v46, %v9754_v26  ;;  %v1626_v26 = vrot.slane %v14429_v12, %v1593_v10  ;;  %v9790_v46 = vld [vmem:[%s14120_s26 + $0x770] sm:$0xff]  ;;  %v11287_v12 = vpack.c.bf16 %v9808_v0, %v9807_v19  ;;  %v9810_v19 = vld [vmem:[%s13341_s19 + $0x4] ss:$0 sm:$0xff] }
 0xb2d   : > { %v11269_v48 = vpack.c.bf16 %v9791_v47, %v9790_v46  ;;  %v9817_v47 = vld [vmem:[%s14120_s26 + $0x7a0] sm:$0xff] }
 0xb49   : > { %v7303_v52 = vpop.f32.mrb[38].mxu1 }
 0xb4a   : > { %v7304_v62 = vadd.f32 %v7303_v52, %v7234_v44  ;;  %v10693_v63 = vpop.f32.mrb[39].mxu1  ;;  %v9774_v44 = vld [vmem:[%s14120_s26 + $0x6f0] sm:$0xff] }
 0xb4b   : > { %v11243_v52 = vpack.c.bf16 %v9775_v40, %v9774_v44  ;;  %v11449_v63 = vadd.f32 %v14212_v22, %v1618_v51  ;;  %v9776_v22 = vld [vmem:[%s14120_s26 + $0x700] sm:$0xff]  ;;  %v9794_v44 = vld [vmem:[%s13331_s12 + $0xc0] sm:$0xff] }
 0xb4c   : > { %v7307_v4 = vmax.f32 %v7304_v62, 0.0  ;;  %v11245_v62 = vpack.c.bf16 %v9759_v61, %v9758_v53  ;;  %v9795_v40 = vld [vmem:[%s13331_s12 + $0xc8] sm:$0xff]  ;;  %v9797_v51 = vld [vmem:[%s13331_s12 + $0xd8] sm:$0xff]  ;;  %v9798_v53 = vld [vmem:[%s13331_s12 + $0xe0] sm:$0xff] }
 0xb4d   : > { %v9799_v61 = vld [vmem:[%s13331_s12 + $0xe8] sm:$0xff] }
 0xb4e   : > { %10707 = vmatmul.mubr.msk.f32.vlgmr.msra.gmra.mrb[40].mxu0 %vm6194_vm4, %v7307_v4  ;;  %v9739_v4 = vld [vmem:[%s13339_s29 + $0xb8] sm:$0xff] }
 0xb4f   : > { %11218 = vmatpush3.bf16.msra.mxu0 %v11217_v3  ;;  %7608 = vmatprep.mubr.f32.mxu0 %v5977_v9  ;;  %v5976_v3 = vmax.f32 %v11449_v63, 0.0  ;;  %v9829_v63 = vld [vmem:[%s14120_s26 + $0x800] sm:$0xff] }
 0xb50   : > { %11220 = vmatprep.subr.bf16.mxu0 %v11219_v8  ;;  %v11213_v8 = vpack.c.bf16 %v9739_v4, %v9738_v45  ;;  %v9803_v4 = vld [vmem:[%s13339_s29 + $0xc0] sm:$0xff] }
 0xb52   : > { %11214 = vmatpush3.bf16.msra.mxu1 %v11213_v8  ;;  %v9804_v8 = vld [vmem:[%s13339_s29 + $0xc8] sm:$0xff] }
 0xb53   : > { %11222 = vmatpush3.bf16.msra.mxu0 %v11221_v55  ;;  %11247 = vmatprep.subr.bf16.mxu1 %v12906_v32  ;;  %v11248_v55 = vpack.c.bf16 %v9777_v6, %v9776_v22  ;;  %v11281_v22 = vpack.c.bf16 %v9804_v8, %v9803_v4  ;;  %v9806_v6 = vld [vmem:[%s13339_s29 + $0xd8] sm:$0xff] }
 0xb54   : > { %11224 = vmatprep.subr.bf16.mxu0 %v11223_v15  ;;  %v9824_v4 = vld [vmem:[%s14120_s26 + $0x7d8] sm:$0xff]  ;;  %v9841_v8 = vld [vmem:[%s14120_s26 + $0x860] sm:$0xff] }
 0xb57   : > { %11226 = vmatpush3.bf16.msra.mxu0 %v11225_v39  ;;  %v9781_v39 = vld [vmem:[%s14120_s26 + $0x728] sm:$0xff] }
 0xb58   : > { %11228 = vmatprep.subr.bf16.mxu0 %v11227_v41  ;;  %v11254_v41 = vpack.c.bf16 %v9781_v39, %v9780_v20  ;;  %v9813_v39 = vld [vmem:[%s14120_s26 + $0x780] sm:$0xff] }
 0xb5b   : > { %11230 = vmatpush3.bf16.msra.mxu0 %v11229_v36  ;;  %v9785_v36 = vld [vmem:[%s14120_s26 + $0x748] sm:$0xff] }
 0xb5c   : > { %11232 = vmatprep.subr.bf16.mxu0 %v11231_v38  ;;  %v11260_v38 = vpack.c.bf16 %v9785_v36, %v9784_v57  ;;  %v9832_v57 = vld [vmem:[%s14120_s26 + $0x818] sm:$0xff] }
 0xb5f   : > { %11234 = vmatpush3.bf16.msra.mxu0 %v11233_v43  ;;  %v9789_v43 = vld [vmem:[%s14120_s26 + $0x768] sm:$0xff] }
 0xb60   : > { %11236 = vmatprep.subr.bf16.mxu0 %v11235_v56  ;;  %v11266_v56 = vpack.c.bf16 %v9789_v43, %v9788_v42  ;;  %v9816_v42 = vld [vmem:[%s14120_s26 + $0x798] sm:$0xff]  ;;  %v5980_v43 = vmax.f32 %v11453_v54, 0.0  ;;  %v11452_v54 = vadd.f32 %v14218_v59, %v1630_v17  ;;  %v9845_v59 = vld [vmem:[%s14120_s26 + $0x880] sm:$0xff] }
 0xb63   : > { %11238 = vmatpush3.bf16.msra.mxu0 %v11237_v34  ;;  %v11451_v34 = vadd.f32 %v14214_v23, %v1626_v26  ;;  %v9796_v23 = vld [vmem:[%s13331_s12 + $0xd0] sm:$0xff] }
 0xb64   : > { %11240 = vmatprep.subr.bf16.mxu0 %v11239_v31  ;;  %v9834_v26 = vld [vmem:[%s14120_s26 + $0x828] sm:$0xff] }
 0xb65   : > { %v5978_v10 = vmax.f32 %v11451_v34, 0.0  ;;  %v9835_v34 = vld [vmem:[%s14120_s26 + $0x830] sm:$0xff] }
 0xb67   : > { %11242 = vmatpush3.bf16.msra.mxu0 %v11241_v50  ;;  %v11272_v50 = vpack.c.bf16 %v9795_v40, %v9794_v44  ;;  %v9820_v44 = vld [vmem:[%s14120_s26 + $0x7b8] sm:$0xff]  ;;  %v9837_v40 = vld [vmem:[%s14120_s26 + $0x840] sm:$0xff] }
 0xb68   : > { %11244 = vmatprep.subr.bf16.mxu0 %v11243_v52  ;;  %v11275_v52 = vpack.c.bf16 %v9797_v51, %v9796_v23  ;;  %v9838_v23 = vld [vmem:[%s14120_s26 + $0x848] sm:$0xff] }
 0xb69   : > { %v11305_v51 = vpack.c.bf16 %v9838_v23, %v9837_v40  ;;  %v9857_v40 = vld [vmem:[%s14120_s26 + $0x8e0] sm:$0xff]  ;;  %v9858_v23 = vld [vmem:[%s14120_s26 + $0x8e8] sm:$0xff] }
 0xb6b   : > { %11246 = vmatpush3.bf16.msra.mxu0 %v11245_v62  ;;  %v11278_v62 = vpack.c.bf16 %v9799_v61, %v9798_v53  ;;  %v9822_v53 = vld [vmem:[%s14120_s26 + $0x7c8] sm:$0xff]  ;;  %v9839_v61 = vld [vmem:[%s14120_s26 + $0x850] sm:$0xff] }
 0xb6c   : > { %11271 = vmatprep.subr.bf16.mxu0 %v12906_v32 }
 0xb6e   : > { %7609 = vmatmul.mubr.f32.vlgmr.msra.gmra.mrb[42].mxu0 %v5976_v3  ;;  %v9830_v3 = vld [vmem:[%s14120_s26 + $0x808] sm:$0xff] }
 0xb6f   : > { %10771 = vmatprep.mubr.msk.f32.mxu0 %vm12907_vm3, %v12905_v14  ;;  %11273 = vmatpush3.bf16.msra.mxu0 %v11272_v50  ;;  %v11289_v45 = vpack.c.bf16 %v9830_v3, %v9829_v63 }
 0xb70   : > { %11274 = vmatprep.subr.bf16.mxu0 %v12906_v32 }
 0xb73   : > { %11276 = vmatpush3.bf16.msra.mxu0 %v11275_v52  ;;  %v9821_v52 = vld [vmem:[%s14120_s26 + $0x7c0] sm:$0xff] }
 0xb74   : > { %11277 = vmatprep.subr.bf16.mxu0 %v12906_v32  ;;  %v11307_v63 = vpack.c.bf16 %v9822_v53, %v9821_v52  ;;  %v9859_v52 = vld [vmem:[%s14120_s26 + $0x8f0] sm:$0xff]  ;;  %v9860_v53 = vld [vmem:[%s14120_s26 + $0x8f8] sm:$0xff] }
 0xb77   : > { %11279 = vmatpush3.bf16.msra.mxu0 %v11278_v62  ;;  %v9840_v62 = vld [vmem:[%s14120_s26 + $0x858] sm:$0xff] }
 0xb78   : > { %11290 = vmatprep.subr.bf16.mxu0 %v11289_v45  ;;  %v11309_v3 = vpack.c.bf16 %v9840_v62, %v9839_v61  ;;  %v9823_v45 = vld [vmem:[%s14120_s26 + $0x7d0] sm:$0xff]  ;;  %v11343_v61 = vpack.c.bf16 %v9860_v53, %v9859_v52  ;;  %v9889_v52 = vld [vmem:[%s14120_s26 + $0x938] sm:$0xff]  ;;  %v9906_v53 = vld [vmem:[%s14120_s26 + $0x9c0] sm:$0xff] }
 0xc21   : > { %v7392_v9 = vpop.f32.mrb[40].mxu0 }
 0xc22   : > { %v7393_v11 = vadd.f32 %v9732_v5, %v7392_v9  ;;  %v10708_v13 = vpop.f32.mrb[41].mxu0  ;;  %v9805_v5 = vld [vmem:[%s13339_s29 + $0xd0] sm:$0xff] }
 0xc23   : > { %v11284_v9 = vpack.c.bf16 %v9806_v6, %v9805_v5  ;;  %v9842_v5 = vld [vmem:[%s14120_s26 + $0x868] sm:$0xff] }
 0xc24   : > { %v7396_v15 = vmax.f32 %v7393_v11, 0.0  ;;  %v9741_v11 = vld [vmem:[%s13341_s19 + $0x3] ss:$0 sm:$0xff]  ;;  %v11313_v6 = vpack.c.bf16 %v9842_v5, %v9841_v8  ;;  %v9864_v8 = vld [vmem:[%s13331_s12 + $0xf8] sm:$0xff] }
 0xc26   : > { %10722 = vmatmul.mubr.msk.f32.vlgmr.msra.gmra.mrb[40].mxu1 %vm6194_vm4, %v7396_v15 }
 0xc27   : > { %11249 = vmatpush3.bf16.msra.mxu1 %v11248_v55  ;;  %10756 = vmatprep.mubr.msk.f32.mxu1 %vm12907_vm3, %v12905_v14 }
 0xc28   : > { %11250 = vmatprep.subr.bf16.mxu1 %v12906_v32 }
 0xc2b   : > { %11252 = vmatpush3.bf16.msra.mxu1 %v11251_v18  ;;  %v9793_v18 = vld [vmem:[%s13325_s21 + $0x4] ss:$0 sm:$0xff] }
 0xc2c   : > { %11253 = vmatprep.subr.bf16.mxu1 %v12906_v32 }
 0xc2f   : > { %11255 = vmatpush3.bf16.msra.mxu1 %v11254_v41  ;;  %v9814_v41 = vld [vmem:[%s14120_s26 + $0x788] sm:$0xff] }
 0xc30   : > { %11256 = vmatprep.subr.bf16.mxu1 %v12906_v32  ;;  %v11291_v2 = vpack.c.bf16 %v9814_v41, %v9813_v39  ;;  %v9828_v39 = vld [vmem:[%s14120_s26 + $0x7f8] sm:$0xff] }
 0xc33   : > { %11258 = vmatpush3.bf16.msra.mxu1 %v11257_v25  ;;  %v9831_v25 = vld [vmem:[%s14120_s26 + $0x810] sm:$0xff] }
 0xc34   : > { %11259 = vmatprep.subr.bf16.mxu1 %v12906_v32  ;;  %v11293_v21 = vpack.c.bf16 %v9832_v57, %v9831_v25  ;;  %v9801_v25 = vld [vmem:[%s13333_s28 + $0x4] ss:$0 sm:$0xff] }
 0xc35   : > { %v9846_v57 = vld [vmem:[%s14120_s26 + $0x888] sm:$0xff] }
 0xc37   : > { %11261 = vmatpush3.bf16.msra.mxu1 %v11260_v38 }
 0xc38   : > { %11262 = vmatprep.subr.bf16.mxu1 %v12906_v32 }
 0xc3b   : > { %11264 = vmatpush3.bf16.msra.mxu1 %v11263_v58  ;;  %v9815_v58 = vld [vmem:[%s14120_s26 + $0x790] sm:$0xff] }
 0xc3c   : > { %11265 = vmatprep.subr.bf16.mxu1 %v12906_v32  ;;  %v11295_v27 = vpack.c.bf16 %v9816_v42, %v9815_v58  ;;  %v9847_v58 = vld [vmem:[%s14120_s26 + $0x890] sm:$0xff]  ;;  %v9848_v42 = vld [vmem:[%s14120_s26 + $0x898] sm:$0xff] }
 0xc3f   : > { %11267 = vmatpush3.bf16.msra.mxu1 %v11266_v56  ;;  %v9833_v56 = vld [vmem:[%s14120_s26 + $0x820] sm:$0xff] }
 0xc40   : > { %11268 = vmatprep.subr.bf16.mxu1 %v12906_v32  ;;  %v11297_v46 = vpack.c.bf16 %v9834_v26, %v9833_v56  ;;  %v9849_v56 = vld [vmem:[%s14120_s26 + $0x8a0] sm:$0xff]  ;;  %v9850_v26 = vld [vmem:[%s14120_s26 + $0x8a8] sm:$0xff] }
 0xc41   : > { %v10298_v31 = vpop.f32.mrb[42].mxu0 }
 0xc42   : > { %v10299_v49 = vpop.f32.mrb[43].mxu0 }
 0xc43   : > { %v10300_v37 = vadd.f32 %v10299_v49, %v10298_v31  ;;  %11270 = vmatpush3.bf16.msra.mxu1 %v11269_v48  ;;  %v9818_v48 = vld [vmem:[%s14120_s26 + $0x7a8] sm:$0xff]  ;;  %v9836_v31 = vld [vmem:[%s14120_s26 + $0x838] sm:$0xff] }
 0xc44   : > { %11280 = vmatprep.subr.bf16.mxu1 %v12906_v32  ;;  %v11299_v49 = vpack.c.bf16 %v9818_v48, %v9817_v47  ;;  %v9852_v47 = vld [vmem:[%s14120_s26 + $0x8b8] sm:$0xff] }
 0xc45   : > { %v7611_v20 = vadd.f32 %v10300_v37, %v9793_v18  ;;  %v11301_v37 = vpack.c.bf16 %v9836_v31, %v9835_v34  ;;  %v9853_v34 = vld [vmem:[%s14120_s26 + $0x8c0] sm:$0xff]  ;;  %v9854_v31 = vld [vmem:[%s14120_s26 + $0x8c8] sm:$0xff] }
 0xc46   : > { %10757 = vmatmul.mubr.f32.vlgmr.msra.gmra.mrb[42].mxu1 %v5978_v10  ;;  %v9819_v10 = vld [vmem:[%s14120_s26 + $0x7b0] sm:$0xff] }
 0xc47   : > { %10786 = vmatprep.mubr.msk.f32.mxu1 %vm12907_vm3, %v12905_v14  ;;  %11282 = vmatpush3.bf16.msra.mxu1 %v11281_v22  ;;  %v11303_v50 = vpack.c.bf16 %v9820_v44, %v9819_v10  ;;  %v11311_v22 = vpack.c.bf16 %v9824_v4, %v9823_v45  ;;  %v9856_v10 = vld [vmem:[%s14120_s26 + $0x8d8] sm:$0xff] }
 0xc48   : > { %11283 = vmatprep.subr.bf16.mxu1 %v12906_v32  ;;  %v9863_v4 = vld [vmem:[%s13331_s12 + $0xf0] sm:$0xff] }
 0xc49   : > { %v11346_v5 = vpack.c.bf16 %v9864_v8, %v9863_v4  ;;  %v9909_v4 = vld [vmem:[%s14120_s26 + $0x9d8] sm:$0xff] }
 0xc4b   : > { %11285 = vmatpush3.bf16.msra.mxu1 %v11284_v9  ;;  %v9825_v9 = vld [vmem:[%s14120_s26 + $0x7e0] sm:$0xff] }
 0xc4c   : > { %11286 = vmatprep.subr.bf16.mxu1 %v12906_v32 }
 0xc4f   : > { %11288 = vmatpush3.bf16.msra.mxu1 %v11287_v12 }
 0xc50   : > { %11321 = vmatprep.subr.bf16.mxu1 %v12906_v32 }
 0xcf9   : > { %v7481_v13 = vpop.f32.mrb[40].mxu1 }
 0xcfa   : > { %v7482_v55 = vadd.f32 %v9741_v11, %v7481_v13  ;;  %v10723_v15 = vpop.f32.mrb[41].mxu1  ;;  %v9826_v11 = vld [vmem:[%s14120_s26 + $0x7e8] sm:$0xff]  ;;  %v9843_v13 = vld [vmem:[%s14120_s26 + $0x870] sm:$0xff] }
 0xcfb   : > { %v11315_v15 = vpack.c.bf16 %v9826_v11, %v9825_v9  ;;  %v9867_v9 = vld [vmem:[%s13331_s12 + $0x110] sm:$0xff]  ;;  %v9868_v11 = vld [vmem:[%s13331_s12 + $0x118] sm:$0xff] }
 0xcfc   : > { %9743 = vst [vmem:[%s14354_s17 + $0x6] sm:$0x3] %v7482_v55  ;;  %v9844_v55 = vld [vmem:[%s14120_s26 + $0x878] sm:$0xff] }
 0xcfd   : > { %v11317_v18 = vpack.c.bf16 %v9844_v55, %v9843_v13  ;;  %v11352_v13 = vpack.c.bf16 %v9868_v11, %v9867_v9  ;;  %v9898_v55 = vld [vmem:[%s14120_s26 + $0x980] sm:$0xff]  ;;  %v9911_v9 = vld [vmem:[%s14120_s26 + $0x9e8] sm:$0xff] }
 0xd19   : > { %v7680_v24 = vpop.f32.mrb[42].mxu1 }
 0xd1a   : > { %v7681_v36 = vadd.f32 %v7680_v24, %v7611_v20  ;;  %v10758_v38 = vpop.f32.mrb[43].mxu1  ;;  %v9827_v20 = vld [vmem:[%s14120_s26 + $0x7f0] sm:$0xff]  ;;  %v5979_v24 = vmax.f32 %v11452_v54, 0.0 }
 0xd1b   : > { %v11319_v41 = vpack.c.bf16 %v9828_v39, %v9827_v20  ;;  %v9873_v20 = vld [vmem:[%s13339_s29 + $0xf8] sm:$0xff]  ;;  %v9874_v39 = vld [vmem:[%s13339_s29 + $0x100] sm:$0xff]  ;;  %v9875_v54 = vld [vmem:[%s13339_s29 + $0x108] sm:$0xff] }
 0xd1c   : > { %v7684_v33 = vmax.f32 %v7681_v36, 0.0 }
 0xd1e   : > { %10772 = vmatmul.mubr.msk.f32.vlgmr.msra.gmra.mrb[44].mxu0 %vm6194_vm4, %v7684_v33  ;;  %v11322_v33 = vpack.c.bf16 %v9846_v57, %v9845_v59  ;;  %v1646_v59 = vrot.slane %v14652_v16, %v14281_v7  ;;  %v9862_v57 = vld [vmem:[%s13325_s21 + $0x5] ss:$0 sm:$0xff] }
 0xd1f   : > { %11292 = vmatpush3.bf16.msra.mxu0 %v11291_v2  ;;  %7985 = vmatprep.mubr.f32.mxu0 %v5980_v43  ;;  %v11325_v43 = vpack.c.bf16 %v9848_v42, %v9847_v58  ;;  %v9900_v58 = vld [vmem:[%s14120_s26 + $0x990] sm:$0xff]  ;;  %v9901_v42 = vld [vmem:[%s14120_s26 + $0x998] sm:$0xff] }
 0xd20   : > { %11294 = vmatprep.subr.bf16.mxu0 %v11293_v21  ;;  %v11367_v7 = vpack.c.bf16 %v9901_v42, %v9900_v58  ;;  %v9916_v58 = vld [vmem:[%s14120_s26 + $0xa10] sm:$0xff]  ;;  %v9917_v42 = vld [vmem:[%s14120_s26 + $0xa18] sm:$0xff] }
 0xd23   : > { %11296 = vmatpush3.bf16.msra.mxu0 %v11295_v27  ;;  %v11328_v27 = vpack.c.bf16 %v9850_v26, %v9849_v56 }
 0xd24   : > { %11298 = vmatprep.subr.bf16.mxu0 %v11297_v46  ;;  %v9851_v46 = vld [vmem:[%s14120_s26 + $0x8b0] sm:$0xff] }
 0xd25   : > { %v11331_v48 = vpack.c.bf16 %v9852_v47, %v9851_v46  ;;  %v9884_v46 = vld [vmem:[%s14120_s26 + $0x910] sm:$0xff]  ;;  %v9885_v47 = vld [vmem:[%s14120_s26 + $0x918] sm:$0xff] }
 0xd27   : > { %11300 = vmatpush3.bf16.msra.mxu0 %v11299_v49  ;;  %v11334_v49 = vpack.c.bf16 %v9854_v31, %v9853_v34  ;;  %v9902_v34 = vld [vmem:[%s14120_s26 + $0x9a0] sm:$0xff]  ;;  %v9903_v31 = vld [vmem:[%s14120_s26 + $0x9a8] sm:$0xff] }
 0xd28   : > { %11302 = vmatprep.subr.bf16.mxu0 %v11301_v37  ;;  %v9855_v37 = vld [vmem:[%s14120_s26 + $0x8d0] sm:$0xff] }
 0xd29   : > { %v11337_v44 = vpack.c.bf16 %v9856_v10, %v9855_v37  ;;  %v9886_v37 = vld [vmem:[%s14120_s26 + $0x920] sm:$0xff]  ;;  %v9887_v10 = vld [vmem:[%s14120_s26 + $0x928] sm:$0xff] }
 0xd2b   : > { %11304 = vmatpush3.bf16.msra.mxu0 %v11303_v50  ;;  %v11340_v50 = vpack.c.bf16 %v9858_v23, %v9857_v40  ;;  %v9905_v40 = vld [vmem:[%s14120_s26 + $0x9b8] sm:$0xff]  ;;  %v11373_v23 = vpack.c.bf16 %v9887_v10, %v9886_v37  ;;  %v9926_v10 = vld [vmem:[%s14120_s26 + $0xa60] sm:$0xff] }
 0xd2c   : > { %11306 = vmatprep.subr.bf16.mxu0 %v11305_v51  ;;  %v1638_v51 = vrot.slane %v14652_v16, %v14115_v1 }
 0xd2e   : > { %v11454_v62 = vadd.f32 %v14240_v29, %v1638_v51  ;;  %v9865_v29 = vld [vmem:[%s13331_s12 + $0x100] sm:$0xff]  ;;  %v9888_v51 = vld [vmem:[%s14120_s26 + $0x930] sm:$0xff] }
 0xd2f   : > { %11308 = vmatpush3.bf16.msra.mxu0 %v11307_v63 }
 0xd30   : > { %11310 = vmatprep.subr.bf16.mxu0 %v11309_v3  ;;  %v5981_v1 = vmax.f32 %v11454_v62, 0.0  ;;  %v11377_v62 = vpack.c.bf16 %v9889_v52, %v9888_v51 }
 0xd33   : > { %11312 = vmatpush3.bf16.msra.mxu0 %v11311_v22  ;;  %v9866_v22 = vld [vmem:[%s13331_s12 + $0x108] sm:$0xff] }
 0xd34   : > { %11314 = vmatprep.subr.bf16.mxu0 %v11313_v6  ;;  %v11349_v6 = vpack.c.bf16 %v9866_v22, %v9865_v29  ;;  %v9893_v22 = vld [vmem:[%s14120_s26 + $0x958] sm:$0xff] }
 0xd37   : > { %11316 = vmatpush3.bf16.msra.mxu0 %v11315_v15  ;;  %v9899_v15 = vld [vmem:[%s14120_s26 + $0x988] sm:$0xff] }
 0xd38   : > { %11318 = vmatprep.subr.bf16.mxu0 %v11317_v18  ;;  %v11363_v17 = vpack.c.bf16 %v9899_v15, %v9898_v55  ;;  %v9872_v18 = vld [vmem:[%s13339_s29 + $0xf0] sm:$0xff] }
 0xd39   : > { %v9894_v55 = vld [vmem:[%s14120_s26 + $0x960] sm:$0xff]  ;;  %v9895_v15 = vld [vmem:[%s14120_s26 + $0x968] sm:$0xff] }
 0xd3b   : > { %11320 = vmatpush3.bf16.msra.mxu0 %v11319_v41  ;;  %v11355_v41 = vpack.c.bf16 %v9873_v20, %v9872_v18  ;;  %v9913_v18 = vld [vmem:[%s14120_s26 + $0x9f8] sm:$0xff]  ;;  %v11389_v20 = vpack.c.bf16 %v9895_v15, %v9894_v55 }
 0xd3c   : > { %11345 = vmatprep.subr.bf16.mxu0 %v12906_v32  ;;  %v9879_v55 = vld [vmem:[%s13341_s19 + $0x5] ss:$0 sm:$0xff] }
 0xd3e   : > { %7986 = vmatmul.mubr.f32.vlgmr.msra.gmra.mrb[46].mxu0 %v5979_v24  ;;  %v11358_v24 = vpack.c.bf16 %v9875_v54, %v9874_v39  ;;  %v1642_v39 = vrot.slane %v14652_v16, %v14188_v35  ;;  %v9896_v54 = vld [vmem:[%s14120_s26 + $0x970] sm:$0xff] }
 0xd3f   : > { %10836 = vmatprep.mubr.msk.f32.mxu0 %vm12907_vm3, %v12905_v14  ;;  %11347 = vmatpush3.bf16.msra.mxu0 %v11346_v5  ;;  %v9892_v5 = vld [vmem:[%s14120_s26 + $0x950] sm:$0xff] }
 0xd40   : > { %11348 = vmatprep.subr.bf16.mxu0 %v12906_v32  ;;  %v11385_v11 = vpack.c.bf16 %v9893_v22, %v9892_v5  ;;  %v9876_v35 = vld [vmem:[%s13339_s29 + $0x110] sm:$0xff]  ;;  %v9877_v16 = vld [vmem:[%s13339_s29 + $0x118] sm:$0xff]  ;;  %v9942_v22 = vld [vmem:[%s13339_s29 + $0x128] sm:$0xff] }
 0xd43   : > { %11350 = vmatpush3.bf16.msra.mxu0 %v11349_v6  ;;  %v9910_v6 = vld [vmem:[%s14120_s26 + $0x9e0] sm:$0xff] }
 0xd44   : > { %11351 = vmatprep.subr.bf16.mxu0 %v12906_v32 }
 0xd47   : > { %11353 = vmatpush3.bf16.msra.mxu0 %v11352_v13  ;;  %v11387_v13 = vpack.c.bf16 %v9911_v9, %v9910_v6  ;;  %v9943_v6 = vld [vmem:[%s13339_s29 + $0x130] sm:$0xff] }
 0xd48   : > { %11364 = vmatprep.subr.bf16.mxu0 %v11363_v17  ;;  %v9912_v17 = vld [vmem:[%s14120_s26 + $0x9f0] sm:$0xff] }
 0xdf1   : > { %v7769_v36 = vpop.f32.mrb[44].mxu0 }
 0xdf2   : > { %v7770_v38 = vadd.f32 %v9801_v25, %v7769_v36  ;;  %v10773_v2 = vpop.f32.mrb[45].mxu0 }
 0xdf3   : > { %v9883_v2 = vld [vmem:[%s14120_s26 + $0x908] sm:$0xff] }
 0xdf4   : > { %v7773_v21 = vmax.f32 %v7770_v38, 0.0  ;;  %v9882_v38 = vld [vmem:[%s14120_s26 + $0x900] sm:$0xff] }
 0xdf5   : > { %v11365_v26 = vpack.c.bf16 %v9883_v2, %v9882_v38 }
 0xdf6   : > { %10787 = vmatmul.mubr.msk.f32.vlgmr.msra.gmra.mrb[44].mxu1 %vm6194_vm4, %v7773_v21 }
 0xdf7   : > { %11323 = vmatpush3.bf16.msra.mxu1 %v11322_v33  ;;  %10821 = vmatprep.mubr.msk.f32.mxu1 %vm12907_vm3, %v12905_v14  ;;  %v11456_v33 = vadd.f32 %v14242_v30, %v1646_v59  ;;  %v11369_v30 = vpack.c.bf16 %v9885_v47, %v9884_v46  ;;  %v9870_v59 = vld [vmem:[%s13333_s28 + $0x5] ss:$0 sm:$0xff]  ;;  %v9921_v46 = vld [vmem:[%s14120_s26 + $0xa38] sm:$0xff] }
 0xdf8   : > { %11324 = vmatprep.subr.bf16.mxu1 %v12906_v32 }
 0xdfb   : > { %11326 = vmatpush3.bf16.msra.mxu1 %v11325_v43 }
 0xdfc   : > { %11327 = vmatprep.subr.bf16.mxu1 %v12906_v32 }
 0xdff   : > { %11329 = vmatpush3.bf16.msra.mxu1 %v11328_v27 }
 0xe00   : > { %11330 = vmatprep.subr.bf16.mxu1 %v12906_v32 }
 0xe03   : > { %11332 = vmatpush3.bf16.msra.mxu1 %v11331_v48  ;;  %v5983_v48 = vmax.f32 %v11456_v33, 0.0 }
 0xe04   : > { %11333 = vmatprep.subr.bf16.mxu1 %v12906_v32 }
 0xe07   : > { %11335 = vmatpush3.bf16.msra.mxu1 %v11334_v49  ;;  %v11371_v49 = vpack.c.bf16 %v9903_v31, %v9902_v34  ;;  %v9923_v34 = vld [vmem:[%s14120_s26 + $0xa48] sm:$0xff] }
 0xe08   : > { %11336 = vmatprep.subr.bf16.mxu1 %v12906_v32 }
 0xe0b   : > { %11338 = vmatpush3.bf16.msra.mxu1 %v11337_v44  ;;  %v9904_v44 = vld [vmem:[%s14120_s26 + $0x9b0] sm:$0xff] }
 0xe0c   : > { %11339 = vmatprep.subr.bf16.mxu1 %v12906_v32 }
 0xe0f   : > { %11341 = vmatpush3.bf16.msra.mxu1 %v11340_v50  ;;  %v11375_v50 = vpack.c.bf16 %v9905_v40, %v9904_v44  ;;  %v9927_v44 = vld [vmem:[%s14120_s26 + $0xa68] sm:$0xff] }
 0xe10   : > { %11342 = vmatprep.subr.bf16.mxu1 %v12906_v32  ;;  %v11414_v40 = vpack.c.bf16 %v9927_v44, %v9926_v10 }
 0xe11   : > { %v10364_v63 = vpop.f32.mrb[46].mxu0 }
 0xe12   : > { %v10365_v3 = vpop.f32.mrb[47].mxu0 }
 0xe13   : > { %v10366_v45 = vadd.f32 %v10365_v3, %v10364_v63  ;;  %11344 = vmatpush3.bf16.msra.mxu1 %v11343_v61  ;;  %v9907_v61 = vld [vmem:[%s14120_s26 + $0x9c8] sm:$0xff]  ;;  %v9890_v3 = vld [vmem:[%s14120_s26 + $0x940] sm:$0xff] }
 0xe14   : > { %11354 = vmatprep.subr.bf16.mxu1 %v12906_v32  ;;  %v11379_v63 = vpack.c.bf16 %v9907_v61, %v9906_v53 }
 0xe15   : > { %v7988_v36 = vadd.f32 %v10366_v45, %v9862_v57  ;;  %v9891_v45 = vld [vmem:[%s14120_s26 + $0x948] sm:$0xff] }
 0xe16   : > { %10822 = vmatmul.mubr.f32.vlgmr.msra.gmra.mrb[46].mxu1 %v5981_v1  ;;  %v9908_v1 = vld [vmem:[%s14120_s26 + $0x9d0] sm:$0xff]  ;;  %v11381_v8 = vpack.c.bf16 %v9891_v45, %v9890_v3  ;;  %v9915_v57 = vld [vmem:[%s14120_s26 + $0xa08] sm:$0xff] }
 0xe17   : > { %10851 = vmatprep.mubr.msk.f32.mxu1 %vm12907_vm3, %v12905_v14  ;;  %11356 = vmatpush3.bf16.msra.mxu1 %v11355_v41  ;;  %v11383_v29 = vpack.c.bf16 %v9909_v4, %v9908_v1  ;;  %v11391_v41 = vpack.c.bf16 %v9913_v18, %v9912_v17  ;;  %v9933_v3 = vld [vmem:[%s13331_s12 + $0x128] sm:$0xff]  ;;  %v9934_v45 = vld [vmem:[%s13331_s12 + $0x130] sm:$0xff]  ;;  %v9935_v4 = vld [vmem:[%s13331_s12 + $0x138] sm:$0xff] }
 0xe18   : > { %11357 = vmatprep.subr.bf16.mxu1 %v12906_v32 }
 0xe1b   : > { %11359 = vmatpush3.bf16.msra.mxu1 %v11358_v24  ;;  %v9897_v24 = vld [vmem:[%s14120_s26 + $0x978] sm:$0xff] }
 0xe1c   : > { %11360 = vmatprep.subr.bf16.mxu1 %v12906_v32 }
 0xec9   : > { %v7858_v0 = vpop.f32.mrb[44].mxu1 }
 0xeca   : > { %v7859_v12 = vadd.f32 %v9810_v19, %v7858_v0  ;;  %v10788_v25 = vpop.f32.mrb[45].mxu1  ;;  %v11393_v19 = vpack.c.bf16 %v9897_v24, %v9896_v54  ;;  %v11455_v0 = vadd.f32 %v14238_v28, %v1642_v39  ;;  %v9914_v28 = vld [vmem:[%s14120_s26 + $0xa00] sm:$0xff] }
 0xecb   : > { %v11361_v25 = vpack.c.bf16 %v9877_v16, %v9876_v35  ;;  %v11396_v33 = vpack.c.bf16 %v9915_v57, %v9914_v28  ;;  %v9948_v57 = vld [vmem:[%s13341_s19 + $0x6] ss:$0 sm:$0xff] }
 0xecc   : > { %9812 = vst [vmem:[%s14354_s17 + $0x8] sm:$0x3] %v7859_v12  ;;  %v5982_v12 = vmax.f32 %v11455_v0, 0.0  ;;  %v9945_v0 = vld [vmem:[%s13339_s29 + $0x140] sm:$0xff] }
 0xecd   : > { %11362 = vmatpush3.bf16.msra.mxu1 %v11361_v25 }
 0xece   : > { %11395 = vmatprep.subr.bf16.mxu1 %v12906_v32 }
 0xee9   : > { %v8057_v21 = vpop.f32.mrb[46].mxu1 }
 0xeea   : > { %v8058_v43 = vadd.f32 %v8057_v21, %v7988_v36  ;;  %v10823_v56 = vpop.f32.mrb[47].mxu1 }
 0xeeb   : > { %v9918_v56 = vld [vmem:[%s14120_s26 + $0xa20] sm:$0xff] }
 0xeec   : > { %v8061_v27 = vmax.f32 %v8058_v43, 0.0  ;;  %v11399_v43 = vpack.c.bf16 %v9917_v42, %v9916_v58 }
 0xeee   : > { %10837 = vmatmul.mubr.msk.f32.vlgmr.msra.gmra.mrb[48].mxu0 %vm6194_vm4, %v8061_v27 }
 0xeef   : > { %11366 = vmatpush3.bf16.msra.mxu0 %v11365_v26  ;;  %8362 = vmatprep.mubr.f32.mxu0 %v5983_v48  ;;  %v9919_v26 = vld [vmem:[%s14120_s26 + $0xa28] sm:$0xff]  ;;  %v9922_v48 = vld [vmem:[%s14120_s26 + $0xa40] sm:$0xff] }
 0xef0   : > { %11368 = vmatprep.subr.bf16.mxu0 %v11367_v7  ;;  %v11402_v27 = vpack.c.bf16 %v9919_v26, %v9918_v56  ;;  %v9920_v7 = vld [vmem:[%s14120_s26 + $0xa30] sm:$0xff]  ;;  %v11408_v31 = vpack.c.bf16 %v9923_v34, %v9922_v48 }
 0xef1   : > { %v11405_v47 = vpack.c.bf16 %v9921_v46, %v9920_v7 }
 0xef3   : > { %11370 = vmatpush3.bf16.msra.mxu0 %v11369_v30  ;;  %v9924_v30 = vld [vmem:[%s14120_s26 + $0xa50] sm:$0xff] }
 0xef4   : > { %11372 = vmatprep.subr.bf16.mxu0 %v11371_v49  ;;  %v9925_v49 = vld [vmem:[%s14120_s26 + $0xa58] sm:$0xff] }
 0xef5   : > { %v11411_v37 = vpack.c.bf16 %v9925_v49, %v9924_v30 }
 0xef7   : > { %11374 = vmatpush3.bf16.msra.mxu0 %v11373_v23  ;;  %v9928_v23 = vld [vmem:[%s14120_s26 + $0xa70] sm:$0xff] }
 0xef8   : > { %11376 = vmatprep.subr.bf16.mxu0 %v11375_v50  ;;  %v9929_v50 = vld [vmem:[%s14120_s26 + $0xa78] sm:$0xff] }
 0xef9   : > { %v11417_v51 = vpack.c.bf16 %v9929_v50, %v9928_v23 }
 0xefb   : > { %11378 = vmatpush3.bf16.msra.mxu0 %v11377_v62  ;;  %v5984_v62 = vmax.f32 %v14249_v60, 0.0  ;;  %v9936_v60 = vld [vmem:[%s13331_s12 + $0x140] sm:$0xff] }
 0xefc   : > { %11380 = vmatprep.subr.bf16.mxu0 %v11379_v63  ;;  %v9932_v63 = vld [vmem:[%s13331_s12 + $0x120] sm:$0xff] }
 0xefd   : > { %v11420_v1 = vpack.c.bf16 %v9933_v3, %v9932_v63 }
 0xeff   : > { %11382 = vmatpush3.bf16.msra.mxu0 %v11381_v8  ;;  %v11423_v8 = vpack.c.bf16 %v9935_v4, %v9934_v45 }
 0xf00   : > { %11384 = vmatprep.subr.bf16.mxu0 %v11383_v29  ;;  %v9937_v29 = vld [vmem:[%s13331_s12 + $0x148] sm:$0xff] }
 0xf01   : > { %v11426_v5 = vpack.c.bf16 %v9937_v29, %v9936_v60 }
 0xf03   : > { %11386 = vmatpush3.bf16.msra.mxu0 %v11385_v11  ;;  %v9944_v11 = vld [vmem:[%s13339_s29 + $0x138] sm:$0xff] }
 0xf04   : > { %11388 = vmatprep.subr.bf16.mxu0 %v11387_v13  ;;  %v11432_v13 = vpack.c.bf16 %v9944_v11, %v9943_v6 }
 0xf07   : > { %11390 = vmatpush3.bf16.msra.mxu0 %v11389_v20  ;;  %v9931_v20 = vld [vmem:[%s13325_s21 + $0x6] ss:$0 sm:$0xff] }
 0xf08   : > { %11392 = vmatprep.subr.bf16.mxu0 %v11391_v41 }
 0xf0b   : > { %11394 = vmatpush3.bf16.msra.mxu0 %v11393_v19 }
 0xf0c   : > { %11419 = vmatprep.subr.bf16.mxu0 %v12906_v32 }
 0xf0e   : > { %8363 = vmatmul.mubr.f32.vlgmr.msra.gmra.mrb[50].mxu0 %v5982_v12  ;;  %v9946_v12 = vld [vmem:[%s13339_s29 + $0x148] sm:$0xff] }
 0xf0f   : > { %10901 = vmatprep.mubr.msk.f32.mxu0 %vm12907_vm3, %v12905_v14  ;;  %11421 = vmatpush3.bf16.msra.mxu0 %v11420_v1  ;;  %v11435_v35 = vpack.c.bf16 %v9946_v12, %v9945_v0 }
 0xf10   : > { %11422 = vmatprep.subr.bf16.mxu0 %v12906_v32 }
 0xf13   : > { %11424 = vmatpush3.bf16.msra.mxu0 %v11423_v8 }
 0xf14   : > { %11425 = vmatprep.subr.bf16.mxu0 %v12906_v32 }
 0xf17   : > { %11427 = vmatpush3.bf16.msra.mxu0 %v11426_v5 }
 0xfc1   : > { %v8146_v36 = vpop.f32.mrb[48].mxu0 }
 0xfc2   : > { %v8147_v38 = vadd.f32 %v9870_v59, %v8146_v36  ;;  %v10838_v2 = vpop.f32.mrb[49].mxu0 }
 0xfc4   : > { %v8150_v21 = vmax.f32 %v8147_v38, 0.0 }
 0xfc6   : > { %10852 = vmatmul.mubr.msk.f32.vlgmr.msra.gmra.mrb[48].mxu1 %vm6194_vm4, %v8150_v21 }
 0xfc7   : > { %11397 = vmatpush3.bf16.msra.mxu1 %v11396_v33  ;;  %10886 = vmatprep.mubr.msk.f32.mxu1 %vm12907_vm3, %v12905_v14 }
 0xfc8   : > { %11398 = vmatprep.subr.bf16.mxu1 %v12906_v32 }
 0xfcb   : > { %11400 = vmatpush3.bf16.msra.mxu1 %v11399_v43 }
 0xfcc   : > { %11401 = vmatprep.subr.bf16.mxu1 %v12906_v32 }
 0xfcf   : > { %11403 = vmatpush3.bf16.msra.mxu1 %v11402_v27 }
 0xfd0   : > { %11404 = vmatprep.subr.bf16.mxu1 %v12906_v32 }
 0xfd3   : > { %11406 = vmatpush3.bf16.msra.mxu1 %v11405_v47 }
 0xfd4   : > { %11407 = vmatprep.subr.bf16.mxu1 %v12906_v32 }
 0xfd7   : > { %11409 = vmatpush3.bf16.msra.mxu1 %v11408_v31 }
 0xfd8   : > { %11410 = vmatprep.subr.bf16.mxu1 %v12906_v32 }
 0xfdb   : > { %11412 = vmatpush3.bf16.msra.mxu1 %v11411_v37 }
 0xfdc   : > { %11413 = vmatprep.subr.bf16.mxu1 %v12906_v32 }
 0xfdf   : > { %11415 = vmatpush3.bf16.msra.mxu1 %v11414_v40 }
 0xfe0   : > { %11416 = vmatprep.subr.bf16.mxu1 %v12906_v32 }
 0xfe1   : > { %v10430_v52 = vpop.f32.mrb[50].mxu0 }
 0xfe2   : > { %v10431_v53 = vpop.f32.mrb[51].mxu0 }
 0xfe3   : > { %v10432_v61 = vadd.f32 %v10431_v53, %v10430_v52  ;;  %11418 = vmatpush3.bf16.msra.mxu1 %v11417_v51 }
 0xfe4   : > { %11428 = vmatprep.subr.bf16.mxu1 %v12906_v32 }
 0xfe5   : > { %v8365_v39 = vadd.f32 %v10432_v61, %v9931_v20 }
 0xfe6   : > { %10887 = vmatmul.mubr.f32.vlgmr.msra.gmra.mrb[50].mxu1 %v5984_v62 }
 0xfe7   : > { %10916 = vmatprep.mubr.msk.f32.mxu1 %vm12907_vm3, %v12905_v14  ;;  %v9941_v14 = vld [vmem:[%s13339_s29 + $0x120] sm:$0xff] }
 0xfe8   : > { %v11429_v9 = vpack.c.bf16 %v9942_v22, %v9941_v14 }
 0xfea   : > { %11430 = vmatpush3.bf16.msra.mxu1 %v11429_v9 }
 0xfeb   : > { %11431 = vmatprep.subr.bf16.mxu1 %v12906_v32 }
 0xfee   : > { %11433 = vmatpush3.bf16.msra.mxu1 %v11432_v13 }
 0xfef   : > { %11434 = vmatprep.subr.bf16.mxu1 %v12906_v32  ;;  %v9939_v32 = vld [vmem:[%s13333_s28 + $0x6] ss:$0 sm:$0xff] }
 0xff2   : > { %11436 = vmatpush3.bf16.msra.mxu1 %v11435_v35 }
0x1099   : > { %v8235_v15 = vpop.f32.mrb[48].mxu1 }
0x109a   : > { %v8236_v17 = vadd.f32 %v9879_v55, %v8235_v15  ;;  %v10853_v18 = vpop.f32.mrb[49].mxu1 }
0x109c   : > { %9881 = vst [vmem:[%s14354_s17 + $0xa] sm:$0x3] %v8236_v17 }
0x10b9   : > { %v8434_v41 = vpop.f32.mrb[50].mxu1 }
0x10ba   : > { %v8435_v54 = vadd.f32 %v8434_v41, %v8365_v39  ;;  %v10888_v24 = vpop.f32.mrb[51].mxu1 }
0x10bc   : > { %v8438_v19 = vmax.f32 %v8435_v54, 0.0 }
0x10be   : > { %10902 = vmatmul.mubr.msk.f32.vlgmr.msra.gmra.mrb[52].mxu0 %vm6194_vm4, %v8438_v19 }
0x1191   : > { %v8523_v16 = vpop.f32.mrb[52].mxu0 }
0x1192   : > { %v8524_v25 = vadd.f32 %v9939_v32, %v8523_v16  ;;  %v10903_v59 = vpop.f32.mrb[53].mxu0 }
0x1194   : > { %v8527_v28 = vmax.f32 %v8524_v25, 0.0 }
0x1196   : > { %10917 = vmatmul.mubr.msk.f32.vlgmr.msra.gmra.mrb[52].mxu1 %vm6194_vm4, %v8527_v28 }
0x1269   : > { %v8612_v36 = vpop.f32.mrb[52].mxu1 }
0x126a   : > { %v8613_v38 = vadd.f32 %v9948_v57, %v8612_v36  ;;  %v10918_v2 = vpop.f32.mrb[53].mxu1 }
0x126c   : > { %9950 = vst [vmem:[%s14354_s17 + $0xc] sm:$0x3] %v8613_v38 }
0x126d PF: > { %s14919_s16 = sld [smem:[#allocation21_spill]]  ;;  %s14920_s15 = sld [smem:[#allocation20_spill]] }
0x126e   : > { %s14921_s21 = sld [smem:[#allocation22_spill]]  ;;  %s14922_s13 = smov %s12880_s14 }
0x1273   : > { %p30_p3 = scmp.ge.s32.totalorder %s14919_s16, 4   ;;  %s14923_s14 = smov %s14920_s15 }
0x1274   : > { %s14924_s15 = smov %s14921_s21 }
0x1275   :  { %32 = sbr.rel (!%p30_p3) target bundleno = 16 (0x10), region = 222 }
0x127c   :  { %8640 = vsyncpa [#allocation3], 1 }
0x127d   :  { %8642 = vsyncpa [#allocation3 + $0x1], 1 }
0x127e   :  { %8643 = vsyncpa [#allocation5], 1 }
0x127f   :  { %8645 = vsyncpa [#allocation5 + $0x1], 1 }
0x1280   :  { %8646 = vsyncpa [#allocation8], 1 }
0x1281   :  { %8648 = vsyncpa [#allocation8 + $0x1], 1 }
0x1282   :  { %8649 = vsyncpa [#allocation11], 1 }
0x1283   :  { %8651 = vsyncpa [#allocation11 + $0x1], 1 }
0x1284   :  { %8652 = vsyncpa [#allocation14], 1 }
0x1285   :  { %8654 = vsyncpa [#allocation14 + $0x1], 1 }

</bundles_post_ra>
